<compile_context>
chip_gen: v5e
topology: v5e:2x2
jax: 0.10.0
libtpu: 0.0.40
codegen_flags: <defaults>
</compile_context>

<pallas_src>
import numpy as np

import jax
import jax.numpy as jnp
from jax.experimental import pallas as pl
from jax.experimental.pallas import tpu as pltpu


# ---------------------------------------------------------------------------
# Static layer geometry (input 24x24 -> 12x12 -> 6x6 -> 3x3, chans 1/16/32/8).
# Activations inside the kernel are "flat": (channels, h*stride + w) with
# stride = W + 2 (the zero-padding ring is folded into the layout).
# ---------------------------------------------------------------------------
def _geom(H, W):
    S = W + 2                   # flat row stride of the padded layout
    L = H * S                   # conv-output positions we pool over
    Lc = L + S + 1              # conv-output positions we must compute
    plen = Lc + 2 * S + 2       # padded-flat source length the conv reads
    return S, L, Lc, plen


_S1, _L1, _LC1, _P1LEN = _geom(24, 24)     # 26, 624, 651, 705
_S2, _L2, _LC2, _P2LEN = _geom(12, 12)     # 14, 168, 183, 213
_S3, _L3, _LC3, _P3LEN = _geom(6, 6)       #  8,  48,  57,  75
_X_ROWS = 28                               # 24 rows + 1 top pad + 3 bottom pad/slack
_X_FLAT = _X_ROWS * _S1                    # 728 >= _P1LEN


# ---------------------------------------------------------------------------
# Fused kernel: full forward pass for one image.
# ---------------------------------------------------------------------------
def _fused_forward_kernel(
    x_ref,                                   # (1, 1, 728)  f32 padded-flat image
    wc1_ref, bc1_ref,                        # (32, 9)   bf16, (32, 1) f32
    wc2_ref, bc2_ref,                        # (64, 144) bf16, (64, 1) f32
    wc3_ref, bc3_ref,                        # (16, 288) bf16, (16, 1) f32
    sel1_ref, sel2_ref, sel3_ref,            # f32 0/1 pool/downsample/pad matrices
    w1_ref, b1_ref,                          # (8, 9, 128) bf16, (1, 128) f32
    w2_ref, b2_ref,                          # (128, 64)  bf16, (1, 64)  f32
    w3_ref, b3_ref,                          # (64, 10)   bf16, (1, 10)  f32
    o_ref,                                   # (1, 1, 10) f32
    p_scr,                                   # (288, 656) f32  im2col patch matrix
    y_scr,                                   # (32, 656)  f32  relu(gated conv) map
    xpad_scr,                                # (32, 216)  f32  next layer padded-flat input
    f_scr,                                   # (8, 128)   f32  pooled layer-3 features
):
    def gated_conv_pool(read_src, H, W, Cin, Cout, wc_ref, bc_ref):
        """attentionLayer + ReLU + 2x2 neighbour max, in the flat layout."""
        S = W + 2
        L = H * S
        Lc = L + S + 1
        # im2col: 9 shifted (Cin, Lc) slabs -> rows [tap*Cin, (tap+1)*Cin) of p_scr.
        for dy in range(3):
            for dx in range(3):
                tap = dy * 3 + dx
                p_scr[pl.ds(tap * Cin, Cin), pl.ds(0, Lc)] = read_src(dy * S + dx, Lc)
        patches = p_scr[pl.ds(0, 9 * Cin), pl.ds(0, Lc)].astype(jnp.bfloat16)
        # one MXU dot for feature-conv and attention-conv together (K = 9*Cin).
        acc = jnp.dot(wc_ref[...], patches, preferred_element_type=jnp.float32)
        acc = acc + bc_ref[...]                            # (2*Cout, Lc)
        feat = acc[0:Cout, :]
        gate = jax.nn.sigmoid(acc[Cout:2 * Cout, :])
        y = jnp.maximum(feat * gate, 0.0)                  # ReLU(attention(x))
        y_scr[pl.ds(0, Cout), pl.ds(0, Lc)] = y
        # 2x2 neighbour max.  Only even (h, w) positions are meaningful; junk
        # positions are killed by the all-zero rows of the selection matmul.
        m = jnp.maximum(
            jnp.maximum(y_scr[pl.ds(0, Cout), pl.ds(0, L)],
                        y_scr[pl.ds(0, Cout), pl.ds(1, L)]),
            jnp.maximum(y_scr[pl.ds(0, Cout), pl.ds(S, L)],
                        y_scr[pl.ds(0, Cout), pl.ds(S + 1, L)]),
        )
        return m                                           # (Cout, L)

    # ---- layer 1: 1 -> 16 channels, 24x24, pool -> 12x12 --------------------
    m1 = gated_conv_pool(lambda off, n: x_ref[0, :, pl.ds(off, n)],
                         24, 24, 1, 16, wc1_ref, bc1_ref)
    # pool-select + stride-2 + zero-pad for layer 2, all in one constant matmul.
    xpad_scr[pl.ds(0, 16), pl.ds(0, _P2LEN)] = jnp.dot(
        m1, sel1_ref[...], preferred_element_type=jnp.float32)

    # ---- layer 2: 16 -> 32 channels, 12x12, pool -> 6x6 ---------------------
    m2 = gated_conv_pool(lambda off, n: xpad_scr[pl.ds(0, 16), pl.ds(off, n)],
                         12, 12, 16, 32, wc2_ref, bc2_ref)
    xpad_scr[pl.ds(0, 32), pl.ds(0, _P3LEN)] = jnp.dot(
        m2, sel2_ref[...], preferred_element_type=jnp.float32)

    # ---- layer 3: 32 -> 8 channels, 6x6, pool -> 3x3 ------------------------
    m3 = gated_conv_pool(lambda off, n: xpad_scr[pl.ds(0, 32), pl.ds(off, n)],
                         6, 6, 32, 8, wc3_ref, bc3_ref)
    f_scr[pl.ds(0, 8), pl.ds(0, 9)] = jnp.dot(
        m3, sel3_ref[...], preferred_element_type=jnp.float32)   # (8, 9) = torch .view order

    # ---- MLP head: 72 -> 128 -> 64 -> 10, softmax(dim=-1) -------------------
    h = b1_ref[...]                                         # (1, 128)
    for c in range(8):                                      # flatten(c, h, w) @ W1
        row = f_scr[pl.ds(c, 1), pl.ds(0, 9)].astype(jnp.bfloat16)   # (1, 9)
        h = h + jnp.dot(row, w1_ref[c], preferred_element_type=jnp.float32)
    h = jnp.maximum(h, 0.0)
    h = jnp.maximum(
        jnp.dot(h.astype(jnp.bfloat16), w2_ref[...],
                preferred_element_type=jnp.float32) + b2_ref[...], 0.0)
    logits = jnp.dot(h.astype(jnp.bfloat16), w3_ref[...],
                     preferred_element_type=jnp.float32) + b3_ref[...]
    logits = logits - jnp.max(logits, axis=-1, keepdims=True)
    e = jnp.exp(logits)
    probs = e * pl.reciprocal(jnp.sum(e, axis=-1, keepdims=True), approx=False)
    o_ref[0] = probs.astype(o_ref.dtype)


# ---------------------------------------------------------------------------
# Parameter preparation (PyTorch layouts -> kernel operands) + wrapper.
# ---------------------------------------------------------------------------
def _pool_select_matrix(H, W, dst_index, n_dst):
    """0/1 matrix mapping the 2x2-max map (flat, stride W+2) of an (H, W) conv
    output to its stride-2-downsampled destination layout (applied on the MXU)."""
    S = W + 2
    sel = np.zeros((H * S, n_dst), np.float32)
    for ph in range(H // 2):
        for pw in range(W // 2):
            sel[(2 * ph) * S + 2 * pw, dst_index(ph, pw)] = 1.0
    return jnp.asarray(sel)


def _prep_conv(wf, bf, wa, ba):
    """Stack feature/attention 3x3 convs into one (2*Cout, 9*Cin) bf16 matrix."""
    cout, cin = wf.shape[0], wf.shape[1]

    def stack(w):   # (Cout, Cin, 3, 3) -> (Cout, 9*Cin), column = (dy*3+dx)*Cin + c
        return jnp.transpose(w, (0, 2, 3, 1)).reshape(cout, 9 * cin)

    wc = jnp.concatenate([stack(wf), stack(wa)], axis=0).astype(jnp.bfloat16)
    bc = jnp.concatenate([bf, ba], axis=0).reshape(2 * cout, 1).astype(jnp.float32)
    return wc, bc


def prepare_params(p):
    """One-time layout prep (call outside the hot loop)."""
    kp = {}
    for i in (1, 2, 3):
        kp[f"wc{i}"], kp[f"bc{i}"] = _prep_conv(p[f"wf{i}"], p[f"bf{i}"],
                                                p[f"wa{i}"], p[f"ba{i}"])
    kp["sel1"] = _pool_select_matrix(24, 24, lambda ph, pw: (ph + 1) * _S2 + pw + 1, _P2LEN)
    kp["sel2"] = _pool_select_matrix(12, 12, lambda ph, pw: (ph + 1) * _S3 + pw + 1, _P3LEN)
    kp["sel3"] = _pool_select_matrix(6, 6, lambda ph, pw: ph * 3 + pw, 9)
    kp["w1"] = jnp.transpose(p["w1"]).reshape(8, 9, 128).astype(jnp.bfloat16)
    kp["b1"] = p["b1"].reshape(1, 128).astype(jnp.float32)
    kp["w2"] = jnp.transpose(p["w2"]).astype(jnp.bfloat16)      # (128, 64)
    kp["b2"] = p["b2"].reshape(1, 64).astype(jnp.float32)
    kp["w3"] = jnp.transpose(p["w3"]).astype(jnp.bfloat16)      # (64, 10)
    kp["b3"] = p["b3"].reshape(1, 10).astype(jnp.float32)
    return kp


def fused_forward(x, kp):
    """Full attentionModel forward as a single fused Pallas kernel call."""
    B = x.shape[0]
    assert x.shape[1:] == (1, 24, 24), x.shape
    # Only wrapper-side glue: fold the conv zero-padding (+2 slack rows) into a
    # flat stride-26 layout.  Everything else happens inside the kernel.
    xpad = jnp.pad(x[:, 0], ((0, 0), (1, 3), (1, 1)))            # (B, 28, 26)
    x_flat = xpad.reshape(B, 1, _X_FLAT)

    def bcast(*shape):
        return pl.BlockSpec(shape, lambda b: (0,) * len(shape))

    out = pl.pallas_call(
        _fused_forward_kernel,
        out_shape=jax.ShapeDtypeStruct((B, 1, 10), jnp.float32),
        grid=(B,),
        in_specs=[
            pl.BlockSpec((1, 1, _X_FLAT), lambda b: (b, 0, 0)),
            bcast(32, 9), bcast(32, 1),
            bcast(64, 144), bcast(64, 1),
            bcast(16, 288), bcast(16, 1),
            bcast(_L1, _P2LEN), bcast(_L2, _P3LEN), bcast(_L3, 9),
            bcast(8, 9, 128), bcast(1, 128),
            bcast(128, 64), bcast(1, 64),
            bcast(64, 10), bcast(1, 10),
        ],
        out_specs=pl.BlockSpec((1, 1, 10), lambda b: (b, 0, 0)),
        scratch_shapes=[
            pltpu.VMEM((288, 656), jnp.float32),   # im2col patches (9*Cin, Lc)
            pltpu.VMEM((32, 656), jnp.float32),    # relu(gated conv) map (Cout, Lc)
            pltpu.VMEM((32, 216), jnp.float32),    # next layer's padded-flat input
            pltpu.VMEM((8, 128), jnp.float32),     # pooled layer-3 features (8, 9)
        ],
        compiler_params=pltpu.CompilerParams(
            dimension_semantics=("parallel",)),    # one image per TensorCore on v7x
    )(x_flat,
      kp["wc1"], kp["bc1"], kp["wc2"], kp["bc2"], kp["wc3"], kp["bc3"],
      kp["sel1"], kp["sel2"], kp["sel3"],
      kp["w1"], kp["b1"], kp["w2"], kp["b2"], kp["w3"], kp["b3"])
    return out.reshape(B, 10)


def attention_model_forward(x, params):
    """Convenience wrapper taking PyTorch-layout parameters."""
    return fused_forward(x, prepare_params(params))


# ---------------------------------------------------------------------------
# Parameters (PyTorch layouts) and a pure-XLA reference for validation.
# ---------------------------------------------------------------------------
def init_params(key):
    ks = jax.random.split(key, 9)

    def w(k, shape, fan_in):
        return jax.random.normal(k, shape, jnp.float32) / jnp.sqrt(float(fan_in))

    p = {}
    chans = [(1, 16), (16, 32), (32, 8)]
    for i, (cin, cout) in enumerate(chans):
        p[f"wf{i + 1}"] = w(ks[2 * i], (cout, cin, 3, 3), cin * 9)
        p[f"wa{i + 1}"] = w(ks[2 * i + 1], (cout, cin, 3, 3), cin * 9)
        p[f"bf{i + 1}"] = jnp.zeros((cout,), jnp.float32)
        p[f"ba{i + 1}"] = jnp.zeros((cout,), jnp.float32)
    p["w1"] = w(ks[6], (128, 72), 72)
    p["b1"] = jnp.zeros((128,), jnp.float32)
    p["w2"] = w(ks[7], (64, 128), 128)
    p["b2"] = jnp.zeros((64,), jnp.float32)
    p["w3"] = w(ks[8], (10, 64), 64)
    p["b3"] = jnp.zeros((10,), jnp.float32)
    return p


def reference_forward(x, p):
    """Pure-JAX/XLA reference of the PyTorch module (f32 end to end)."""
    dn = ("NCHW", "OIHW", "NCHW")

    def attn_block(x, wf, bf, wa, ba):
        f = jax.lax.conv_general_dilated(x, wf, (1, 1), "SAME", dimension_numbers=dn)
        a = jax.lax.conv_general_dilated(x, wa, (1, 1), "SAME", dimension_numbers=dn)
        f = f + bf[None, :, None, None]
        a = a + ba[None, :, None, None]
        y = jnp.maximum(f * jax.nn.sigmoid(a), 0.0)
        B, C, H, W = y.shape
        return y.reshape(B, C, H // 2, 2, W // 2, 2).max(axis=(3, 5))

    for i in (1, 2, 3):
        x = attn_block(x, p[f"wf{i}"], p[f"bf{i}"], p[f"wa{i}"], p[f"ba{i}"])
    x = x.reshape(x.shape[0], -1)
    x = jnp.maximum(x @ p["w1"].T + p["b1"], 0.0)
    x = jnp.maximum(x @ p["w2"].T + p["b2"], 0.0)
    return jax.nn.softmax(x @ p["w3"].T + p["b3"], axis=-1)


if __name__ == "__main__":
    key = jax.random.PRNGKey(0)
    kx, kparam = jax.random.split(key)
    # 24x24 single-channel input: three 2x2 pools -> 8 * 3 * 3 = 72 = 24*3
    # features, matching Linear(24 * 3, 128) in the PyTorch module.
    x = jax.random.normal(kx, (2, 1, 24, 24), dtype=jnp.float32)
    params = init_params(kparam)
    kparams = prepare_params(params)

    out = jax.jit(fused_forward)(x, kparams)
    out = jax.block_until_ready(out)

    assert out.shape == (2, 10)
    assert bool(jnp.all(jnp.isfinite(out)))
    assert bool(jnp.allclose(jnp.sum(out, axis=-1), 1.0, atol=1e-5))

    # cross-check against the f32 XLA reference (kernel matmul operands are bf16).
    ref = reference_forward(x, params)
    assert bool(jnp.allclose(out, ref, atol=3e-2)), (out, ref)

    print("KERNEL_OK")
</pallas_src>

<mosaic_0001>
module attributes {stable_mosaic.version = 11 : i64} {
  func.func @_fused_forward_kernel(%arg0: i32, %arg1: memref<1x1x728xf32, #tpu.memory_space<vmem>>, %arg2: memref<32x9xbf16, #tpu.memory_space<vmem>>, %arg3: memref<32x1xf32, #tpu.memory_space<vmem>>, %arg4: memref<64x144xbf16, #tpu.memory_space<vmem>>, %arg5: memref<64x1xf32, #tpu.memory_space<vmem>>, %arg6: memref<16x288xbf16, #tpu.memory_space<vmem>>, %arg7: memref<16x1xf32, #tpu.memory_space<vmem>>, %arg8: memref<624x213xf32, #tpu.memory_space<vmem>>, %arg9: memref<168x75xf32, #tpu.memory_space<vmem>>, %arg10: memref<48x9xf32, #tpu.memory_space<vmem>>, %arg11: memref<8x9x128xbf16, #tpu.memory_space<vmem>>, %arg12: memref<1x128xf32, #tpu.memory_space<vmem>>, %arg13: memref<128x64xbf16, #tpu.memory_space<vmem>>, %arg14: memref<1x64xf32, #tpu.memory_space<vmem>>, %arg15: memref<64x10xbf16, #tpu.memory_space<vmem>>, %arg16: memref<1x10xf32, #tpu.memory_space<vmem>>, %arg17: memref<1x1x10xf32, #tpu.memory_space<vmem>>, %arg18: memref<288x656xf32, #tpu.memory_space<vmem>>, %arg19: memref<32x656xf32, #tpu.memory_space<vmem>>, %arg20: memref<32x216xf32, #tpu.memory_space<vmem>>, %arg21: memref<8x128xf32, #tpu.memory_space<vmem>>) attributes {dimension_semantics = [#tpu.dimension_semantics<parallel>], iteration_bounds = array<i64: 2>, scalar_prefetch = 0 : i64, scratch_operands = 4 : i64, tpu.core_type = #tpu.core_type<tc>, window_params = [{transform_indices = @transform_0, window_bounds = array<i64: 1, 1, 728>}, {pipeline_mode = #tpu.pipeline_mode<synchronous>, transform_indices = @transform_1, window_bounds = array<i64: 32, 9>}, {pipeline_mode = #tpu.pipeline_mode<synchronous>, transform_indices = @transform_2, window_bounds = array<i64: 32, 1>}, {pipeline_mode = #tpu.pipeline_mode<synchronous>, transform_indices = @transform_3, window_bounds = array<i64: 64, 144>}, {pipeline_mode = #tpu.pipeline_mode<synchronous>, transform_indices = @transform_4, window_bounds = array<i64: 64, 1>}, {pipeline_mode = #tpu.pipeline_mode<synchronous>, transform_indices = @transform_5, window_bounds = array<i64: 16, 288>}, {pipeline_mode = #tpu.pipeline_mode<synchronous>, transform_indices = @transform_6, window_bounds = array<i64: 16, 1>}, {pipeline_mode = #tpu.pipeline_mode<synchronous>, transform_indices = @transform_7, window_bounds = array<i64: 624, 213>}, {pipeline_mode = #tpu.pipeline_mode<synchronous>, transform_indices = @transform_8, window_bounds = array<i64: 168, 75>}, {pipeline_mode = #tpu.pipeline_mode<synchronous>, transform_indices = @transform_9, window_bounds = array<i64: 48, 9>}, {pipeline_mode = #tpu.pipeline_mode<synchronous>, transform_indices = @transform_10, window_bounds = array<i64: 8, 9, 128>}, {pipeline_mode = #tpu.pipeline_mode<synchronous>, transform_indices = @transform_11, window_bounds = array<i64: 1, 128>}, {pipeline_mode = #tpu.pipeline_mode<synchronous>, transform_indices = @transform_12, window_bounds = array<i64: 128, 64>}, {pipeline_mode = #tpu.pipeline_mode<synchronous>, transform_indices = @transform_13, window_bounds = array<i64: 1, 64>}, {pipeline_mode = #tpu.pipeline_mode<synchronous>, transform_indices = @transform_14, window_bounds = array<i64: 64, 10>}, {pipeline_mode = #tpu.pipeline_mode<synchronous>, transform_indices = @transform_15, window_bounds = array<i64: 1, 10>}, {transform_indices = @transform_16, window_bounds = array<i64: 1, 1, 10>}]} {
    %c0 = arith.constant 0 : index
    %c0_0 = arith.constant 0 : index
    %c0_1 = arith.constant 0 : index
    %0 = vector.load %arg1[%c0, %c0_0, %c0_1] : memref<1x1x728xf32, #tpu.memory_space<vmem>>, vector<1x1x651xf32>
    %1 = vector.shape_cast %0 : vector<1x1x651xf32> to vector<1x651xf32>
    %c0_2 = arith.constant 0 : index
    %c0_3 = arith.constant 0 : index
    %2 = vector.load %arg18[%c0_2, %c0_3] : memref<288x656xf32, #tpu.memory_space<vmem>>, vector<1x651xf32>
    tpu.vector_store %arg18[%c0_2, %c0_3], %1 {strides = array<i32>} : memref<288x656xf32, #tpu.memory_space<vmem>>, vector<1x651xf32>,
    %c0_4 = arith.constant 0 : index
    %c0_5 = arith.constant 0 : index
    %c1 = arith.constant 1 : index
    %3 = vector.load %arg1[%c0_4, %c0_5, %c1] : memref<1x1x728xf32, #tpu.memory_space<vmem>>, vector<1x1x651xf32>
    %4 = vector.shape_cast %3 : vector<1x1x651xf32> to vector<1x651xf32>
    %c1_6 = arith.constant 1 : index
    %c0_7 = arith.constant 0 : index
    %5 = vector.load %arg18[%c1_6, %c0_7] : memref<288x656xf32, #tpu.memory_space<vmem>>, vector<1x651xf32>
    tpu.vector_store %arg18[%c1_6, %c0_7], %4 {strides = array<i32>} : memref<288x656xf32, #tpu.memory_space<vmem>>, vector<1x651xf32>,
    %c0_8 = arith.constant 0 : index
    %c0_9 = arith.constant 0 : index
    %c2 = arith.constant 2 : index
    %6 = vector.load %arg1[%c0_8, %c0_9, %c2] : memref<1x1x728xf32, #tpu.memory_space<vmem>>, vector<1x1x651xf32>
    %7 = vector.shape_cast %6 : vector<1x1x651xf32> to vector<1x651xf32>
    %c2_10 = arith.constant 2 : index
    %c0_11 = arith.constant 0 : index
    %8 = vector.load %arg18[%c2_10, %c0_11] : memref<288x656xf32, #tpu.memory_space<vmem>>, vector<1x651xf32>
    tpu.vector_store %arg18[%c2_10, %c0_11], %7 {strides = array<i32>} : memref<288x656xf32, #tpu.memory_space<vmem>>, vector<1x651xf32>,
    %c0_12 = arith.constant 0 : index
    %c0_13 = arith.constant 0 : index
    %c26 = arith.constant 26 : index
    %9 = vector.load %arg1[%c0_12, %c0_13, %c26] : memref<1x1x728xf32, #tpu.memory_space<vmem>>, vector<1x1x651xf32>
    %10 = vector.shape_cast %9 : vector<1x1x651xf32> to vector<1x651xf32>
    %c3 = arith.constant 3 : index
    %c0_14 = arith.constant 0 : index
    %11 = vector.load %arg18[%c3, %c0_14] : memref<288x656xf32, #tpu.memory_space<vmem>>, vector<1x651xf32>
    tpu.vector_store %arg18[%c3, %c0_14], %10 {strides = array<i32>} : memref<288x656xf32, #tpu.memory_space<vmem>>, vector<1x651xf32>,
    %c0_15 = arith.constant 0 : index
    %c0_16 = arith.constant 0 : index
    %c27 = arith.constant 27 : index
    %12 = vector.load %arg1[%c0_15, %c0_16, %c27] : memref<1x1x728xf32, #tpu.memory_space<vmem>>, vector<1x1x651xf32>
    %13 = vector.shape_cast %12 : vector<1x1x651xf32> to vector<1x651xf32>
    %c4 = arith.constant 4 : index
    %c0_17 = arith.constant 0 : index
    %14 = vector.load %arg18[%c4, %c0_17] : memref<288x656xf32, #tpu.memory_space<vmem>>, vector<1x651xf32>
    tpu.vector_store %arg18[%c4, %c0_17], %13 {strides = array<i32>} : memref<288x656xf32, #tpu.memory_space<vmem>>, vector<1x651xf32>,
    %c0_18 = arith.constant 0 : index
    %c0_19 = arith.constant 0 : index
    %c28 = arith.constant 28 : index
    %15 = vector.load %arg1[%c0_18, %c0_19, %c28] : memref<1x1x728xf32, #tpu.memory_space<vmem>>, vector<1x1x651xf32>
    %16 = vector.shape_cast %15 : vector<1x1x651xf32> to vector<1x651xf32>
    %c5 = arith.constant 5 : index
    %c0_20 = arith.constant 0 : index
    %17 = vector.load %arg18[%c5, %c0_20] : memref<288x656xf32, #tpu.memory_space<vmem>>, vector<1x651xf32>
    tpu.vector_store %arg18[%c5, %c0_20], %16 {strides = array<i32>} : memref<288x656xf32, #tpu.memory_space<vmem>>, vector<1x651xf32>,
    %c0_21 = arith.constant 0 : index
    %c0_22 = arith.constant 0 : index
    %c52 = arith.constant 52 : index
    %18 = vector.load %arg1[%c0_21, %c0_22, %c52] : memref<1x1x728xf32, #tpu.memory_space<vmem>>, vector<1x1x651xf32>
    %19 = vector.shape_cast %18 : vector<1x1x651xf32> to vector<1x651xf32>
    %c6 = arith.constant 6 : index
    %c0_23 = arith.constant 0 : index
    %20 = vector.load %arg18[%c6, %c0_23] : memref<288x656xf32, #tpu.memory_space<vmem>>, vector<1x651xf32>
    tpu.vector_store %arg18[%c6, %c0_23], %19 {strides = array<i32>} : memref<288x656xf32, #tpu.memory_space<vmem>>, vector<1x651xf32>,
    %c0_24 = arith.constant 0 : index
    %c0_25 = arith.constant 0 : index
    %c53 = arith.constant 53 : index
    %21 = vector.load %arg1[%c0_24, %c0_25, %c53] : memref<1x1x728xf32, #tpu.memory_space<vmem>>, vector<1x1x651xf32>
    %22 = vector.shape_cast %21 : vector<1x1x651xf32> to vector<1x651xf32>
    %c7 = arith.constant 7 : index
    %c0_26 = arith.constant 0 : index
    %23 = vector.load %arg18[%c7, %c0_26] : memref<288x656xf32, #tpu.memory_space<vmem>>, vector<1x651xf32>
    tpu.vector_store %arg18[%c7, %c0_26], %22 {strides = array<i32>} : memref<288x656xf32, #tpu.memory_space<vmem>>, vector<1x651xf32>,
    %c0_27 = arith.constant 0 : index
    %c0_28 = arith.constant 0 : index
    %c54 = arith.constant 54 : index
    %24 = vector.load %arg1[%c0_27, %c0_28, %c54] : memref<1x1x728xf32, #tpu.memory_space<vmem>>, vector<1x1x651xf32>
    %25 = vector.shape_cast %24 : vector<1x1x651xf32> to vector<1x651xf32>
    %c8 = arith.constant 8 : index
    %c0_29 = arith.constant 0 : index
    %26 = vector.load %arg18[%c8, %c0_29] : memref<288x656xf32, #tpu.memory_space<vmem>>, vector<1x651xf32>
    tpu.vector_store %arg18[%c8, %c0_29], %25 {strides = array<i32>} : memref<288x656xf32, #tpu.memory_space<vmem>>, vector<1x651xf32>,
    %c0_30 = arith.constant 0 : index
    %c0_31 = arith.constant 0 : index
    %27 = vector.load %arg18[%c0_30, %c0_31] : memref<288x656xf32, #tpu.memory_space<vmem>>, vector<9x651xf32>
    %28 = arith.truncf %27 : vector<9x651xf32> to vector<9x651xbf16>
    %c0_32 = arith.constant 0 : index
    %c0_33 = arith.constant 0 : index
    %29 = vector.load %arg2[%c0_32, %c0_33] : memref<32x9xbf16, #tpu.memory_space<vmem>>, vector<32x9xbf16>
    %cst = arith.constant dense<0.000000e+00> : vector<32x651xf32>
    %30 = tpu.matmul %29, %28, %cst {dimension_numbers = #tpu.dot_dimension_numbers<[1], [0], [0], [1], [0, 0, 1, 1], [], []>} : vector<32x9xbf16>, vector<9x651xbf16>, vector<32x651xf32> -> vector<32x651xf32>
    %c0_34 = arith.constant 0 : index
    %c0_35 = arith.constant 0 : index
    %31 = vector.load %arg3[%c0_34, %c0_35] : memref<32x1xf32, #tpu.memory_space<vmem>>, vector<32x1xf32>
    %32 = vector.broadcast %31 : vector<32x1xf32> to vector<32x651xf32>
    %33 = arith.addf %30, %32 : vector<32x651xf32>
    %34 = vector.extract_strided_slice %33 {offsets = [0, 0], sizes = [16, 651], strides = [1, 1]} : vector<32x651xf32> to vector<16x651xf32>
    %35 = vector.extract_strided_slice %33 {offsets = [16, 0], sizes = [16, 651], strides = [1, 1]} : vector<32x651xf32> to vector<16x651xf32>
    %36 = arith.negf %35 : vector<16x651xf32>
    %37 = math.exp %36 : vector<16x651xf32>
    %cst_36 = arith.constant 1.000000e+00 : f32
    %38 = vector.broadcast %cst_36 : f32 to vector<16x651xf32>
    %39 = arith.addf %38, %37 : vector<16x651xf32>
    %40 = arith.divf %38, %39 : vector<16x651xf32>
    %41 = arith.mulf %34, %40 : vector<16x651xf32>
    %cst_37 = arith.constant 0.000000e+00 : f32
    %42 = vector.broadcast %cst_37 : f32 to vector<16x651xf32>
    %43 = arith.maximumf %41, %42 : vector<16x651xf32>
    %c0_38 = arith.constant 0 : index
    %c0_39 = arith.constant 0 : index
    %44 = vector.load %arg19[%c0_38, %c0_39] : memref<32x656xf32, #tpu.memory_space<vmem>>, vector<16x651xf32>
    tpu.vector_store %arg19[%c0_38, %c0_39], %43 {strides = array<i32>} : memref<32x656xf32, #tpu.memory_space<vmem>>, vector<16x651xf32>,
    %c0_40 = arith.constant 0 : index
    %c0_41 = arith.constant 0 : index
    %45 = vector.load %arg19[%c0_40, %c0_41] : memref<32x656xf32, #tpu.memory_space<vmem>>, vector<16x624xf32>
    %c0_42 = arith.constant 0 : index
    %c1_43 = arith.constant 1 : index
    %46 = vector.load %arg19[%c0_42, %c1_43] : memref<32x656xf32, #tpu.memory_space<vmem>>, vector<16x624xf32>
    %47 = arith.maximumf %45, %46 : vector<16x624xf32>
    %c0_44 = arith.constant 0 : index
    %c26_45 = arith.constant 26 : index
    %48 = vector.load %arg19[%c0_44, %c26_45] : memref<32x656xf32, #tpu.memory_space<vmem>>, vector<16x624xf32>
    %c0_46 = arith.constant 0 : index
    %c27_47 = arith.constant 27 : index
    %49 = vector.load %arg19[%c0_46, %c27_47] : memref<32x656xf32, #tpu.memory_space<vmem>>, vector<16x624xf32>
    %50 = arith.maximumf %48, %49 : vector<16x624xf32>
    %51 = arith.maximumf %47, %50 : vector<16x624xf32>
    %c0_48 = arith.constant 0 : index
    %c0_49 = arith.constant 0 : index
    %52 = vector.load %arg8[%c0_48, %c0_49] : memref<624x213xf32, #tpu.memory_space<vmem>>, vector<624x213xf32>
    %cst_50 = arith.constant dense<0.000000e+00> : vector<16x213xf32>
    %53 = tpu.matmul %51, %52, %cst_50 {dimension_numbers = #tpu.dot_dimension_numbers<[1], [0], [0], [1], [0, 0, 1, 1], [], []>} : vector<16x624xf32>, vector<624x213xf32>, vector<16x213xf32> -> vector<16x213xf32>
    %c0_51 = arith.constant 0 : index
    %c0_52 = arith.constant 0 : index
    %54 = vector.load %arg20[%c0_51, %c0_52] : memref<32x216xf32, #tpu.memory_space<vmem>>, vector<16x213xf32>
    tpu.vector_store %arg20[%c0_51, %c0_52], %53 {strides = array<i32>} : memref<32x216xf32, #tpu.memory_space<vmem>>, vector<16x213xf32>,
    %c0_53 = arith.constant 0 : index
    %c0_54 = arith.constant 0 : index
    %55 = vector.load %arg20[%c0_53, %c0_54] : memref<32x216xf32, #tpu.memory_space<vmem>>, vector<16x183xf32>
    %c0_55 = arith.constant 0 : index
    %c0_56 = arith.constant 0 : index
    %56 = vector.load %arg18[%c0_55, %c0_56] : memref<288x656xf32, #tpu.memory_space<vmem>>, vector<16x183xf32>
    tpu.vector_store %arg18[%c0_55, %c0_56], %55 {strides = array<i32>} : memref<288x656xf32, #tpu.memory_space<vmem>>, vector<16x183xf32>,
    %c0_57 = arith.constant 0 : index
    %c1_58 = arith.constant 1 : index
    %57 = vector.load %arg20[%c0_57, %c1_58] : memref<32x216xf32, #tpu.memory_space<vmem>>, vector<16x183xf32>
    %c16 = arith.constant 16 : index
    %c0_59 = arith.constant 0 : index
    %58 = vector.load %arg18[%c16, %c0_59] : memref<288x656xf32, #tpu.memory_space<vmem>>, vector<16x183xf32>
    tpu.vector_store %arg18[%c16, %c0_59], %57 {strides = array<i32>} : memref<288x656xf32, #tpu.memory_space<vmem>>, vector<16x183xf32>,
    %c0_60 = arith.constant 0 : index
    %c2_61 = arith.constant 2 : index
    %59 = vector.load %arg20[%c0_60, %c2_61] : memref<32x216xf32, #tpu.memory_space<vmem>>, vector<16x183xf32>
    %c32 = arith.constant 32 : index
    %c0_62 = arith.constant 0 : index
    %60 = vector.load %arg18[%c32, %c0_62] : memref<288x656xf32, #tpu.memory_space<vmem>>, vector<16x183xf32>
    tpu.vector_store %arg18[%c32, %c0_62], %59 {strides = array<i32>} : memref<288x656xf32, #tpu.memory_space<vmem>>, vector<16x183xf32>,
    %c0_63 = arith.constant 0 : index
    %c14 = arith.constant 14 : index
    %61 = vector.load %arg20[%c0_63, %c14] : memref<32x216xf32, #tpu.memory_space<vmem>>, vector<16x183xf32>
    %c48 = arith.constant 48 : index
    %c0_64 = arith.constant 0 : index
    %62 = vector.load %arg18[%c48, %c0_64] : memref<288x656xf32, #tpu.memory_space<vmem>>, vector<16x183xf32>
    tpu.vector_store %arg18[%c48, %c0_64], %61 {strides = array<i32>} : memref<288x656xf32, #tpu.memory_space<vmem>>, vector<16x183xf32>,
    %c0_65 = arith.constant 0 : index
    %c15 = arith.constant 15 : index
    %63 = vector.load %arg20[%c0_65, %c15] : memref<32x216xf32, #tpu.memory_space<vmem>>, vector<16x183xf32>
    %c64 = arith.constant 64 : index
    %c0_66 = arith.constant 0 : index
    %64 = vector.load %arg18[%c64, %c0_66] : memref<288x656xf32, #tpu.memory_space<vmem>>, vector<16x183xf32>
    tpu.vector_store %arg18[%c64, %c0_66], %63 {strides = array<i32>} : memref<288x656xf32, #tpu.memory_space<vmem>>, vector<16x183xf32>,
    %c0_67 = arith.constant 0 : index
    %c16_68 = arith.constant 16 : index
    %65 = vector.load %arg20[%c0_67, %c16_68] : memref<32x216xf32, #tpu.memory_space<vmem>>, vector<16x183xf32>
    %c80 = arith.constant 80 : index
    %c0_69 = arith.constant 0 : index
    %66 = vector.load %arg18[%c80, %c0_69] : memref<288x656xf32, #tpu.memory_space<vmem>>, vector<16x183xf32>
    tpu.vector_store %arg18[%c80, %c0_69], %65 {strides = array<i32>} : memref<288x656xf32, #tpu.memory_space<vmem>>, vector<16x183xf32>,
    %c0_70 = arith.constant 0 : index
    %c28_71 = arith.constant 28 : index
    %67 = vector.load %arg20[%c0_70, %c28_71] : memref<32x216xf32, #tpu.memory_space<vmem>>, vector<16x183xf32>
    %c96 = arith.constant 96 : index
    %c0_72 = arith.constant 0 : index
    %68 = vector.load %arg18[%c96, %c0_72] : memref<288x656xf32, #tpu.memory_space<vmem>>, vector<16x183xf32>
    tpu.vector_store %arg18[%c96, %c0_72], %67 {strides = array<i32>} : memref<288x656xf32, #tpu.memory_space<vmem>>, vector<16x183xf32>,
    %c0_73 = arith.constant 0 : index
    %c29 = arith.constant 29 : index
    %69 = vector.load %arg20[%c0_73, %c29] : memref<32x216xf32, #tpu.memory_space<vmem>>, vector<16x183xf32>
    %c112 = arith.constant 112 : index
    %c0_74 = arith.constant 0 : index
    %70 = vector.load %arg18[%c112, %c0_74] : memref<288x656xf32, #tpu.memory_space<vmem>>, vector<16x183xf32>
    tpu.vector_store %arg18[%c112, %c0_74], %69 {strides = array<i32>} : memref<288x656xf32, #tpu.memory_space<vmem>>, vector<16x183xf32>,
    %c0_75 = arith.constant 0 : index
    %c30 = arith.constant 30 : index
    %71 = vector.load %arg20[%c0_75, %c30] : memref<32x216xf32, #tpu.memory_space<vmem>>, vector<16x183xf32>
    %c128 = arith.constant 128 : index
    %c0_76 = arith.constant 0 : index
    %72 = vector.load %arg18[%c128, %c0_76] : memref<288x656xf32, #tpu.memory_space<vmem>>, vector<16x183xf32>
    tpu.vector_store %arg18[%c128, %c0_76], %71 {strides = array<i32>} : memref<288x656xf32, #tpu.memory_space<vmem>>, vector<16x183xf32>,
    %c0_77 = arith.constant 0 : index
    %c0_78 = arith.constant 0 : index
    %73 = vector.load %arg18[%c0_77, %c0_78] : memref<288x656xf32, #tpu.memory_space<vmem>>, vector<144x183xf32>
    %74 = arith.truncf %73 : vector<144x183xf32> to vector<144x183xbf16>
    %c0_79 = arith.constant 0 : index
    %c0_80 = arith.constant 0 : index
    %75 = vector.load %arg4[%c0_79, %c0_80] : memref<64x144xbf16, #tpu.memory_space<vmem>>, vector<64x144xbf16>
    %cst_81 = arith.constant dense<0.000000e+00> : vector<64x183xf32>
    %76 = tpu.matmul %75, %74, %cst_81 {dimension_numbers = #tpu.dot_dimension_numbers<[1], [0], [0], [1], [0, 0, 1, 1], [], []>} : vector<64x144xbf16>, vector<144x183xbf16>, vector<64x183xf32> -> vector<64x183xf32>
    %c0_82 = arith.constant 0 : index
    %c0_83 = arith.constant 0 : index
    %77 = vector.load %arg5[%c0_82, %c0_83] : memref<64x1xf32, #tpu.memory_space<vmem>>, vector<64x1xf32>
    %78 = vector.broadcast %77 : vector<64x1xf32> to vector<64x183xf32>
    %79 = arith.addf %76, %78 : vector<64x183xf32>
    %80 = vector.extract_strided_slice %79 {offsets = [0, 0], sizes = [32, 183], strides = [1, 1]} : vector<64x183xf32> to vector<32x183xf32>
    %81 = vector.extract_strided_slice %79 {offsets = [32, 0], sizes = [32, 183], strides = [1, 1]} : vector<64x183xf32> to vector<32x183xf32>
    %82 = arith.negf %81 : vector<32x183xf32>
    %83 = math.exp %82 : vector<32x183xf32>
    %cst_84 = arith.constant 1.000000e+00 : f32
    %84 = vector.broadcast %cst_84 : f32 to vector<32x183xf32>
    %85 = arith.addf %84, %83 : vector<32x183xf32>
    %86 = arith.divf %84, %85 : vector<32x183xf32>
    %87 = arith.mulf %80, %86 : vector<32x183xf32>
    %cst_85 = arith.constant 0.000000e+00 : f32
    %88 = vector.broadcast %cst_85 : f32 to vector<32x183xf32>
    %89 = arith.maximumf %87, %88 : vector<32x183xf32>
    %c0_86 = arith.constant 0 : index
    %c0_87 = arith.constant 0 : index
    %90 = vector.load %arg19[%c0_86, %c0_87] : memref<32x656xf32, #tpu.memory_space<vmem>>, vector<32x183xf32>
    tpu.vector_store %arg19[%c0_86, %c0_87], %89 {strides = array<i32>} : memref<32x656xf32, #tpu.memory_space<vmem>>, vector<32x183xf32>,
    %c0_88 = arith.constant 0 : index
    %c0_89 = arith.constant 0 : index
    %91 = vector.load %arg19[%c0_88, %c0_89] : memref<32x656xf32, #tpu.memory_space<vmem>>, vector<32x168xf32>
    %c0_90 = arith.constant 0 : index
    %c1_91 = arith.constant 1 : index
    %92 = vector.load %arg19[%c0_90, %c1_91] : memref<32x656xf32, #tpu.memory_space<vmem>>, vector<32x168xf32>
    %93 = arith.maximumf %91, %92 : vector<32x168xf32>
    %c0_92 = arith.constant 0 : index
    %c14_93 = arith.constant 14 : index
    %94 = vector.load %arg19[%c0_92, %c14_93] : memref<32x656xf32, #tpu.memory_space<vmem>>, vector<32x168xf32>
    %c0_94 = arith.constant 0 : index
    %c15_95 = arith.constant 15 : index
    %95 = vector.load %arg19[%c0_94, %c15_95] : memref<32x656xf32, #tpu.memory_space<vmem>>, vector<32x168xf32>
    %96 = arith.maximumf %94, %95 : vector<32x168xf32>
    %97 = arith.maximumf %93, %96 : vector<32x168xf32>
    %c0_96 = arith.constant 0 : index
    %c0_97 = arith.constant 0 : index
    %98 = vector.load %arg9[%c0_96, %c0_97] : memref<168x75xf32, #tpu.memory_space<vmem>>, vector<168x75xf32>
    %cst_98 = arith.constant dense<0.000000e+00> : vector<32x75xf32>
    %99 = tpu.matmul %97, %98, %cst_98 {dimension_numbers = #tpu.dot_dimension_numbers<[1], [0], [0], [1], [0, 0, 1, 1], [], []>} : vector<32x168xf32>, vector<168x75xf32>, vector<32x75xf32> -> vector<32x75xf32>
    %c0_99 = arith.constant 0 : index
    %c0_100 = arith.constant 0 : index
    %100 = vector.load %arg20[%c0_99, %c0_100] : memref<32x216xf32, #tpu.memory_space<vmem>>, vector<32x75xf32>
    tpu.vector_store %arg20[%c0_99, %c0_100], %99 {strides = array<i32>} : memref<32x216xf32, #tpu.memory_space<vmem>>, vector<32x75xf32>,
    %c0_101 = arith.constant 0 : index
    %c0_102 = arith.constant 0 : index
    %101 = vector.load %arg20[%c0_101, %c0_102] : memref<32x216xf32, #tpu.memory_space<vmem>>, vector<32x57xf32>
    %c0_103 = arith.constant 0 : index
    %c0_104 = arith.constant 0 : index
    %102 = vector.load %arg18[%c0_103, %c0_104] : memref<288x656xf32, #tpu.memory_space<vmem>>, vector<32x57xf32>
    tpu.vector_store %arg18[%c0_103, %c0_104], %101 {strides = array<i32>} : memref<288x656xf32, #tpu.memory_space<vmem>>, vector<32x57xf32>,
    %c0_105 = arith.constant 0 : index
    %c1_106 = arith.constant 1 : index
    %103 = vector.load %arg20[%c0_105, %c1_106] : memref<32x216xf32, #tpu.memory_space<vmem>>, vector<32x57xf32>
    %c32_107 = arith.constant 32 : index
    %c0_108 = arith.constant 0 : index
    %104 = vector.load %arg18[%c32_107, %c0_108] : memref<288x656xf32, #tpu.memory_space<vmem>>, vector<32x57xf32>
    tpu.vector_store %arg18[%c32_107, %c0_108], %103 {strides = array<i32>} : memref<288x656xf32, #tpu.memory_space<vmem>>, vector<32x57xf32>,
    %c0_109 = arith.constant 0 : index
    %c2_110 = arith.constant 2 : index
    %105 = vector.load %arg20[%c0_109, %c2_110] : memref<32x216xf32, #tpu.memory_space<vmem>>, vector<32x57xf32>
    %c64_111 = arith.constant 64 : index
    %c0_112 = arith.constant 0 : index
    %106 = vector.load %arg18[%c64_111, %c0_112] : memref<288x656xf32, #tpu.memory_space<vmem>>, vector<32x57xf32>
    tpu.vector_store %arg18[%c64_111, %c0_112], %105 {strides = array<i32>} : memref<288x656xf32, #tpu.memory_space<vmem>>, vector<32x57xf32>,
    %c0_113 = arith.constant 0 : index
    %c8_114 = arith.constant 8 : index
    %107 = vector.load %arg20[%c0_113, %c8_114] : memref<32x216xf32, #tpu.memory_space<vmem>>, vector<32x57xf32>
    %c96_115 = arith.constant 96 : index
    %c0_116 = arith.constant 0 : index
    %108 = vector.load %arg18[%c96_115, %c0_116] : memref<288x656xf32, #tpu.memory_space<vmem>>, vector<32x57xf32>
    tpu.vector_store %arg18[%c96_115, %c0_116], %107 {strides = array<i32>} : memref<288x656xf32, #tpu.memory_space<vmem>>, vector<32x57xf32>,
    %c0_117 = arith.constant 0 : index
    %c9 = arith.constant 9 : index
    %109 = vector.load %arg20[%c0_117, %c9] : memref<32x216xf32, #tpu.memory_space<vmem>>, vector<32x57xf32>
    %c128_118 = arith.constant 128 : index
    %c0_119 = arith.constant 0 : index
    %110 = vector.load %arg18[%c128_118, %c0_119] : memref<288x656xf32, #tpu.memory_space<vmem>>, vector<32x57xf32>
    tpu.vector_store %arg18[%c128_118, %c0_119], %109 {strides = array<i32>} : memref<288x656xf32, #tpu.memory_space<vmem>>, vector<32x57xf32>,
    %c0_120 = arith.constant 0 : index
    %c10 = arith.constant 10 : index
    %111 = vector.load %arg20[%c0_120, %c10] : memref<32x216xf32, #tpu.memory_space<vmem>>, vector<32x57xf32>
    %c160 = arith.constant 160 : index
    %c0_121 = arith.constant 0 : index
    %112 = vector.load %arg18[%c160, %c0_121] : memref<288x656xf32, #tpu.memory_space<vmem>>, vector<32x57xf32>
    tpu.vector_store %arg18[%c160, %c0_121], %111 {strides = array<i32>} : memref<288x656xf32, #tpu.memory_space<vmem>>, vector<32x57xf32>,
    %c0_122 = arith.constant 0 : index
    %c16_123 = arith.constant 16 : index
    %113 = vector.load %arg20[%c0_122, %c16_123] : memref<32x216xf32, #tpu.memory_space<vmem>>, vector<32x57xf32>
    %c192 = arith.constant 192 : index
    %c0_124 = arith.constant 0 : index
    %114 = vector.load %arg18[%c192, %c0_124] : memref<288x656xf32, #tpu.memory_space<vmem>>, vector<32x57xf32>
    tpu.vector_store %arg18[%c192, %c0_124], %113 {strides = array<i32>} : memref<288x656xf32, #tpu.memory_space<vmem>>, vector<32x57xf32>,
    %c0_125 = arith.constant 0 : index
    %c17 = arith.constant 17 : index
    %115 = vector.load %arg20[%c0_125, %c17] : memref<32x216xf32, #tpu.memory_space<vmem>>, vector<32x57xf32>
    %c224 = arith.constant 224 : index
    %c0_126 = arith.constant 0 : index
    %116 = vector.load %arg18[%c224, %c0_126] : memref<288x656xf32, #tpu.memory_space<vmem>>, vector<32x57xf32>
    tpu.vector_store %arg18[%c224, %c0_126], %115 {strides = array<i32>} : memref<288x656xf32, #tpu.memory_space<vmem>>, vector<32x57xf32>,
    %c0_127 = arith.constant 0 : index
    %c18 = arith.constant 18 : index
    %117 = vector.load %arg20[%c0_127, %c18] : memref<32x216xf32, #tpu.memory_space<vmem>>, vector<32x57xf32>
    %c256 = arith.constant 256 : index
    %c0_128 = arith.constant 0 : index
    %118 = vector.load %arg18[%c256, %c0_128] : memref<288x656xf32, #tpu.memory_space<vmem>>, vector<32x57xf32>
    tpu.vector_store %arg18[%c256, %c0_128], %117 {strides = array<i32>} : memref<288x656xf32, #tpu.memory_space<vmem>>, vector<32x57xf32>,
    %c0_129 = arith.constant 0 : index
    %c0_130 = arith.constant 0 : index
    %119 = vector.load %arg18[%c0_129, %c0_130] : memref<288x656xf32, #tpu.memory_space<vmem>>, vector<288x57xf32>
    %120 = arith.truncf %119 : vector<288x57xf32> to vector<288x57xbf16>
    %c0_131 = arith.constant 0 : index
    %c0_132 = arith.constant 0 : index
    %121 = vector.load %arg6[%c0_131, %c0_132] : memref<16x288xbf16, #tpu.memory_space<vmem>>, vector<16x288xbf16>
    %cst_133 = arith.constant dense<0.000000e+00> : vector<16x57xf32>
    %122 = tpu.matmul %121, %120, %cst_133 {dimension_numbers = #tpu.dot_dimension_numbers<[1], [0], [0], [1], [0, 0, 1, 1], [], []>} : vector<16x288xbf16>, vector<288x57xbf16>, vector<16x57xf32> -> vector<16x57xf32>
    %c0_134 = arith.constant 0 : index
    %c0_135 = arith.constant 0 : index
    %123 = vector.load %arg7[%c0_134, %c0_135] : memref<16x1xf32, #tpu.memory_space<vmem>>, vector<16x1xf32>
    %124 = vector.broadcast %123 : vector<16x1xf32> to vector<16x57xf32>
    %125 = arith.addf %122, %124 : vector<16x57xf32>
    %126 = vector.extract_strided_slice %125 {offsets = [0, 0], sizes = [8, 57], strides = [1, 1]} : vector<16x57xf32> to vector<8x57xf32>
    %127 = vector.extract_strided_slice %125 {offsets = [8, 0], sizes = [8, 57], strides = [1, 1]} : vector<16x57xf32> to vector<8x57xf32>
    %128 = arith.negf %127 : vector<8x57xf32>
    %129 = math.exp %128 : vector<8x57xf32>
    %cst_136 = arith.constant 1.000000e+00 : f32
    %130 = vector.broadcast %cst_136 : f32 to vector<8x57xf32>
    %131 = arith.addf %130, %129 : vector<8x57xf32>
    %132 = arith.divf %130, %131 : vector<8x57xf32>
    %133 = arith.mulf %126, %132 : vector<8x57xf32>
    %cst_137 = arith.constant 0.000000e+00 : f32
    %134 = vector.broadcast %cst_137 : f32 to vector<8x57xf32>
    %135 = arith.maximumf %133, %134 : vector<8x57xf32>
    %c0_138 = arith.constant 0 : index
    %c0_139 = arith.constant 0 : index
    %136 = vector.load %arg19[%c0_138, %c0_139] : memref<32x656xf32, #tpu.memory_space<vmem>>, vector<8x57xf32>
    tpu.vector_store %arg19[%c0_138, %c0_139], %135 {strides = array<i32>} : memref<32x656xf32, #tpu.memory_space<vmem>>, vector<8x57xf32>,
    %c0_140 = arith.constant 0 : index
    %c0_141 = arith.constant 0 : index
    %137 = vector.load %arg19[%c0_140, %c0_141] : memref<32x656xf32, #tpu.memory_space<vmem>>, vector<8x48xf32>
    %c0_142 = arith.constant 0 : index
    %c1_143 = arith.constant 1 : index
    %138 = vector.load %arg19[%c0_142, %c1_143] : memref<32x656xf32, #tpu.memory_space<vmem>>, vector<8x48xf32>
    %139 = arith.maximumf %137, %138 : vector<8x48xf32>
    %c0_144 = arith.constant 0 : index
    %c8_145 = arith.constant 8 : index
    %140 = vector.load %arg19[%c0_144, %c8_145] : memref<32x656xf32, #tpu.memory_space<vmem>>, vector<8x48xf32>
    %c0_146 = arith.constant 0 : index
    %c9_147 = arith.constant 9 : index
    %141 = vector.load %arg19[%c0_146, %c9_147] : memref<32x656xf32, #tpu.memory_space<vmem>>, vector<8x48xf32>
    %142 = arith.maximumf %140, %141 : vector<8x48xf32>
    %143 = arith.maximumf %139, %142 : vector<8x48xf32>
    %c0_148 = arith.constant 0 : index
    %c0_149 = arith.constant 0 : index
    %144 = vector.load %arg10[%c0_148, %c0_149] : memref<48x9xf32, #tpu.memory_space<vmem>>, vector<48x9xf32>
    %cst_150 = arith.constant dense<0.000000e+00> : vector<8x9xf32>
    %145 = tpu.matmul %143, %144, %cst_150 {dimension_numbers = #tpu.dot_dimension_numbers<[1], [0], [0], [1], [0, 0, 1, 1], [], []>} : vector<8x48xf32>, vector<48x9xf32>, vector<8x9xf32> -> vector<8x9xf32>
    %c0_151 = arith.constant 0 : index
    %c0_152 = arith.constant 0 : index
    %146 = vector.load %arg21[%c0_151, %c0_152] : memref<8x128xf32, #tpu.memory_space<vmem>>, vector<8x9xf32>
    tpu.vector_store %arg21[%c0_151, %c0_152], %145 {strides = array<i32>} : memref<8x128xf32, #tpu.memory_space<vmem>>, vector<8x9xf32>,
    %c0_153 = arith.constant 0 : index
    %c0_154 = arith.constant 0 : index
    %147 = vector.load %arg12[%c0_153, %c0_154] : memref<1x128xf32, #tpu.memory_space<vmem>>, vector<1x128xf32>
    %c0_155 = arith.constant 0 : index
    %c0_156 = arith.constant 0 : index
    %148 = vector.load %arg21[%c0_155, %c0_156] : memref<8x128xf32, #tpu.memory_space<vmem>>, vector<1x9xf32>
    %149 = arith.truncf %148 : vector<1x9xf32> to vector<1x9xbf16>
    %c0_157 = arith.constant 0 : index
    %c0_158 = arith.constant 0 : index
    %c0_159 = arith.constant 0 : index
    %150 = vector.load %arg11[%c0_157, %c0_158, %c0_159] : memref<8x9x128xbf16, #tpu.memory_space<vmem>>, vector<1x9x128xbf16>
    %151 = vector.shape_cast %150 : vector<1x9x128xbf16> to vector<9x128xbf16>
    %cst_160 = arith.constant dense<0.000000e+00> : vector<1x128xf32>
    %152 = tpu.matmul %149, %151, %cst_160 {dimension_numbers = #tpu.dot_dimension_numbers<[1], [0], [0], [1], [0, 0, 1, 1], [], []>} : vector<1x9xbf16>, vector<9x128xbf16>, vector<1x128xf32> -> vector<1x128xf32>
    %153 = arith.addf %147, %152 : vector<1x128xf32>
    %c1_161 = arith.constant 1 : index
    %c0_162 = arith.constant 0 : index
    %154 = vector.load %arg21[%c1_161, %c0_162] : memref<8x128xf32, #tpu.memory_space<vmem>>, vector<1x9xf32>
    %155 = arith.truncf %154 : vector<1x9xf32> to vector<1x9xbf16>
    %c1_163 = arith.constant 1 : index
    %c0_164 = arith.constant 0 : index
    %c0_165 = arith.constant 0 : index
    %156 = vector.load %arg11[%c1_163, %c0_164, %c0_165] : memref<8x9x128xbf16, #tpu.memory_space<vmem>>, vector<1x9x128xbf16>
    %157 = vector.shape_cast %156 : vector<1x9x128xbf16> to vector<9x128xbf16>
    %cst_166 = arith.constant dense<0.000000e+00> : vector<1x128xf32>
    %158 = tpu.matmul %155, %157, %cst_166 {dimension_numbers = #tpu.dot_dimension_numbers<[1], [0], [0], [1], [0, 0, 1, 1], [], []>} : vector<1x9xbf16>, vector<9x128xbf16>, vector<1x128xf32> -> vector<1x128xf32>
    %159 = arith.addf %153, %158 : vector<1x128xf32>
    %c2_167 = arith.constant 2 : index
    %c0_168 = arith.constant 0 : index
    %160 = vector.load %arg21[%c2_167, %c0_168] : memref<8x128xf32, #tpu.memory_space<vmem>>, vector<1x9xf32>
    %161 = arith.truncf %160 : vector<1x9xf32> to vector<1x9xbf16>
    %c2_169 = arith.constant 2 : index
    %c0_170 = arith.constant 0 : index
    %c0_171 = arith.constant 0 : index
    %162 = vector.load %arg11[%c2_169, %c0_170, %c0_171] : memref<8x9x128xbf16, #tpu.memory_space<vmem>>, vector<1x9x128xbf16>
    %163 = vector.shape_cast %162 : vector<1x9x128xbf16> to vector<9x128xbf16>
    %cst_172 = arith.constant dense<0.000000e+00> : vector<1x128xf32>
    %164 = tpu.matmul %161, %163, %cst_172 {dimension_numbers = #tpu.dot_dimension_numbers<[1], [0], [0], [1], [0, 0, 1, 1], [], []>} : vector<1x9xbf16>, vector<9x128xbf16>, vector<1x128xf32> -> vector<1x128xf32>
    %165 = arith.addf %159, %164 : vector<1x128xf32>
    %c3_173 = arith.constant 3 : index
    %c0_174 = arith.constant 0 : index
    %166 = vector.load %arg21[%c3_173, %c0_174] : memref<8x128xf32, #tpu.memory_space<vmem>>, vector<1x9xf32>
    %167 = arith.truncf %166 : vector<1x9xf32> to vector<1x9xbf16>
    %c3_175 = arith.constant 3 : index
    %c0_176 = arith.constant 0 : index
    %c0_177 = arith.constant 0 : index
    %168 = vector.load %arg11[%c3_175, %c0_176, %c0_177] : memref<8x9x128xbf16, #tpu.memory_space<vmem>>, vector<1x9x128xbf16>
    %169 = vector.shape_cast %168 : vector<1x9x128xbf16> to vector<9x128xbf16>
    %cst_178 = arith.constant dense<0.000000e+00> : vector<1x128xf32>
    %170 = tpu.matmul %167, %169, %cst_178 {dimension_numbers = #tpu.dot_dimension_numbers<[1], [0], [0], [1], [0, 0, 1, 1], [], []>} : vector<1x9xbf16>, vector<9x128xbf16>, vector<1x128xf32> -> vector<1x128xf32>
    %171 = arith.addf %165, %170 : vector<1x128xf32>
    %c4_179 = arith.constant 4 : index
    %c0_180 = arith.constant 0 : index
    %172 = vector.load %arg21[%c4_179, %c0_180] : memref<8x128xf32, #tpu.memory_space<vmem>>, vector<1x9xf32>
    %173 = arith.truncf %172 : vector<1x9xf32> to vector<1x9xbf16>
    %c4_181 = arith.constant 4 : index
    %c0_182 = arith.constant 0 : index
    %c0_183 = arith.constant 0 : index
    %174 = vector.load %arg11[%c4_181, %c0_182, %c0_183] : memref<8x9x128xbf16, #tpu.memory_space<vmem>>, vector<1x9x128xbf16>
    %175 = vector.shape_cast %174 : vector<1x9x128xbf16> to vector<9x128xbf16>
    %cst_184 = arith.constant dense<0.000000e+00> : vector<1x128xf32>
    %176 = tpu.matmul %173, %175, %cst_184 {dimension_numbers = #tpu.dot_dimension_numbers<[1], [0], [0], [1], [0, 0, 1, 1], [], []>} : vector<1x9xbf16>, vector<9x128xbf16>, vector<1x128xf32> -> vector<1x128xf32>
    %177 = arith.addf %171, %176 : vector<1x128xf32>
    %c5_185 = arith.constant 5 : index
    %c0_186 = arith.constant 0 : index
    %178 = vector.load %arg21[%c5_185, %c0_186] : memref<8x128xf32, #tpu.memory_space<vmem>>, vector<1x9xf32>
    %179 = arith.truncf %178 : vector<1x9xf32> to vector<1x9xbf16>
    %c5_187 = arith.constant 5 : index
    %c0_188 = arith.constant 0 : index
    %c0_189 = arith.constant 0 : index
    %180 = vector.load %arg11[%c5_187, %c0_188, %c0_189] : memref<8x9x128xbf16, #tpu.memory_space<vmem>>, vector<1x9x128xbf16>
    %181 = vector.shape_cast %180 : vector<1x9x128xbf16> to vector<9x128xbf16>
    %cst_190 = arith.constant dense<0.000000e+00> : vector<1x128xf32>
    %182 = tpu.matmul %179, %181, %cst_190 {dimension_numbers = #tpu.dot_dimension_numbers<[1], [0], [0], [1], [0, 0, 1, 1], [], []>} : vector<1x9xbf16>, vector<9x128xbf16>, vector<1x128xf32> -> vector<1x128xf32>
    %183 = arith.addf %177, %182 : vector<1x128xf32>
    %c6_191 = arith.constant 6 : index
    %c0_192 = arith.constant 0 : index
    %184 = vector.load %arg21[%c6_191, %c0_192] : memref<8x128xf32, #tpu.memory_space<vmem>>, vector<1x9xf32>
    %185 = arith.truncf %184 : vector<1x9xf32> to vector<1x9xbf16>
    %c6_193 = arith.constant 6 : index
    %c0_194 = arith.constant 0 : index
    %c0_195 = arith.constant 0 : index
    %186 = vector.load %arg11[%c6_193, %c0_194, %c0_195] : memref<8x9x128xbf16, #tpu.memory_space<vmem>>, vector<1x9x128xbf16>
    %187 = vector.shape_cast %186 : vector<1x9x128xbf16> to vector<9x128xbf16>
    %cst_196 = arith.constant dense<0.000000e+00> : vector<1x128xf32>
    %188 = tpu.matmul %185, %187, %cst_196 {dimension_numbers = #tpu.dot_dimension_numbers<[1], [0], [0], [1], [0, 0, 1, 1], [], []>} : vector<1x9xbf16>, vector<9x128xbf16>, vector<1x128xf32> -> vector<1x128xf32>
    %189 = arith.addf %183, %188 : vector<1x128xf32>
    %c7_197 = arith.constant 7 : index
    %c0_198 = arith.constant 0 : index
    %190 = vector.load %arg21[%c7_197, %c0_198] : memref<8x128xf32, #tpu.memory_space<vmem>>, vector<1x9xf32>
    %191 = arith.truncf %190 : vector<1x9xf32> to vector<1x9xbf16>
    %c7_199 = arith.constant 7 : index
    %c0_200 = arith.constant 0 : index
    %c0_201 = arith.constant 0 : index
    %192 = vector.load %arg11[%c7_199, %c0_200, %c0_201] : memref<8x9x128xbf16, #tpu.memory_space<vmem>>, vector<1x9x128xbf16>
    %193 = vector.shape_cast %192 : vector<1x9x128xbf16> to vector<9x128xbf16>
    %cst_202 = arith.constant dense<0.000000e+00> : vector<1x128xf32>
    %194 = tpu.matmul %191, %193, %cst_202 {dimension_numbers = #tpu.dot_dimension_numbers<[1], [0], [0], [1], [0, 0, 1, 1], [], []>} : vector<1x9xbf16>, vector<9x128xbf16>, vector<1x128xf32> -> vector<1x128xf32>
    %195 = arith.addf %189, %194 : vector<1x128xf32>
    %cst_203 = arith.constant 0.000000e+00 : f32
    %196 = vector.broadcast %cst_203 : f32 to vector<1x128xf32>
    %197 = arith.maximumf %195, %196 : vector<1x128xf32>
    %198 = arith.truncf %197 : vector<1x128xf32> to vector<1x128xbf16>
    %c0_204 = arith.constant 0 : index
    %c0_205 = arith.constant 0 : index
    %199 = vector.load %arg13[%c0_204, %c0_205] : memref<128x64xbf16, #tpu.memory_space<vmem>>, vector<128x64xbf16>
    %cst_206 = arith.constant dense<0.000000e+00> : vector<1x64xf32>
    %200 = tpu.matmul %198, %199, %cst_206 {dimension_numbers = #tpu.dot_dimension_numbers<[1], [0], [0], [1], [0, 0, 1, 1], [], []>} : vector<1x128xbf16>, vector<128x64xbf16>, vector<1x64xf32> -> vector<1x64xf32>
    %c0_207 = arith.constant 0 : index
    %c0_208 = arith.constant 0 : index
    %201 = vector.load %arg14[%c0_207, %c0_208] : memref<1x64xf32, #tpu.memory_space<vmem>>, vector<1x64xf32>
    %202 = arith.addf %200, %201 : vector<1x64xf32>
    %cst_209 = arith.constant 0.000000e+00 : f32
    %203 = vector.broadcast %cst_209 : f32 to vector<1x64xf32>
    %204 = arith.maximumf %202, %203 : vector<1x64xf32>
    %205 = arith.truncf %204 : vector<1x64xf32> to vector<1x64xbf16>
    %c0_210 = arith.constant 0 : index
    %c0_211 = arith.constant 0 : index
    %206 = vector.load %arg15[%c0_210, %c0_211] : memref<64x10xbf16, #tpu.memory_space<vmem>>, vector<64x10xbf16>
    %cst_212 = arith.constant dense<0.000000e+00> : vector<1x10xf32>
    %207 = tpu.matmul %205, %206, %cst_212 {dimension_numbers = #tpu.dot_dimension_numbers<[1], [0], [0], [1], [0, 0, 1, 1], [], []>} : vector<1x64xbf16>, vector<64x10xbf16>, vector<1x10xf32> -> vector<1x10xf32>
    %c0_213 = arith.constant 0 : index
    %c0_214 = arith.constant 0 : index
    %208 = vector.load %arg16[%c0_213, %c0_214] : memref<1x10xf32, #tpu.memory_space<vmem>>, vector<1x10xf32>
    %209 = arith.addf %207, %208 : vector<1x10xf32>
    %cst_215 = arith.constant dense<0xFF800000> : vector<1xf32>
    %210 = vector.multi_reduction <maximumf>, %209, %cst_215 [1] : vector<1x10xf32> to vector<1xf32>
    %211 = vector.shape_cast %210 : vector<1xf32> to vector<1x1xf32>
    %212 = vector.broadcast %211 : vector<1x1xf32> to vector<1x10xf32>
    %213 = arith.subf %209, %212 : vector<1x10xf32>
    %214 = math.exp %213 : vector<1x10xf32>
    %cst_216 = arith.constant dense<0.000000e+00> : vector<1xf32>
    %215 = vector.multi_reduction <add>, %214, %cst_216 [1] : vector<1x10xf32> to vector<1xf32>
    %216 = vector.shape_cast %215 : vector<1xf32> to vector<1x1xf32>
    %217 = tpu.reciprocal %216 : vector<1x1xf32> -> vector<1x1xf32>
    %218 = vector.broadcast %217 : vector<1x1xf32> to vector<1x10xf32>
    %219 = arith.mulf %214, %218 : vector<1x10xf32>
    %c0_217 = arith.constant 0 : index
    %c0_218 = arith.constant 0 : index
    %c0_219 = arith.constant 0 : index
    %220 = vector.load %arg17[%c0_217, %c0_218, %c0_219] : memref<1x1x10xf32, #tpu.memory_space<vmem>>, vector<1x1x10xf32>
    %221 = vector.shape_cast %220 : vector<1x1x10xf32> to vector<1x10xf32>
    %222 = vector.shape_cast %219 : vector<1x10xf32> to vector<1x1x10xf32>
    tpu.vector_store %arg17[%c0_217, %c0_218, %c0_219], %222 {strides = array<i32>} : memref<1x1x10xf32, #tpu.memory_space<vmem>>, vector<1x1x10xf32>,
    return
  }
  func.func @transform_0(%arg0: i32) -> (i32, i32, i32) {
    %c0_i32 = arith.constant 0 : i32
    %c0_i32_0 = arith.constant 0 : i32
    %c0_i32_1 = arith.constant 0 : i32
    return %arg0, %c0_i32, %c0_i32_0 : i32, i32, i32
  }
  func.func @transform_1(%arg0: i32) -> (i32, i32) {
    %c0_i32 = arith.constant 0 : i32
    %c0_i32_0 = arith.constant 0 : i32
    %c0_i32_1 = arith.constant 0 : i32
    return %c0_i32, %c0_i32_0 : i32, i32
  }
  func.func @transform_2(%arg0: i32) -> (i32, i32) {
    %c0_i32 = arith.constant 0 : i32
    %c0_i32_0 = arith.constant 0 : i32
    %c0_i32_1 = arith.constant 0 : i32
    return %c0_i32, %c0_i32_0 : i32, i32
  }
  func.func @transform_3(%arg0: i32) -> (i32, i32) {
    %c0_i32 = arith.constant 0 : i32
    %c0_i32_0 = arith.constant 0 : i32
    %c0_i32_1 = arith.constant 0 : i32
    return %c0_i32, %c0_i32_0 : i32, i32
  }
  func.func @transform_4(%arg0: i32) -> (i32, i32) {
    %c0_i32 = arith.constant 0 : i32
    %c0_i32_0 = arith.constant 0 : i32
    %c0_i32_1 = arith.constant 0 : i32
    return %c0_i32, %c0_i32_0 : i32, i32
  }
  func.func @transform_5(%arg0: i32) -> (i32, i32) {
    %c0_i32 = arith.constant 0 : i32
    %c0_i32_0 = arith.constant 0 : i32
    %c0_i32_1 = arith.constant 0 : i32
    return %c0_i32, %c0_i32_0 : i32, i32
  }
  func.func @transform_6(%arg0: i32) -> (i32, i32) {
    %c0_i32 = arith.constant 0 : i32
    %c0_i32_0 = arith.constant 0 : i32
    %c0_i32_1 = arith.constant 0 : i32
    return %c0_i32, %c0_i32_0 : i32, i32
  }
  func.func @transform_7(%arg0: i32) -> (i32, i32) {
    %c0_i32 = arith.constant 0 : i32
    %c0_i32_0 = arith.constant 0 : i32
    %c0_i32_1 = arith.constant 0 : i32
    return %c0_i32, %c0_i32_0 : i32, i32
  }
  func.func @transform_8(%arg0: i32) -> (i32, i32) {
    %c0_i32 = arith.constant 0 : i32
    %c0_i32_0 = arith.constant 0 : i32
    %c0_i32_1 = arith.constant 0 : i32
    return %c0_i32, %c0_i32_0 : i32, i32
  }
  func.func @transform_9(%arg0: i32) -> (i32, i32) {
    %c0_i32 = arith.constant 0 : i32
    %c0_i32_0 = arith.constant 0 : i32
    %c0_i32_1 = arith.constant 0 : i32
    return %c0_i32, %c0_i32_0 : i32, i32
  }
  func.func @transform_10(%arg0: i32) -> (i32, i32, i32) {
    %c0_i32 = arith.constant 0 : i32
    %c0_i32_0 = arith.constant 0 : i32
    %c0_i32_1 = arith.constant 0 : i32
    %c0_i32_2 = arith.constant 0 : i32
    return %c0_i32, %c0_i32_0, %c0_i32_1 : i32, i32, i32
  }
  func.func @transform_11(%arg0: i32) -> (i32, i32) {
    %c0_i32 = arith.constant 0 : i32
    %c0_i32_0 = arith.constant 0 : i32
    %c0_i32_1 = arith.constant 0 : i32
    return %c0_i32, %c0_i32_0 : i32, i32
  }
  func.func @transform_12(%arg0: i32) -> (i32, i32) {
    %c0_i32 = arith.constant 0 : i32
    %c0_i32_0 = arith.constant 0 : i32
    %c0_i32_1 = arith.constant 0 : i32
    return %c0_i32, %c0_i32_0 : i32, i32
  }
  func.func @transform_13(%arg0: i32) -> (i32, i32) {
    %c0_i32 = arith.constant 0 : i32
    %c0_i32_0 = arith.constant 0 : i32
    %c0_i32_1 = arith.constant 0 : i32
    return %c0_i32, %c0_i32_0 : i32, i32
  }
  func.func @transform_14(%arg0: i32) -> (i32, i32) {
    %c0_i32 = arith.constant 0 : i32
    %c0_i32_0 = arith.constant 0 : i32
    %c0_i32_1 = arith.constant 0 : i32
    return %c0_i32, %c0_i32_0 : i32, i32
  }
  func.func @transform_15(%arg0: i32) -> (i32, i32) {
    %c0_i32 = arith.constant 0 : i32
    %c0_i32_0 = arith.constant 0 : i32
    %c0_i32_1 = arith.constant 0 : i32
    return %c0_i32, %c0_i32_0 : i32, i32
  }
  func.func @transform_16(%arg0: i32) -> (i32, i32, i32) {
    %c0_i32 = arith.constant 0 : i32
    %c0_i32_0 = arith.constant 0 : i32
    %c0_i32_1 = arith.constant 0 : i32
    return %arg0, %c0_i32, %c0_i32_0 : i32, i32, i32
  }
}

</mosaic_0001>

<bundles_post_ra>
// kernel: fused_forward.1
= control target key start
LH: loop header
LB: loop body
LE: loop exit
PB: predicated region body
PF: predicated region fallthrough
CT: control target
= control target key end

     0   :  { %s5651_s0 = inlined_call_operand.vmem [shape: f32[2,1,728], index: 0, kind: input, shape index: {}]   ;;  %s5652_s1 = inlined_call_operand.vmem [shape: bf16[32,9], index: 1, kind: input, shape index: {}]   ;;  %s5653_s2 = inlined_call_operand.vmem [shape: f32[32,1], index: 2, kind: input, shape index: {}]   ;;  %s5654_s3 = inlined_call_operand.vmem [shape: bf16[64,144], index: 3, kind: input, shape index: {}]   ;;  %s5655_s4 = inlined_call_operand.vmem [shape: f32[64,1], index: 4, kind: input, shape index: {}]   ;;  %s5656_s5 = inlined_call_operand.vmem [shape: bf16[16,288], index: 5, kind: input, shape index: {}]   ;;  %s5657_s6 = inlined_call_operand.vmem [shape: f32[16,1], index: 6, kind: input, shape index: {}]   ;;  %s5658_s7 = inlined_call_operand.vmem [shape: f32[624,213], index: 7, kind: input, shape index: {}]   ;;  %s5659_s8 = inlined_call_operand.vmem [shape: f32[168,75], index: 8, kind: input, shape index: {}]   ;;  %s5660_s9 = inlined_call_operand.vmem [shape: f32[48,9], index: 9, kind: input, shape index: {}]   ;;  %s5661_s10 = inlined_call_operand.vmem [shape: bf16[8,9,128], index: 10, kind: input, shape index: {}]   ;;  %s5662_s11 = inlined_call_operand.vmem [shape: f32[1,128], index: 11, kind: input, shape index: {}]   ;;  %s5663_s12 = inlined_call_operand.vmem [shape: bf16[128,64], index: 12, kind: input, shape index: {}]   ;;  %s5664_s13 = inlined_call_operand.vmem [shape: f32[1,64], index: 13, kind: input, shape index: {}]   ;;  %s5665_s14 = inlined_call_operand.vmem [shape: bf16[64,10], index: 14, kind: input, shape index: {}]   ;;  %s5666_s15 = inlined_call_operand.vmem [shape: f32[1,10], index: 15, kind: input, shape index: {}]   ;;  %s5667_s16 = inlined_call_operand.hbm [shape: f32[2,1,10], index: 16, kind: output, shape index: {}]  }
   0x1   :  { %5683 = sst [smem:[#allocation12_spill]] %s5651_s0 }
   0x2   :  { %5684 = sst [smem:[#allocation13_spill]] %s5652_s1 }
   0x3   :  { %5685 = sst [smem:[#allocation14_spill]] %s5653_s2 }
   0x4   :  { %5686 = sst [smem:[#allocation15_spill]] %s5658_s7 }
   0x5   :  { %21 = vsyncpa [#allocation7], 0 }
   0x6   :  { %23 = vsyncpa [#allocation7 + $0x1], 0  ;;  %s3953_s21 = smov 0   ;;  %s3955_s22 = smov 0  }
   0x7   :  { %s3957_s23 = smov 0   ;;  %s3959_s24 = smov 0  }
   0x8 LB: > { %5687 = sst [smem:[#allocation9_spill]] %s3842_s23  ;;  %s3974_s25 = sadd.s32 4294967295, %s3846_s24   ;;  %s3846_s24 = sphi %s3959_s24, %s5722_s24   ;;  %s3842_s23 = sphi %s3957_s23, %s5724_s23   ;;  %s3838_s22 = sphi %s3955_s22, %s5726_s22   ;;  %s3834_s21 = sphi %s3953_s21, %s5725_s21  }
   0x9   : > { %s3352_s26 = sadd.s32 4294967294, %s3846_s24   ;;  %s3978_s27 = sadd.s32 1, %s3846_s24  }
   0xa   : > { %5688 = sst [smem:[#allocation10_spill]] %s3978_s27  ;;  %s377_s28 = sadd.s32 1, %s3842_s23 }
   0xb   : > { %s374_s29 = ssub.s32 %s3846_s24, %s3978_s27  ;;  %p387_p0 = scmp.ne.s32.totalorder %s3842_s23, %s3838_s22 }
   0xc   : > { %p375_p1 = scmp.eq.s32.totalorder %s374_s29, 0  ;;  %p388_p2 = scmp.eq.s32.totalorder %s3974_s25, 1 }
   0xd   : > { %p393_p3 = scmp.ne.s32.totalorder %s3838_s22, %s3834_s21  ;;  %p394_p4 = scmp.eq.s32.totalorder %s3352_s26, 1 }
   0xe   : > { %s3989_s30 = scalar_select %p375_p1, %s3842_s23, %s377_s28  }
   0xf   : > { %p3991_p5 = por %p388_p2, %p387_p0  ;;  %p3995_p6 = por %p394_p4, %p393_p3 }
  0x10   : > { %5689 = sst [smem:[#allocation11_spill]] %s3989_s30  ;;  %p3355_p7 = scmp.ge.s32.totalorder %s3846_s24, 1 }
  0x11   : > { %p464_p8 = scmp.lt.s32.totalorder %s3846_s24, 3 }
  0x13   : > { %p465_p9 = pnand %p3355_p7, %p464_p8 }
  0x14   : > { %p512_p10 = scmp.lt.s32.totalorder (!%p465_p9), %s3974_s25, 1  ;;  %s5692_s28 = sld [smem:[#allocation12_spill]] (!%p465_p9) }
  0x15   : > { %468 = sbr.rel (%p465_p9) target bundleno = 3009 (0xbc1), region = 84  ;;  %s5669_s30 = smov (!%p465_p9), 102  }
  0x16   : > { %s5671_s23 = smov (!%p465_p9), 127   ;;  %s5673_s20 = smov (!%p465_p9), 126  }
  0x17   : > { %s3853_s26 = smov (!%p465_p9), 76   ;;  %s5695_s2 = sld [smem:[#allocation14_spill]] (!%p465_p9) }
  0x18   : > { %s5696_s1 = sld [smem:[#allocation13_spill]] (!%p465_p9)  ;;  %s5715_s27 = smov (!%p465_p9), 127  }
  0x19   : > { %s5712_s7 = sld [smem:[#allocation15_spill]] (!%p465_p9) }
  0x1a   : > { %s513_s18 = scalar_select %p512_p10, %s3974_s25, 1  ;;  %v518_v8 = vlaneseq  ;;  %vm573_vm0 = vcmask 818176   ;;  %vm584_vm2 = vcmask 621568   ;;  %vm551_vm3 = vcmask 834560  }
  0x1b   : > { %vm529_vm4 = vcmask 1039360   ;;  %vm562_vm5 = vcmask 826368   ;;  %vm540_vm6 = vcmask 1031168   ;;  %v3856_v26 = vmov 0  }
  0x1c   : > { %s3598_s19 = smul.u32 6, %s513_s18  ;;  %s5675_s18 = smov 100   ;;  %vm4020_vm1 = vcmp.lt.s32.totalorder %v518_v8, 651  ;;  %3660 = vset.pattern.permute.xlu1 %v3856_v26  ;;  %3659 = vset.pattern.permute.xlu0 %v3856_v26  ;;  %vm606_vm7 = vcmask 605184   ;;  %vm595_vm8 = vcmask 613376   ;;  %vm675_vm9 = vcmask 1043456  }
  0x1d   : > { %v634_v23 = vld [vmem:[%s5695_s2] sm:$0xff]  ;;  %3658 = vset.pattern.permute.xlu2 %v3856_v26  ;;  %v637_v37 = vld [vmem:[%s5695_s2 + $0x18] sm:$0xff]  ;;  %vm676_vm10 = vcmask 1044480   ;;  %v3857_v38 = vmov 65535   ;;  %vm668_vm11 = vcmask 72704  }
  0x1e   : > { %s4006_s29 = scalar_lea.vmem %s5692_s28, %s3598_s19  ;;  %s3851_s19 = smov 101   ;;  %v677_v39 = vsel %vm675_vm9, 4294967295, %v3857_v38 }
  0x1f   : > { %v546_v0 = vld [vmem:[%s4006_s29] sm:$0x3f]  ;;  %s3854_s28 = smov 74   ;;  %v4072_v47 = vsel %vm676_vm10, %v677_v39, 0 }
  0x20   : > { %v524_v1 = vld [vmem:[%s4006_s29] sm:$0x3f]  ;;  %548 = vrot.lane.b32.xlu1 %v546_v0, %s5669_s30  ;;  %s3855_s30 = smov 75  }
  0x21   : > { %526 = vrot.lane.b32.xlu0 %v524_v1, %s5671_s23  ;;  %v568_v2 = vld [vmem:[%s4006_s29] sm:$0x3f] }
  0x22   : > { %570 = vrot.lane.b32.xlu2 %v568_v2, %s5675_s18  ;;  %v557_v3 = vld [vmem:[%s4006_s29] sm:$0x3f]  ;;  %v3565_v2 = vld [vmem:[%s5696_s1 + $0x8] sm:$0xff]  ;;  %s5681_s18 = smov 114  }
  0x23   : > { %v535_v4 = vld [vmem:[%s4006_s29] sm:$0x3f] }
  0x24   : > { %v579_v5 = vld [vmem:[%s4006_s29] sm:$0x3f] }
  0x25   : > { %v601_v6 = vld [vmem:[%s4006_s29] sm:$0x3f] }
  0x26   : > { %v590_v7 = vld [vmem:[%s4006_s29] sm:$0x3f] }
  0x27   : > { %v517_v16 = vld [vmem:[%s4006_s29] sm:$0x3f]  ;;  %s3863_s29 = smov 120  }
  0x28   : > { %559 = vrot.lane.b32.xlu1 %v557_v3, %s3851_s19  ;;  %522 = vst.msk [vmem:[#allocation2] ss:$8 sm:$0xf] %vm4020_vm1, %v517_v16  ;;  %v3564_v1 = vld [vmem:[%s5696_s1] sm:$0xff]  ;;  %v636_v3 = vld [vmem:[%s5695_s2 + $0x10] sm:$0xff]  ;;  %s5711_s19 = smov 102  }
  0x29   : > { %537 = vrot.lane.b32.xlu0 %v535_v4, %s5673_s20  ;;  %523 = vst.msk [vmem:[#allocation2] ss:$8 sm:$0x30] %vm4020_vm1, %v517_v16  ;;  %v635_v4 = vld [vmem:[%s5695_s2 + $0x8] sm:$0xff]  ;;  %s5713_s20 = smov 100   ;;  %s3860_s1 = smov 113  }
  0x2a   : > { %581 = vrot.lane.b32.xlu2 %v579_v5, %s3853_s26  ;;  %s5714_s2 = smov 126   ;;  %s3862_s26 = smov 98  }
  0x30   : > { %603 = vrot.lane.b32.xlu1 %v601_v6, %s3854_s28  ;;  %s3293_s28 = scalar_lea.hbm %s5667_s16, %s3974_s25 }
  0x31   : > { %592 = vrot.lane.b32.xlu0 %v590_v7, %s3855_s30 }
  0x32   : > { %650 = vperm.xlu2 %3658, %v636_v3  }
  0x38   : > { %640 = vperm.xlu1 %3660, %v634_v23  }
  0x39   : > { %655 = vperm.xlu0 %3659, %v637_v37  }
  0x3a   : > { %645 = vperm.xlu2 %3658, %v635_v4  }
  0x7c   : > { %v571_v9 = vpop.permute.xlu2 %570 }
  0x7d   : > { %v572_v10 = vrot.slane %v571_v9, 1 }
  0x7f   : > { %v574_v12 = vsel %vm573_vm0, %v571_v9, %v572_v10 }
  0x80   : > { %577 = vst.msk [vmem:[#allocation2 + $0x5] ss:$8 sm:$0xf] %vm4020_vm1, %v574_v12 }
  0x81   : > { %578 = vst.msk [vmem:[#allocation2 + $0x5] ss:$8 sm:$0x30] %vm4020_vm1, %v574_v12 }
  0x84   : > { %v582_v13 = vpop.permute.xlu2 %581 }
  0x85   : > { %v583_v14 = vrot.slane %v582_v13, 1 }
  0x87   : > { %v585_v15 = vsel %vm584_vm2, %v582_v13, %v583_v14 }
  0x88   : > { %588 = vst.msk [vmem:[#allocation2 + $0x6] ss:$8 sm:$0xf] %vm4020_vm1, %v585_v15 }
  0x89   : > { %589 = vst.msk [vmem:[#allocation2 + $0x6] ss:$8 sm:$0x30] %vm4020_vm1, %v585_v15 }
  0x8c   : > { %v4104_v7 = vpop.permute.xlu2 %650 }
  0x92   : > { %v549_v17 = vpop.permute.xlu1 %548 }
  0x93   : > { %v527_v18 = vpop.permute.xlu0 %526  ;;  %v550_v19 = vrot.slane %v549_v17, 1 }
  0x94   : > { %v528_v20 = vrot.slane %v527_v18, 1 }
  0x95   : > { %v552_v21 = vsel %vm551_vm3, %v549_v17, %v550_v19 }
  0x96   : > { %v530_v22 = vsel %vm529_vm4, %v527_v18, %v528_v20  ;;  %555 = vst.msk [vmem:[#allocation2 + $0x3] ss:$8 sm:$0xf] %vm4020_vm1, %v552_v21 }
  0x97   : > { %556 = vst.msk [vmem:[#allocation2 + $0x3] ss:$8 sm:$0x30] %vm4020_vm1, %v552_v21 }
  0x98   : > { %533 = vst.msk [vmem:[#allocation2 + $0x1] ss:$8 sm:$0xf] %vm4020_vm1, %v530_v22 }
  0x99   : > { %534 = vst.msk [vmem:[#allocation2 + $0x1] ss:$8 sm:$0x30] %vm4020_vm1, %v530_v22 }
  0x9a   : > { %v560_v24 = vpop.permute.xlu1 %559 }
  0x9b   : > { %v538_v25 = vpop.permute.xlu0 %537  ;;  %v561_v27 = vrot.slane %v560_v24, 1 }
  0x9c   : > { %v539_v28 = vrot.slane %v538_v25, 1 }
  0x9d   : > { %v563_v29 = vsel %vm562_vm5, %v560_v24, %v561_v27 }
  0x9e   : > { %v541_v30 = vsel %vm540_vm6, %v538_v25, %v539_v28  ;;  %566 = vst.msk [vmem:[#allocation2 + $0x4] ss:$8 sm:$0xf] %vm4020_vm1, %v563_v29 }
  0x9f   : > { %567 = vst.msk [vmem:[#allocation2 + $0x4] ss:$8 sm:$0x30] %vm4020_vm1, %v563_v29 }
  0xa0   : > { %544 = vst.msk [vmem:[#allocation2 + $0x2] ss:$8 sm:$0xf] %vm4020_vm1, %v541_v30 }
  0xa1   : > { %545 = vst.msk [vmem:[#allocation2 + $0x2] ss:$8 sm:$0x30] %vm4020_vm1, %v541_v30 }
  0xa2   : > { %v604_v31 = vpop.permute.xlu1 %603 }
  0xa3   : > { %v593_v32 = vpop.permute.xlu0 %592  ;;  %v605_v33 = vrot.slane %v604_v31, 1 }
  0xa4   : > { %v594_v34 = vrot.slane %v593_v32, 1 }
  0xa5   : > { %v607_v35 = vsel %vm606_vm7, %v604_v31, %v605_v33 }
  0xa6   : > { %v596_v36 = vsel %vm595_vm8, %v593_v32, %v594_v34  ;;  %610 = vst.msk [vmem:[#allocation2 + $0x30] ss:$8 sm:$0xf] %vm4020_vm1, %v607_v35 }
  0xa7   : > { %611 = vst.msk [vmem:[#allocation2 + $0x30] ss:$8 sm:$0x30] %vm4020_vm1, %v607_v35 }
  0xa8   : > { %599 = vst.msk [vmem:[#allocation2 + $0x7] ss:$8 sm:$0xf] %vm4020_vm1, %v596_v36 }
  0xa9   : > { %600 = vst.msk [vmem:[#allocation2 + $0x7] ss:$8 sm:$0x30] %vm4020_vm1, %v596_v36 }
  0xaa   : > { %v4124_v38 = vpop.permute.xlu1 %640 }
  0xab   : > { %v4107_v14 = vpop.permute.xlu0 %655 }
  0xad   : > { %v618_v40 = vld [vmem:[#allocation2 + $0x30] sm:$0x1]  ;;  %v619_v41 = vld [vmem:[#allocation2 + $0x38] sm:$0x1]  ;;  %v620_v42 = vld [vmem:[#allocation2 + $0x40] sm:$0x1] }
  0xae   : > { %v621_v43 = vld [vmem:[#allocation2 + $0x48] sm:$0x1]  ;;  %v622_v44 = vld [vmem:[#allocation2 + $0x50] sm:$0x1]  ;;  %v623_v45 = vld [vmem:[#allocation2 + $0x58] sm:$0x1] }
  0xaf   : > { %v612_v46 = vld [vmem:[#allocation2] sm:$0xff]  ;;  %v613_v48 = vld [vmem:[#allocation2 + $0x8] sm:$0xff]  ;;  %v614_v49 = vld [vmem:[#allocation2 + $0x10] sm:$0xff] }
  0xb0   : > { %v624_v50 = vpack.c.bf16 %v618_v40, %v612_v46  ;;  %v625_v51 = vpack.c.bf16 %v619_v41, %v613_v48  ;;  %v626_v52 = vpack.c.bf16 %v620_v42, %v614_v49  ;;  %v615_v53 = vld [vmem:[#allocation2 + $0x18] sm:$0xff]  ;;  %v616_v54 = vld [vmem:[#allocation2 + $0x20] sm:$0xff]  ;;  %v617_v55 = vld [vmem:[#allocation2 + $0x28] sm:$0xff]  ;;  %v4128_v41 = vpop.permute.xlu2 %645 }
  0xb1   : > { %v627_v56 = vpack.c.bf16 %v621_v43, %v615_v53  ;;  %v628_v57 = vpack.c.bf16 %v622_v44, %v616_v54  ;;  %v629_v58 = vpack.c.bf16 %v623_v45, %v617_v55 }
  0xb2   : > { %v680_v59 = vand.u32 %v4072_v47, %v624_v50  ;;  %v683_v60 = vand.u32 %v4072_v47, %v625_v51  ;;  %v686_v61 = vand.u32 %v4072_v47, %v626_v52 }
  0xb3   : > { %v689_v62 = vand.u32 %v4072_v47, %v627_v56  ;;  %v692_v63 = vand.u32 %v4072_v47, %v628_v57  ;;  %v695_v0 = vand.u32 %v4072_v47, %v629_v58 }
  0xb4   : > { %704 = vmatpush.bf16.msra.mxu0 %v680_v59  ;;  %3597 = vmatpush.bf16.msra.mxu3 %v680_v59 }
  0xb5   : > { %723 = vmatpush.bf16.msra.mxu1 %v683_v60  ;;  %742 = vmatpush.bf16.msra.mxu2 %v686_v61 }
  0xb7   : > { %3364 = vmatmul.msk.bf16.vlgmr.msra.gmra.mxu0 %vm668_vm11, %v3564_v1  ;;  %3365 = vmatmul.msk.bf16.vlgmr.msra.gmra.mxu3 %vm668_vm11, %v3565_v2 }
  0xb8   : > { %761 = vmatpush.bf16.msrb.mxu3 %v689_v62  ;;  %780 = vmatpush.bf16.msrb.mxu0 %v692_v63 }
  0xb9   : > { %799 = vmatpush.bf16.msrb.mxu1 %v695_v0  ;;  %3368 = vmatmul.msk.bf16.vlgmr.msra.gmra.mxu2 %vm668_vm11, %v3564_v1 }
  0xba   : > { %3366 = vmatmul.msk.bf16.vlgmr.msra.gmra.mxu1 %vm668_vm11, %v3564_v1 }
  0xc7   : > { %3372 = vmatmul.msk.bf16.vlgmr.msrb.gmra.mxu0 %vm668_vm11, %v3564_v1  ;;  %3370 = vmatmul.msk.bf16.vlgmr.msrb.gmra.mxu3 %vm668_vm11, %v3564_v1 }
  0xc9   : > { %3369 = vmatmul.msk.bf16.gmra.mxu2 %vm668_vm11, %v3565_v2 }
  0xca   : > { %3367 = vmatmul.msk.bf16.gmra.mxu1 %vm668_vm11, %v3565_v2 }
  0xd7   : > { %3373 = vmatmul.msk.bf16.gmra.mxu0 %vm668_vm11, %v3565_v2  ;;  %3371 = vmatmul.msk.bf16.gmra.mxu3 %vm668_vm11, %v3565_v2 }
  0xda   : > { %3374 = vmatmul.msk.bf16.vlgmr.msrb.gmra.mxu1 %vm668_vm11, %v3564_v1 }
  0xea   : > { %3375 = vmatmul.msk.bf16.gmra.mxu1 %vm668_vm11, %v3565_v2 }
 0x134   : > { %v706_v5 = vpop.f32.mrf.mxu0 }
 0x135   : > { %v707_v52 = vadd.f32 %v706_v5, %v4124_v38 }
 0x137   : > { %v725_v6 = vpop.f32.mrf.mxu1 }
 0x138   : > { %v4139_v53 = vadd.f32 %v725_v6, %v4124_v38 }
 0x13a   : > { %v711_v8 = vpop.f32.mrf.mxu3 }
 0x13b   : > { %v712_v9 = vadd.f32 %v711_v8, %v4104_v7 }
 0x13c   : > { %v744_v10 = vpop.f32.mrf.mxu2  ;;  %v708_v11 = vpop.f32.mrf.mxu0 }
 0x13d   : > { %v3376_v13 = vmul.f32 -1.442695, %v712_v9  ;;  %v4142_v55 = vadd.f32 %v744_v10, %v4124_v38  ;;  %v4152_v58 = vadd.f32 %v708_v11, %v4128_v41 }
 0x13f   : > { %v727_v12 = vpop.f32.mrf.mxu1  ;;  %3696 = vpow2.f32 %v3376_v13 }
 0x140   : > { %v4155_v59 = vadd.f32 %v727_v12, %v4128_v41 }
 0x142   : > { %v713_v15 = vpop.f32.mrf.mxu3 }
 0x143   : > { %v714_v16 = vadd.f32 %v713_v15, %v4107_v14 }
 0x144   : > { %v4110_v17 = vpop.f32.mrf.mxu2  ;;  %v4112_v18 = vpop.f32.mrf.mxu0 }
 0x145   : > { %v3697_v20 = vpop.eup %3696  ;;  %v3382_v21 = vmul.f32 -1.442695, %v714_v16  ;;  %v4170_v11 = vadd.f32 %v4110_v17, %v4128_v41 }
 0x146   : > { %v847_v23 = vadd.f32 1.0, %v3697_v20 }
 0x147   : > { %v730_v19 = vpop.f32.mrf.mxu1  ;;  %3698 = vpow2.f32 %v3382_v21 }
 0x148   : > { %v731_v22 = vadd.f32 %v730_v19, %v4104_v7  ;;  %3700 = vrcp.f32 %v847_v23  ;;  %vm864_vm12 = vweird.f32 %v847_v23  ;;  %v870_v44 = vand.u32 2147483648, %v847_v23 }
 0x149   : > { %v868_v48 = vand.u32 2147483647, %v847_v23 }
 0x14a   : > { %v3377_v24 = vmul.f32 -1.442695, %v731_v22  ;;  %v4115_v25 = vpop.f32.mrf.mxu3  ;;  %v871_v0 = vor.u32 1.1754944e-38, %v870_v44 }
 0x14b   : > { %vm869_vm15 = vcmp.eq.f32.partialorder %v868_v48, 8.507059e+37 }
 0x14c   : > { %3702 = vpow2.f32 %v3377_v24  ;;  %v749_v26 = vpop.f32.mrf.mxu2  ;;  %v4117_v27 = vpop.f32.mrf.mxu0 }
 0x14d   : > { %v750_v28 = vadd.f32 %v749_v26, %v4104_v7  ;;  %v3699_v30 = vpop.eup %3698 }
 0x14e   : > { %v3701_v32 = vpop.eup %3700  ;;  %v4121_v33 = vadd.f32 1.0, %v3699_v30 }
 0x14f   : > { %v732_v29 = vpop.f32.mrf.mxu1  ;;  %v3378_v34 = vmul.f32 -1.442695, %v750_v28  ;;  %v860_v36 = vmul.f32 %v3701_v32, %v847_v23  ;;  %vm865_vm13 = vweird.f32 %v3701_v32 }
 0x150   : > { %v733_v31 = vadd.f32 %v732_v29, %v4107_v14  ;;  %3704 = vrcp.f32 %v4121_v33  ;;  %vm4147_vm14 = vmor %vm864_vm12, %vm865_vm13  ;;  %v958_v2 = vand.u32 2147483647, %v4121_v33  ;;  %v960_v4 = vand.u32 2147483648, %v4121_v33 }
 0x151   : > { %v861_v39 = vsub.f32 1.0, %v860_v36  ;;  %3706 = vpow2.f32 %v3378_v34  ;;  %vm954_vm1 = vweird.f32 %v4121_v33 }
 0x152   : > { %v3703_v35 = vpop.eup %3702  ;;  %v3383_v37 = vmul.f32 -1.442695, %v733_v31  ;;  %v4130_v42 = vpop.f32.mrf.mxu3  ;;  %vm4175_vm2 = vcmp.eq.f32.partialorder %v958_v2, 8.507059e+37  ;;  %v961_v22 = vor.u32 1.1754944e-38, %v960_v4 }
 0x153   : > { %v4126_v40 = vadd.f32 1.0, %v3703_v35  ;;  %v862_v43 = vmul.f32 %v3701_v32, %v861_v39 }
 0x154   : > { %3708 = vpow2.f32 %v3383_v37  ;;  %v751_v45 = vpop.f32.mrf.mxu2  ;;  %v787_v46 = vpop.f32.mrf.mxu0 }
 0x155   : > { %3710 = vrcp.f32 %v4126_v40  ;;  %v752_v49 = vadd.f32 %v751_v45, %v4107_v14  ;;  %v788_v50 = vadd.f32 %v787_v46, %v4104_v7  ;;  %v863_v54 = vadd.f32 %v3701_v32, %v862_v43 }
 0x156   : > { %v4144_v56 = vpop.eup %3704  ;;  %v883_v19 = vand.u32 2147483647, %v4126_v40  ;;  %v885_v20 = vand.u32 2147483648, %v4126_v40  ;;  %vm879_vm7 = vweird.f32 %v4126_v40 }
 0x157   : > { %v4135_v51 = vpop.f32.mrf.mxu1  ;;  %v3384_v60 = vmul.f32 -1.442695, %v752_v49  ;;  %v3380_v61 = vmul.f32 -1.442695, %v788_v50  ;;  %v3707_v62 = vpop.eup %3706  ;;  %v867_v63 = vsel %vm4147_vm14, %v3701_v32, %v863_v54  ;;  %v950_v1 = vmul.f32 %v4144_v56, %v4121_v33 }
 0x158   : > { %v4163_v5 = vadd.f32 1.0, %v3707_v62  ;;  %v872_v8 = vsel %vm869_vm15, %v871_v0, %v867_v63  ;;  %vm955_vm5 = vweird.f32 %v4144_v56  ;;  %vm4192_vm10 = vcmp.eq.f32.partialorder %v883_v19, 8.507059e+37 }
 0x159   : > { %3712 = vpow2.f32 %v3384_v60  ;;  %v951_v9 = vsub.f32 1.0, %v950_v1  ;;  %v4181_v21 = vmul.f32 %v872_v8, %v707_v52  ;;  %v886_v35 = vor.u32 1.1754944e-38, %v885_v20  ;;  %vm4204_vm13 = vmor %vm954_vm1, %vm955_vm5 }
 0x15a   : > { %v3709_v3 = vpop.eup %3708  ;;  %3714 = vpow2.f32 %v3380_v61  ;;  %v768_v13 = vpop.f32.mrf.mxu3  ;;  %v898_v29 = vand.u32 2147483647, %v4163_v5  ;;  %v900_v30 = vand.u32 2147483648, %v4163_v5  ;;  %vm894_vm12 = vweird.f32 %v4163_v5 }
 0x15b   : > { %v3711_v6 = vpop.eup %3710  ;;  %v4165_v10 = vadd.f32 1.0, %v3709_v3  ;;  %3716 = vrcp.f32 %v4163_v5  ;;  %v952_v15 = vmul.f32 %v4144_v56, %v951_v9  ;;  %v769_v31 = vadd.f32 %v768_v13, %v4104_v7 }
 0x15c   : > { %v875_v12 = vmul.f32 %v3711_v6, %v4126_v40  ;;  %vm880_vm9 = vweird.f32 %v3711_v6  ;;  %v1051_v39 = vmax.f32 %v4181_v21, 0.0  ;;  %v789_v48 = vpop.f32.mrf.mxu0  ;;  %vm4221_vm1 = vcmp.eq.f32.partialorder %v898_v29, 8.507059e+37 }
 0x15d   : > { %3718 = vrcp.f32 %v4165_v10  ;;  %v953_v24 = vadd.f32 %v4144_v56, %v952_v15  ;;  %v973_v45 = vand.u32 2147483647, %v4165_v10  ;;  %v975_v46 = vand.u32 2147483648, %v4165_v10  ;;  %vm881_vm14 = vmor %vm879_vm7, %vm880_vm9 }
 0x15e   : > { %v876_v17 = vsub.f32 1.0, %v875_v12  ;;  %vm969_vm15 = vweird.f32 %v4165_v10  ;;  %v901_v60 = vor.u32 1.1754944e-38, %v900_v30  ;;  %v790_v63 = vadd.f32 %v789_v48, %v4107_v14 }
 0x15f   : > { %v4184_v23 = vpop.f32.mrf.mxu1  ;;  %v3713_v26 = vpop.eup %3712  ;;  %v957_v49 = vsel %vm4204_vm13, %v4144_v56, %v953_v24  ;;  %v3379_v56 = vmul.f32 -1.442695, %v769_v31  ;;  %vm4232_vm5 = vcmp.eq.f32.partialorder %v973_v45, 8.507059e+37  ;;  %v976_v3 = vor.u32 1.1754944e-38, %v975_v46 }
 0x160   : > { %v877_v28 = vmul.f32 %v3711_v6, %v876_v17  ;;  %v3715_v32 = vpop.eup %3714  ;;  %v4197_v36 = vadd.f32 1.0, %v3713_v26  ;;  %v962_v0 = vsel %vm4175_vm2, %v961_v22, %v957_v49  ;;  %v3386_v19 = vmul.f32 -1.442695, %v790_v63 }
 0x161   : > { %v3717_v37 = vpop.eup %3716  ;;  %v4219_v50 = vadd.f32 1.0, %v3715_v32  ;;  %v4242_v22 = vmul.f32 %v962_v0, %v4152_v58 }
 0x162   : > { %v878_v44 = vadd.f32 %v3711_v6, %v877_v28  ;;  %v890_v33 = vmul.f32 %v3717_v37, %v4163_v5  ;;  %3720 = vrcp.f32 %v4197_v36  ;;  %v770_v4 = vpop.f32.mrf.mxu3  ;;  %vm895_vm7 = vweird.f32 %v3717_v37 }
 0x163   : > { %v3719_v52 = vpop.eup %3718  ;;  %3722 = vrcp.f32 %v4219_v50  ;;  %v988_v13 = vand.u32 2147483647, %v4197_v36  ;;  %v771_v20 = vadd.f32 %v770_v4, %v4107_v14  ;;  %vm896_vm2 = vmor %vm894_vm12, %vm895_vm7  ;;  %v990_v24 = vand.u32 2147483648, %v4197_v36 }
 0x164   : > { %v882_v54 = vsel %vm881_vm14, %v3711_v6, %v878_v44  ;;  %v891_v61 = vsub.f32 1.0, %v890_v33  ;;  %v965_v62 = vmul.f32 %v3719_v52, %v4165_v10  ;;  %vm970_vm9 = vweird.f32 %v3719_v52 }
 0x165   : > { %v887_v40 = vsel %vm4192_vm10, %v886_v35, %v882_v54  ;;  %3724 = vpow2.f32 %v3379_v56  ;;  %vm984_vm10 = vweird.f32 %v4197_v36  ;;  %v3385_v29 = vmul.f32 -1.442695, %v771_v20  ;;  %vm971_vm13 = vmor %vm969_vm15, %vm970_vm9 }
 0x166   : > { %v1040_v1 = vmul.f32 %v887_v40, %v4139_v53  ;;  %v892_v8 = vmul.f32 %v3717_v37, %v891_v61  ;;  %v966_v9 = vsub.f32 1.0, %v965_v62  ;;  %3726 = vpow2.f32 %v3386_v19 }
 0x167   : > { %v806_v6 = vpop.f32.mrf.mxu1  ;;  %vm4262_vm12 = vcmp.eq.f32.partialorder %v988_v13, 8.507059e+37  ;;  %3728 = vpow2.f32 %v3385_v29  ;;  %v928_v40 = vand.u32 2147483647, %v4219_v50  ;;  %v930_v61 = vand.u32 2147483648, %v4219_v50 }
 0x168   : > { %v4237_v12 = vmax.f32 %v1040_v1, 0.0  ;;  %v3721_v15 = vpop.eup %3720  ;;  %v893_v53 = vadd.f32 %v3717_v37, %v892_v8  ;;  %v967_v16 = vmul.f32 %v3719_v52, %v966_v9  ;;  %v807_v5 = vadd.f32 %v806_v6, %v4104_v7 }
 0x169   : > { %v980_v17 = vmul.f32 %v3721_v15, %v4197_v36  ;;  %v3723_v32 = vpop.eup %3722  ;;  %vm985_vm14 = vweird.f32 %v3721_v15  ;;  %v783_v4 = vadd.f32 %v4112_v18, %v4124_v38  ;;  %vm929_vm9 = vcmp.eq.f32.partialorder %v928_v40, 8.507059e+37 }
 0x16a   : > { %1064 = vst [vmem:[#allocation3 + $0x8] sm:$0xff] %v4237_v12  ;;  %v897_v26 = vsel %vm896_vm2, %v3717_v37, %v893_v53  ;;  %v968_v28 = vadd.f32 %v3719_v52, %v967_v16  ;;  %v3661_v31 = vpack.i.bf16 %v4237_v12, %v1051_v39  ;;  %v920_v7 = vmul.f32 %v3723_v32, %v4219_v50  ;;  %vm986_vm15 = vmor %vm984_vm10, %vm985_vm14 }
 0x16b   : > { %v902_v30 = vsel %vm4221_vm1, %v901_v60, %v897_v26  ;;  %v981_v58 = vsub.f32 1.0, %v980_v17  ;;  %v3725_v43 = vpop.eup %3724  ;;  %v3381_v49 = vmul.f32 -1.442695, %v807_v5  ;;  %vm925_vm1 = vweird.f32 %v3723_v32 }
 0x16c   : > { %v4260_v34 = vmul.f32 %v902_v30, %v4142_v55  ;;  %v972_v35 = vsel %vm971_vm13, %v3719_v52, %v968_v28  ;;  %3662 = vrot.lane.b32.xlu1 %v3661_v31, %s5671_s23  ;;  %v4272_v48 = vadd.f32 1.0, %v3725_v43  ;;  %v991_v52 = vor.u32 1.1754944e-38, %v990_v24  ;;  %v3727_v60 = vpop.eup %3726 }
 0x16d   : > { %v977_v10 = vsel %vm4232_vm5, %v976_v3, %v972_v35  ;;  %v982_v44 = vmul.f32 %v3721_v15, %v981_v58  ;;  %v921_v54 = vsub.f32 1.0, %v920_v7  ;;  %v4282_v63 = vadd.f32 1.0, %v3727_v60  ;;  %v3729_v0 = vpop.eup %3728 }
 0x16e   : > { %v1053_v55 = vmax.f32 %v4260_v34, 0.0  ;;  %v1046_v46 = vmul.f32 %v977_v10, %v4155_v59  ;;  %3730 = vrcp.f32 %v4272_v48  ;;  %vm924_vm5 = vweird.f32 %v4219_v50  ;;  %v1256_v34 = vld [vmem:[%s5712_s7 + $0xe0] sm:$0xff] }
 0x16f   : > { %v808_v45 = vpop.f32.mrf.mxu1  ;;  %v983_v33 = vadd.f32 %v3721_v15, %v982_v44  ;;  %v922_v62 = vmul.f32 %v3723_v32, %v921_v54  ;;  %3732 = vpow2.f32 %v3381_v49  ;;  %vm926_vm7 = vmor %vm924_vm5, %vm925_vm1  ;;  %v931_v6 = vor.u32 1.1754944e-38, %v930_v61 }
 0x170   : > { %v809_v57 = vadd.f32 %v808_v45, %v4107_v14  ;;  %v4275_v56 = vmax.f32 %v1046_v46, 0.0  ;;  %v1057_v14 = vmax.f32 %v4242_v22, 0.0  ;;  %3734 = vrcp.f32 %v4282_v63  ;;  %v1288_v22 = vld [vmem:[%s5712_s7 + $0x1e0] sm:$0xff] }
 0x171   : > { %v987_v59 = vsel %vm986_vm15, %v3721_v15, %v983_v33  ;;  %v923_v3 = vadd.f32 %v3723_v32, %v922_v62  ;;  %v4295_v8 = vadd.f32 1.0, %v3729_v0  ;;  %v915_v24 = vand.u32 2147483648, %v4272_v48 }
 0x172   : > { %1071 = vst [vmem:[#allocation3 + $0x38] sm:$0xff] %v4275_v56  ;;  %v992_v36 = vsel %vm4262_vm12, %v991_v52, %v987_v59  ;;  %v3387_v1 = vmul.f32 -1.442695, %v809_v57  ;;  %v764_v28 = vadd.f32 %v4115_v25, %v4124_v38  ;;  %v785_v29 = vadd.f32 %v4117_v27, %v4128_v41 }
 0x173   : > { %v4289_v2 = vmul.f32 %v992_v36, %v4170_v11  ;;  %v927_v13 = vsel %vm926_vm7, %v3723_v32, %v923_v3  ;;  %v3671_v11 = vpack.i.bf16 %v4275_v56, %v1057_v14  ;;  %v913_v31 = vand.u32 2147483647, %v4272_v48 }
 0x174   : > { %3736 = vpow2.f32 %v3387_v1  ;;  %v3731_v15 = vpop.eup %3730  ;;  %v932_v50 = vsel %vm929_vm9, %v931_v6, %v927_v13  ;;  %v766_v35 = vadd.f32 %v4130_v42, %v4128_v41  ;;  %vm909_vm10 = vweird.f32 %v4272_v48 }
 0x175   : > { %v1059_v9 = vmax.f32 %v4289_v2, 0.0  ;;  %3738 = vrcp.f32 %v4295_v8  ;;  %v1043_v53 = vmul.f32 %v932_v50, %v783_v4  ;;  %v905_v18 = vmul.f32 %v3731_v15, %v4272_v48  ;;  %3672 = vrot.lane.b32.xlu0 %v3671_v11, %s5671_s23  ;;  %v3733_v16 = vpop.eup %3732  ;;  %v1352_v2 = vld [vmem:[%s5712_s7 + $0x3e0] sm:$0xff] }
 0x176   : > { %v3735_v19 = vpop.eup %3734  ;;  %v4307_v26 = vadd.f32 1.0, %v3733_v16  ;;  %vm910_vm2 = vweird.f32 %v3731_v15  ;;  %v916_v27 = vor.u32 1.1754944e-38, %v915_v24  ;;  %v1020_v10 = vand.u32 2147483648, %v4282_v63 }
 0x177   : > { %v4304_v20 = vmax.f32 %v1043_v53, 0.0  ;;  %v906_v17 = vsub.f32 1.0, %v905_v18  ;;  %v1010_v30 = vmul.f32 %v3735_v19, %v4282_v63  ;;  %vm911_vm13 = vmor %vm909_vm10, %vm910_vm2  ;;  %vm1015_vm12 = vweird.f32 %v3735_v19 }
 0x178   : > { %3740 = vrcp.f32 %v4307_v26  ;;  %v1018_v45 = vand.u32 2147483647, %v4282_v63  ;;  %vm914_vm14 = vcmp.eq.f32.partialorder %v913_v31, 8.507059e+37  ;;  %v1003_v48 = vand.u32 2147483647, %v4295_v8 }
 0x179   : > { %v907_v5 = vmul.f32 %v3731_v15, %v906_v17  ;;  %v1011_v37 = vsub.f32 1.0, %v1010_v30  ;;  %vm1014_vm15 = vweird.f32 %v4282_v63  ;;  %v1005_v52 = vand.u32 2147483648, %v4295_v8 }
 0x17a   : > { %v3737_v58 = vpop.eup %3736  ;;  %vm1016_vm1 = vmor %vm1014_vm15, %vm1015_vm12  ;;  %v1021_v60 = vor.u32 1.1754944e-38, %v1020_v10  ;;  %vm1019_vm7 = vcmp.eq.f32.partialorder %v1018_v45, 8.507059e+37  ;;  %vm999_vm9 = vweird.f32 %v4295_v8  ;;  %vm1004_vm2 = vcmp.eq.f32.partialorder %v1003_v48, 8.507059e+37 }
 0x17b   : > { %v3739_v32 = vpop.eup %3738  ;;  %v4319_v25 = vadd.f32 1.0, %v3737_v58  ;;  %v908_v43 = vadd.f32 %v3731_v15, %v907_v5  ;;  %v1012_v7 = vmul.f32 %v3735_v19, %v1011_v37  ;;  %v1006_v3 = vor.u32 1.1754944e-38, %v1005_v52 }
 0x17c   : > { %v995_v44 = vmul.f32 %v3739_v32, %v4295_v8  ;;  %vm1000_vm5 = vweird.f32 %v3739_v32  ;;  %v945_v6 = vand.u32 2147483648, %v4307_v26  ;;  %v943_v11 = vand.u32 2147483647, %v4307_v26 }
 0x17d   : > { %3742 = vrcp.f32 %v4319_v25  ;;  %v912_v46 = vsel %vm911_vm13, %v3731_v15, %v908_v43  ;;  %v1013_v33 = vadd.f32 %v3735_v19, %v1012_v7  ;;  %vm1001_vm10 = vmor %vm999_vm9, %vm1000_vm5  ;;  %vm939_vm12 = vweird.f32 %v4307_v26 }
 0x17e   : > { %v996_v42 = vsub.f32 1.0, %v995_v44  ;;  %v917_v49 = vsel %vm914_vm14, %v916_v27, %v912_v46  ;;  %v3741_v54 = vpop.eup %3740  ;;  %v946_v24 = vor.u32 1.1754944e-38, %v945_v6  ;;  %v1033_v58 = vand.u32 2147483647, %v4319_v25  ;;  %v1284_v6 = vld [vmem:[%s5712_s7 + $0x1c0] sm:$0xff] }
 0x17f   : > { %v4328_v57 = vmul.f32 %v917_v49, %v764_v28  ;;  %v1017_v61 = vsel %vm1016_vm1, %v3735_v19, %v1013_v33  ;;  %v935_v59 = vmul.f32 %v3741_v54, %v4307_v26  ;;  %vm940_vm13 = vweird.f32 %v3741_v54 }
 0x180   : > { %v997_v40 = vmul.f32 %v3739_v32, %v996_v42  ;;  %v1022_v0 = vsel %vm1019_vm7, %v1021_v60, %v1017_v61  ;;  %v1035_v28 = vand.u32 2147483648, %v4319_v25  ;;  %vm941_vm14 = vmor %vm939_vm12, %vm940_vm13  ;;  %v802_v5 = vadd.f32 %v4135_v51, %v4124_v38 }
 0x181   : > { %v1054_v62 = vmax.f32 %v4328_v57, 0.0  ;;  %v1049_v1 = vmul.f32 %v1022_v0, %v785_v29  ;;  %v936_v4 = vsub.f32 1.0, %v935_v59  ;;  %vm944_vm1 = vcmp.eq.f32.partialorder %v943_v11, 8.507059e+37  ;;  %v1250_v11 = vld [vmem:[%s5712_s7 + $0xb0] sm:$0xff] }
 0x182   : > { %v998_v36 = vadd.f32 %v3739_v32, %v997_v40  ;;  %vm1029_vm5 = vweird.f32 %v4319_v25  ;;  %v1036_v43 = vor.u32 1.1754944e-38, %v1035_v28  ;;  %v804_v27 = vadd.f32 %v4184_v23, %v4128_v41  ;;  %v1266_v57 = vld [vmem:[%s5712_s7 + $0x130] sm:$0xff] }
 0x183   : > { %v3743_v63 = vpop.eup %3742  ;;  %v3666_v8 = vpack.i.bf16 %v1054_v62, %v1053_v55  ;;  %v4340_v50 = vmax.f32 %v1049_v1, 0.0  ;;  %v937_v18 = vmul.f32 %v3741_v54, %v936_v4  ;;  %vm1068_vm9 = vcmask 89088   ;;  %v1258_v1 = vld [vmem:[%s5712_s7 + $0xf0] sm:$0xff]  ;;  %v1252_v4 = vld [vmem:[%s5712_s7 + $0xc0] sm:$0xff] }
 0x184   : > { %v1002_v13 = vsel %vm1001_vm10, %v3739_v32, %v998_v36  ;;  %v1025_v15 = vmul.f32 %v3743_v63, %v4319_v25  ;;  %vm1030_vm15 = vweird.f32 %v3743_v63  ;;  %1391 = vmatpush.msrb.mxu2 %v1258_v1  ;;  %vm1384_vm10 = vcmask 916480  }
 0x185   : > { %v1007_v53 = vsel %vm1004_vm2, %v1006_v3, %v1002_v13  ;;  %3667 = vrot.lane.b32.xlu2 %v3666_v8, %s5671_s23  ;;  %v938_v17 = vadd.f32 %v3741_v54, %v937_v18  ;;  %vm1031_vm7 = vmor %vm1029_vm5, %vm1030_vm15  ;;  %vm1034_vm2 = vcmp.eq.f32.partialorder %v1033_v58, 8.507059e+37  ;;  %v1290_v3 = vld [vmem:[%s5712_s7 + $0x1f0] sm:$0xff]  ;;  %v1320_v8 = vld [vmem:[%s5712_s7 + $0x2e0] sm:$0xff]  ;;  %vm1631_vm13 = vcmask 449536  }
 0x186   : > { %v4342_v16 = vmul.f32 %v1007_v53, %v766_v35  ;;  %v1026_v19 = vsub.f32 1.0, %v1025_v15  ;;  %1414 = vmatpush.msra.mxu3 %v1290_v3  ;;  %1392 = vmatpush.msrb.mxu2 %v1256_v34  ;;  %v1322_v13 = vld [vmem:[%s5712_s7 + $0x2f0] sm:$0xff]  ;;  %v1304_v3 = vld [vmem:[%s5712_s7 + $0x260] sm:$0xff]  ;;  %vm1703_vm12 = vcmask 932864   ;;  %vm1730_vm15 = vcmask 924672  }
 0x187   : > { %v942_v31 = vsel %vm941_vm14, %v3741_v54, %v938_v17  ;;  %v1282_v15 = vld [vmem:[%s5712_s7 + $0x1b0] sm:$0xff]  ;;  %1437 = vmatpush.msra.mxu0 %v1322_v13  ;;  %v1280_v17 = vld [vmem:[%s5712_s7 + $0x1a0] sm:$0xff]  ;;  %vm1809_vm14 = vcmask 809984  }
 0x188   : > { %v1060_v29 = vmax.f32 %v4342_v16, 0.0  ;;  %v1027_v30 = vmul.f32 %v3743_v63, %v1026_v19  ;;  %v947_v32 = vsel %vm944_vm1, %v946_v24, %v942_v31  ;;  %1415 = vmatpush.msra.mxu3 %v1288_v22  ;;  %v1318_v53 = vld [vmem:[%s5712_s7 + $0x2d0] sm:$0xff]  ;;  %v1248_v19 = vld [vmem:[%s5712_s7 + $0xa0] sm:$0xff] }
 0x189   : > { %v1044_v37 = vmul.f32 %v947_v32, %v802_v5  ;;  %1438 = vmatpush.msra.mxu0 %v1320_v8  ;;  %v1246_v58 = vld [vmem:[%s5712_s7 + $0x90] sm:$0xff]  ;;  %v1232_v22 = vld [vmem:[%s5712_s7 + $0x20] sm:$0xff] }
 0x18a   : > { %v1028_v35 = vadd.f32 %v3743_v63, %v1027_v30  ;;  %v3676_v26 = vpack.i.bf16 %v1060_v29, %v1059_v9  ;;  %v1316_v30 = vld [vmem:[%s5712_s7 + $0x2c0] sm:$0xff]  ;;  %v1278_v5 = vld [vmem:[%s5712_s7 + $0x190] sm:$0xff] }
 0x18b   : > { %v1056_v38 = vmax.f32 %v1044_v37, 0.0  ;;  %1439 = vmatpush.msra.mxu0 %v1318_v53  ;;  %v1262_v53 = vld [vmem:[%s5712_s7 + $0x110] sm:$0xff] }
 0x18c   : > { %v1032_v10 = vsel %vm1031_vm7, %v3743_v63, %v1028_v35  ;;  %3677 = vrot.lane.b32.xlu1 %v3676_v26, %s5671_s23  ;;  %v1314_v35 = vld [vmem:[%s5712_s7 + $0x2b0] sm:$0xff] }
 0x18d   : > { %v1037_v51 = vsel %vm1034_vm2, %v1036_v43, %v1032_v10  ;;  %1104 = vrot.lane.b32.xlu2 %v4304_v20, %s5671_s23  ;;  %1069 = vst.msk [vmem:[#allocation3 + $0x28] sm:$0xff] %vm1068_vm9, %v1056_v38  ;;  %v1354_v26 = vld [vmem:[%s5712_s7 + $0x3f0] sm:$0xff]  ;;  %v1276_v10 = vld [vmem:[%s5712_s7 + $0x180] sm:$0xff]  ;;  %1440 = vmatpush.msra.mxu0 %v1316_v30  ;;  %v1259_v30 = vld [vmem:[%s5712_s7 + $0xf8] sm:$0xff] }
 0x18e   : > { %v1050_v44 = vmul.f32 %v1037_v51, %v804_v27  ;;  %v1244_v27 = vld [vmem:[%s5712_s7 + $0x80] sm:$0xff]  ;;  %1460 = vmatpush.msra.mxu1 %v1354_v26  ;;  %v1242_v38 = vld [vmem:[%s5712_s7 + $0x70] sm:$0xff]  ;;  %v1255_v26 = vld [vmem:[%s5712_s7 + $0xd8] sm:$0xff] }
 0x18f   : > { %v1274_v51 = vld [vmem:[%s5712_s7 + $0x170] sm:$0xff]  ;;  %1441 = vmatpush.msra.mxu0 %v1314_v35 }
 0x190   : > { %v1062_v25 = vmax.f32 %v1050_v44, 0.0  ;;  %1461 = vmatpush.msra.mxu1 %v1352_v2  ;;  %v1310_v44 = vld [vmem:[%s5712_s7 + $0x290] sm:$0xff]  ;;  %v1253_v2 = vld [vmem:[%s5712_s7 + $0xc8] sm:$0xff] }
 0x191   : > { %v1342_v16 = vld [vmem:[%s5712_s7 + $0x390] sm:$0xff] }
 0x192   : > { %1075 = vst.msk [vmem:[#allocation3 + $0x58] sm:$0xff] %vm1068_vm9, %v1062_v25  ;;  %v1350_v25 = vld [vmem:[%s5712_s7 + $0x3d0] sm:$0xff] }
 0x193   : > { %1462 = vmatpush.msra.mxu1 %v1350_v25  ;;  %v1378_v35 = vld [vmem:[%s5712_s7 + $0x4b0] sm:$0xff] }
 0x194   : > { %1114 = vrot.lane.b32.xlu1 %v4340_v50, %s5671_s23  ;;  %v4363_v7 = vld [vmem:[#allocation3 + $0x28] sm:$0xff]  ;;  %v1370_v25 = vld [vmem:[%s5712_s7 + $0x470] sm:$0xff] }
 0x195   : > { %1148 = vrot.lane.b32.xlu0 %v4363_v7, %s5671_s23 }
 0x199   : > { %v4367_v41 = vld [vmem:[#allocation3 + $0x58] sm:$0xff] }
 0x19a   : > { %1150 = vrot.lane.b32.xlu2 %v4367_v41, %s5671_s23  ;;  %s3858_s23 = smov 99  }
 0x1de   : > { %v3663_v23 = vpop.permute.xlu1 %3662 }
 0x1df   : > { %v3665_v45 = vunpack.i.h.bf16 %v3663_v23  ;;  %v3664_v46 = vunpack.i.l.bf16 %v3663_v23  ;;  %v4371_v42 = vpop.permute.xlu2 %3667 }
 0x1e0   : > { %v3669_v48 = vunpack.i.l.bf16 %v4371_v42  ;;  %v3670_v60 = vunpack.i.h.bf16 %v4371_v42 }
 0x1e1   : > { %v1116_v49 = vsel %vm529_vm4, %v3664_v46, %v3665_v45  ;;  %v1272_v46 = vld [vmem:[%s5712_s7 + $0x160] sm:$0xff] }
 0x1e2   : > { %v4377_v33 = vmax.f32 %v1051_v39, %v1116_v49  ;;  %v1117_v52 = vsel %vm529_vm4, %v3665_v45, %v3669_v48  ;;  %v1118_v59 = vsel %vm529_vm4, %v3669_v48, %v3670_v60  ;;  %v1240_v45 = vld [vmem:[%s5712_s7 + $0x60] sm:$0xff] }
 0x1e3   : > { %v4381_v54 = vmax.f32 %v4237_v12, %v1117_v52  ;;  %v4393_v12 = vmax.f32 %v1053_v55, %v1118_v59  ;;  %v1254_v55 = vld [vmem:[%s5712_s7 + $0xd0] sm:$0xff]  ;;  %v1308_v48 = vld [vmem:[%s5712_s7 + $0x280] sm:$0xff] }
 0x1e4   : > { %1393 = vmatpush.msrb.mxu2 %v1254_v55  ;;  %v1348_v49 = vld [vmem:[%s5712_s7 + $0x3c0] sm:$0xff]  ;;  %v1238_v52 = vld [vmem:[%s5712_s7 + $0x50] sm:$0xff] }
 0x1e5   : > { %v3681_v40 = vpack.i.bf16 %v4381_v54, %v4377_v33  ;;  %1463 = vmatpush.msra.mxu1 %v1348_v49  ;;  %v1302_v55 = vld [vmem:[%s5712_s7 + $0x250] sm:$0xff]  ;;  %v1368_v49 = vld [vmem:[%s5712_s7 + $0x460] sm:$0xff] }
 0x1e6   : > { %1394 = vmatpush.msrb.mxu2 %v1252_v4  ;;  %v1264_v4 = vld [vmem:[%s5712_s7 + $0x120] sm:$0xff] }
 0x1e7   : > { %v3673_v61 = vpop.permute.xlu0 %3672  ;;  %3682 = vrot.lane.b32.xlu0 %v3681_v40, %s5711_s19  ;;  %v4503_v23 = vpop.permute.xlu2 %1104  ;;  %v1270_v40 = vld [vmem:[%s5712_s7 + $0x150] sm:$0xff] }
 0x1e8   : > { %v3675_v21 = vunpack.i.h.bf16 %v3673_v61  ;;  %v3674_v39 = vunpack.i.l.bf16 %v3673_v61  ;;  %1395 = vmatpush.msrb.mxu2 %v1250_v11  ;;  %v1119_v61 = vsel %vm529_vm4, %v3670_v60, %v4503_v23  ;;  %v1268_v60 = vld [vmem:[%s5712_s7 + $0x140] sm:$0xff]  ;;  %v1230_v11 = vld [vmem:[%s5712_s7 + $0x10] sm:$0xff] }
 0x1e9   : > { %v4544_v1 = vmax.f32 %v1054_v62, %v1119_v61  ;;  %v1346_v62 = vld [vmem:[%s5712_s7 + $0x3b0] sm:$0xff] }
 0x1ea   : > { %v1120_v0 = vsel %vm529_vm4, %v3674_v39, %v3675_v21  ;;  %1396 = vmatpush.msrb.mxu2 %v1248_v19  ;;  %1464 = vmatpush.msra.mxu1 %v1346_v62  ;;  %v1334_v61 = vld [vmem:[%s5712_s7 + $0x350] sm:$0xff]  ;;  %v1317_v62 = vld [vmem:[%s5712_s7 + $0x2c8] sm:$0xff] }
 0x1eb   : > { %v4397_v36 = vmax.f32 %v1057_v14, %v1120_v0  ;;  %v1286_v14 = vld [vmem:[%s5712_s7 + $0x1d0] sm:$0xff] }
 0x1ec   : > { %1416 = vmatpush.msra.mxu3 %v1286_v14  ;;  %1397 = vmatpush.msrb.mxu2 %v1246_v58  ;;  %v1298_v58 = vld [vmem:[%s5712_s7 + $0x230] sm:$0xff] }
 0x1ed   : > { %v3686_v63 = vpack.i.bf16 %v4397_v36, %v4393_v12 }
 0x1ee   : > { %1417 = vmatpush.msra.mxu3 %v1284_v6  ;;  %1398 = vmatpush.msrb.mxu2 %v1244_v27  ;;  %v1344_v6 = vld [vmem:[%s5712_s7 + $0x3a0] sm:$0xff]  ;;  %v1294_v27 = vld [vmem:[%s5712_s7 + $0x210] sm:$0xff] }
 0x1ef   : > { %3687 = vrot.lane.b32.xlu1 %v3686_v63, %s5711_s19  ;;  %v1236_v63 = vld [vmem:[%s5712_s7 + $0x40] sm:$0xff]  ;;  %1465 = vmatpush.msra.mxu1 %v1344_v6  ;;  %v1326_v6 = vld [vmem:[%s5712_s7 + $0x310] sm:$0xff] }
 0x1f0   : > { %1418 = vmatpush.msra.mxu3 %v1282_v15  ;;  %1399 = vmatpush.msrb.mxu2 %v1242_v38  ;;  %v1300_v15 = vld [vmem:[%s5712_s7 + $0x240] sm:$0xff]  ;;  %v1251_v38 = vld [vmem:[%s5712_s7 + $0xb8] sm:$0xff] }
 0x1f1   : > { %1466 = vmatpush.msra.mxu1 %v1342_v16  ;;  %v1307_v16 = vld [vmem:[%s5712_s7 + $0x278] sm:$0xff] }
 0x1f2   : > { %1419 = vmatpush.msra.mxu3 %v1280_v17  ;;  %1400 = vmatpush.msrb.mxu2 %v1240_v45  ;;  %v1228_v17 = vld [vmem:[%s5712_s7] sm:$0xff]  ;;  %v1247_v45 = vld [vmem:[%s5712_s7 + $0x98] sm:$0xff] }
 0x1f4   : > { %1420 = vmatpush.msra.mxu3 %v1278_v5  ;;  %1401 = vmatpush.msrb.mxu2 %v1238_v52  ;;  %v1151_v14 = vpop.permute.xlu2 %1150  ;;  %v1257_v5 = vld [vmem:[%s5712_s7 + $0xe8] sm:$0xff] }
 0x1f5   : > { %v1161_v19 = vmax.f32 %v4367_v41, %v1151_v14  ;;  %v1382_v41 = vld [vmem:[%s5712_s7 + $0x4d0] sm:$0xff]  ;;  %v1245_v52 = vld [vmem:[%s5712_s7 + $0x88] sm:$0xff] }
 0x1f6   : > { %1421 = vmatpush.msra.mxu3 %v1276_v10  ;;  %1402 = vmatpush.msrb.mxu2 %v1236_v63  ;;  %v1338_v10 = vld [vmem:[%s5712_s7 + $0x370] sm:$0xff]  ;;  %v1364_v63 = vld [vmem:[%s5712_s7 + $0x440] sm:$0xff] }
 0x1f8   : > { %1422 = vmatpush.msra.mxu3 %v1274_v51  ;;  %v1372_v51 = vld [vmem:[%s5712_s7 + $0x480] sm:$0xff] }
 0x1fa   : > { %1423 = vmatpush.msra.mxu3 %v1272_v46  ;;  %v1292_v46 = vld [vmem:[%s5712_s7 + $0x200] sm:$0xff] }
 0x1fc   : > { %1424 = vmatpush.msra.mxu3 %v1270_v40  ;;  %v1323_v40 = vld [vmem:[%s5712_s7 + $0x2f8] sm:$0xff] }
 0x1fe   : > { %v4441_v18 = vpop.permute.xlu1 %3677  ;;  %1425 = vmatpush.msra.mxu3 %v1268_v60  ;;  %v1319_v60 = vld [vmem:[%s5712_s7 + $0x2d8] sm:$0xff] }
 0x1ff   : > { %v3680_v24 = vunpack.i.h.bf16 %v4441_v18  ;;  %v3679_v28 = vunpack.i.l.bf16 %v4441_v18  ;;  %v1260_v18 = vld [vmem:[%s5712_s7 + $0x100] sm:$0xff] }
 0x200   : > { %1426 = vmatpush.msra.mxu3 %v1266_v57  ;;  %v1239_v57 = vld [vmem:[%s5712_s7 + $0x58] sm:$0xff] }
 0x201   : > { %v1121_v31 = vsel %vm529_vm4, %v3675_v21, %v3679_v28  ;;  %v1122_v32 = vsel %vm529_vm4, %v3679_v28, %v3680_v24  ;;  %v1306_v21 = vld [vmem:[%s5712_s7 + $0x270] sm:$0xff] }
 0x202   : > { %v4471_v37 = vmax.f32 %v4275_v56, %v1121_v31  ;;  %v4475_v43 = vmax.f32 %v1059_v9, %v1122_v32  ;;  %v1312_v56 = vld [vmem:[%s5712_s7 + $0x2a0] sm:$0xff]  ;;  %1427 = vmatpush.msra.mxu3 %v1264_v4  ;;  %v1315_v4 = vld [vmem:[%s5712_s7 + $0x2b8] sm:$0xff] }
 0x203   : > { %1442 = vmatpush.msra.mxu0 %v1312_v56  ;;  %v1296_v31 = vld [vmem:[%s5712_s7 + $0x220] sm:$0xff] }
 0x204   : > { %v3691_v9 = vpack.i.bf16 %v4475_v43, %v4471_v37  ;;  %1428 = vmatpush.msra.mxu3 %v1262_v53  ;;  %v1340_v32 = vld [vmem:[%s5712_s7 + $0x380] sm:$0xff] }
 0x205   : > { %1443 = vmatpush.msra.mxu0 %v1310_v44  ;;  %v1376_v56 = vld [vmem:[%s5712_s7 + $0x4a0] sm:$0xff]  ;;  %1467 = vmatpush.msra.mxu1 %v1340_v32  ;;  %v1249_v44 = vld [vmem:[%s5712_s7 + $0xa8] sm:$0xff]  ;;  %v1303_v32 = vld [vmem:[%s5712_s7 + $0x258] sm:$0xff] }
 0x206   : > { %3692 = vrot.lane.b32.xlu2 %v3691_v9, %s5711_s19  ;;  %v4553_v34 = vpop.permute.xlu1 %1114  ;;  %1429 = vmatpush.msra.mxu3 %v1260_v18  ;;  %v1374_v9 = vld [vmem:[%s5712_s7 + $0x490] sm:$0xff]  ;;  %v1356_v53 = vld [vmem:[%s5712_s7 + $0x400] sm:$0xff]  ;;  %v1231_v18 = vld [vmem:[%s5712_s7 + $0x18] sm:$0xff] }
 0x207   : > { %v1149_v59 = vpop.permute.xlu0 %1148  ;;  %1444 = vmatpush.msra.mxu0 %v1308_v48  ;;  %v1153_v13 = vsel %vm529_vm4, %v4553_v34, %v1151_v14  ;;  %v1123_v8 = vsel %vm529_vm4, %v3680_v24, %v4553_v34  ;;  %1468 = vmatpush.msra.mxu1 %v1338_v10  ;;  %v1336_v48 = vld [vmem:[%s5712_s7 + $0x360] sm:$0xff]  ;;  %v1237_v14 = vld [vmem:[%s5712_s7 + $0x48] sm:$0xff]  ;;  %v1299_v10 = vld [vmem:[%s5712_s7 + $0x238] sm:$0xff] }
 0x208   : > { %v1152_v39 = vsel %vm529_vm4, %v4503_v23, %v1149_v59  ;;  %v1159_v0 = vmax.f32 %v4363_v7, %v1149_v59  ;;  %v1234_v7 = vld [vmem:[%s5712_s7 + $0x30] sm:$0xff]  ;;  %v1160_v28 = vmax.f32 %v4340_v50, %v1153_v13  ;;  %v4601_v24 = vmax.f32 %v1060_v29, %v1123_v8  ;;  %v1380_v29 = vld [vmem:[%s5712_s7 + $0x4c0] sm:$0xff]  ;;  %1506 = vmatpush.msrb.mxu3 %v1259_v30  ;;  %v1353_v30 = vld [vmem:[%s5712_s7 + $0x3e8] sm:$0xff] }
 0x209   : > { %v1158_v42 = vmax.f32 %v4304_v20, %v1152_v39  ;;  %1445 = vmatpush.msra.mxu0 %v1306_v21  ;;  %1403 = vmatpush.msrb.mxu2 %v1234_v7  ;;  %v1366_v59 = vld [vmem:[%s5712_s7 + $0x450] sm:$0xff]  ;;  %v1243_v21 = vld [vmem:[%s5712_s7 + $0x78] sm:$0xff]  ;;  %v1321_v39 = vld [vmem:[%s5712_s7 + $0x2e8] sm:$0xff] }
 0x20a   : > { %1184 = vrot.lane.b32.xlu1 %v1159_v0, %s5711_s19  ;;  %1507 = vmatpush.msrb.mxu3 %v1257_v5  ;;  %v1332_v0 = vld [vmem:[%s5712_s7 + $0x340] sm:$0xff]  ;;  %v1330_v7 = vld [vmem:[%s5712_s7 + $0x330] sm:$0xff]  ;;  %v1305_v5 = vld [vmem:[%s5712_s7 + $0x268] sm:$0xff] }
 0x20b   : > { %1182 = vrot.lane.b32.xlu0 %v1158_v42, %s5711_s19  ;;  %1446 = vmatpush.msra.mxu0 %v1304_v3  ;;  %v1241_v42 = vld [vmem:[%s5712_s7 + $0x68] sm:$0xff]  ;;  %v1362_v3 = vld [vmem:[%s5712_s7 + $0x430] sm:$0xff]  ;;  %v1324_v8 = vld [vmem:[%s5712_s7 + $0x300] sm:$0xff] }
 0x20c   : > { %1404 = vmatpush.msrb.mxu2 %v1232_v22  ;;  %1508 = vmatpush.msrb.mxu3 %v1255_v26  ;;  %v1328_v22 = vld [vmem:[%s5712_s7 + $0x320] sm:$0xff]  ;;  %v1358_v13 = vld [vmem:[%s5712_s7 + $0x410] sm:$0xff]  ;;  %v1301_v26 = vld [vmem:[%s5712_s7 + $0x248] sm:$0xff] }
 0x20d   : > { %1447 = vmatpush.msra.mxu0 %v1302_v55  ;;  %1469 = vmatpush.msra.mxu1 %v1336_v48  ;;  %v1360_v55 = vld [vmem:[%s5712_s7 + $0x420] sm:$0xff] }
 0x20e   : > { %1180 = vrot.lane.b32.xlu2 %v4544_v1, %s5711_s19  ;;  %1405 = vmatpush.msrb.mxu2 %v1230_v11  ;;  %v1235_v11 = vld [vmem:[%s5712_s7 + $0x38] sm:$0xff] }
 0x20f   : > { %1448 = vmatpush.msra.mxu0 %v1300_v15  ;;  %1509 = vmatpush.msrb.mxu3 %v1253_v2  ;;  %v1313_v15 = vld [vmem:[%s5712_s7 + $0x2a8] sm:$0xff] }
 0x210   : > { %1406 = vmatpush.msrb.mxu2 %v1228_v17  ;;  %1470 = vmatpush.msra.mxu1 %v1334_v61  ;;  %v1311_v17 = vld [vmem:[%s5712_s7 + $0x298] sm:$0xff]  ;;  %v1297_v2 = vld [vmem:[%s5712_s7 + $0x228] sm:$0xff] }
 0x211   : > { %1449 = vmatpush.msra.mxu0 %v1298_v58  ;;  %1510 = vmatpush.msrb.mxu3 %v1251_v38  ;;  %v1229_v58 = vld [vmem:[%s5712_s7 + $0x8] sm:$0xff]  ;;  %v1287_v61 = vld [vmem:[%s5712_s7 + $0x1d8] sm:$0xff] }
 0x212   : > { %1196 = vrot.lane.b32.xlu1 %v1161_v19, %s5711_s19  ;;  %1485 = vmatpush.msra.mxu2 %v1382_v41  ;;  %v1233_v19 = vld [vmem:[%s5712_s7 + $0x28] sm:$0xff] }
 0x213   : > { %1194 = vrot.lane.b32.xlu0 %v1160_v28, %s5711_s19  ;;  %1450 = vmatpush.msra.mxu0 %v1296_v31  ;;  %v1355_v28 = vld [vmem:[%s5712_s7 + $0x3f8] sm:$0xff]  ;;  %v1309_v41 = vld [vmem:[%s5712_s7 + $0x288] sm:$0xff] }
 0x214   : > { %1486 = vmatpush.msra.mxu2 %v1380_v29  ;;  %1511 = vmatpush.msrb.mxu3 %v1249_v44  ;;  %v1351_v29 = vld [vmem:[%s5712_s7 + $0x3d8] sm:$0xff]  ;;  %v1349_v31 = vld [vmem:[%s5712_s7 + $0x3c8] sm:$0xff] }
 0x215   : > { %1451 = vmatpush.msra.mxu0 %v1294_v27  ;;  %1471 = vmatpush.msra.mxu1 %v1332_v0  ;;  %v1345_v27 = vld [vmem:[%s5712_s7 + $0x3a8] sm:$0xff]  ;;  %v1339_v0 = vld [vmem:[%s5712_s7 + $0x378] sm:$0xff] }
 0x216   : > { %1192 = vrot.lane.b32.xlu2 %v4601_v24, %s5711_s19  ;;  %1487 = vmatpush.msra.mxu2 %v1378_v35  ;;  %v1347_v35 = vld [vmem:[%s5712_s7 + $0x3b8] sm:$0xff]  ;;  %s5679_s19 = smov 112  }
 0x217   : > { %1512 = vmatpush.msrb.mxu3 %v1247_v45  ;;  %1452 = vmatpush.msra.mxu0 %v1292_v46  ;;  %v1291_v45 = vld [vmem:[%s5712_s7 + $0x1f8] sm:$0xff]  ;;  %v1293_v46 = vld [vmem:[%s5712_s7 + $0x208] sm:$0xff] }
 0x218   : > { %1488 = vmatpush.msra.mxu2 %v1376_v56  ;;  %1472 = vmatpush.msra.mxu1 %v1330_v7 }
 0x219   : > { %1513 = vmatpush.msrb.mxu3 %v1245_v52  ;;  %1552 = vmatpush.msrb.mxu0 %v1323_v40  ;;  %v1341_v52 = vld [vmem:[%s5712_s7 + $0x388] sm:$0xff] }
 0x21a   : > { %1489 = vmatpush.msra.mxu2 %v1374_v9  ;;  %1473 = vmatpush.msra.mxu1 %v1328_v22  ;;  %v1283_v22 = vld [vmem:[%s5712_s7 + $0x1b8] sm:$0xff] }
 0x21b   : > { %1514 = vmatpush.msrb.mxu3 %v1243_v21  ;;  %1553 = vmatpush.msrb.mxu0 %v1321_v39 }
 0x21c   : > { %1490 = vmatpush.msra.mxu2 %v1372_v51  ;;  %1474 = vmatpush.msra.mxu1 %v1326_v6  ;;  %v1295_v51 = vld [vmem:[%s5712_s7 + $0x218] sm:$0xff] }
 0x21d   : > { %1515 = vmatpush.msrb.mxu3 %v1241_v42  ;;  %1554 = vmatpush.msrb.mxu0 %v1319_v60  ;;  %v1337_v42 = vld [vmem:[%s5712_s7 + $0x368] sm:$0xff] }
 0x21e   : > { %1491 = vmatpush.msra.mxu2 %v1370_v25  ;;  %1475 = vmatpush.msra.mxu1 %v1324_v8  ;;  %v1279_v8 = vld [vmem:[%s5712_s7 + $0x198] sm:$0xff] }
 0x21f   : > { %1516 = vmatpush.msrb.mxu3 %v1239_v57  ;;  %1555 = vmatpush.msrb.mxu0 %v1317_v62  ;;  %v1383_v62 = vld [vmem:[%s5712_s7 + $0x4d8] sm:$0xff] }
 0x220   : > { %1492 = vmatpush.msra.mxu2 %v1368_v49  ;;  %1575 = vmatpush.msrb.mxu1 %v1355_v28  ;;  %v1289_v49 = vld [vmem:[%s5712_s7 + $0x1e8] sm:$0xff] }
 0x221   : > { %1517 = vmatpush.msrb.mxu3 %v1237_v14  ;;  %1556 = vmatpush.msrb.mxu0 %v1315_v4  ;;  %v1335_v4 = vld [vmem:[%s5712_s7 + $0x358] sm:$0xff]  ;;  %v1329_v28 = vld [vmem:[%s5712_s7 + $0x328] sm:$0xff] }
 0x222   : > { %1493 = vmatpush.msra.mxu2 %v1366_v59  ;;  %1576 = vmatpush.msrb.mxu1 %v1353_v30  ;;  %v1275_v30 = vld [vmem:[%s5712_s7 + $0x178] sm:$0xff] }
 0x223   : > { %1518 = vmatpush.msrb.mxu3 %v1235_v11  ;;  %1557 = vmatpush.msrb.mxu0 %v1313_v15  ;;  %v1379_v15 = vld [vmem:[%s5712_s7 + $0x4b8] sm:$0xff] }
 0x224   : > { %1494 = vmatpush.msra.mxu2 %v1364_v63  ;;  %1577 = vmatpush.msrb.mxu1 %v1351_v29  ;;  %v1285_v63 = vld [vmem:[%s5712_s7 + $0x1c8] sm:$0xff] }
 0x225   : > { %1519 = vmatpush.msrb.mxu3 %v1233_v19  ;;  %1558 = vmatpush.msrb.mxu0 %v1311_v17  ;;  %v1331_v19 = vld [vmem:[%s5712_s7 + $0x338] sm:$0xff]  ;;  %v1277_v17 = vld [vmem:[%s5712_s7 + $0x188] sm:$0xff] }
 0x226   : > { %1495 = vmatpush.msra.mxu2 %v1362_v3  ;;  %1578 = vmatpush.msrb.mxu1 %v1349_v31  ;;  %v1273_v29 = vld [vmem:[%s5712_s7 + $0x168] sm:$0xff] }
 0x227   : > { %1520 = vmatpush.msrb.mxu3 %v1231_v18  ;;  %1559 = vmatpush.msrb.mxu0 %v1309_v41  ;;  %v1375_v41 = vld [vmem:[%s5712_s7 + $0x498] sm:$0xff]  ;;  %v1325_v31 = vld [vmem:[%s5712_s7 + $0x308] sm:$0xff] }
 0x228   : > { %1496 = vmatpush.msra.mxu2 %v1360_v55  ;;  %1579 = vmatpush.msrb.mxu1 %v1347_v35  ;;  %v1371_v35 = vld [vmem:[%s5712_s7 + $0x478] sm:$0xff] }
 0x229   : > { %1521 = vmatpush.msrb.mxu3 %v1229_v58  ;;  %1560 = vmatpush.msrb.mxu0 %v1307_v16  ;;  %v1327_v58 = vld [vmem:[%s5712_s7 + $0x318] sm:$0xff] }
 0x22a   : > { %1497 = vmatpush.msra.mxu2 %v1358_v13  ;;  %1580 = vmatpush.msrb.mxu1 %v1345_v27  ;;  %v1333_v13 = vld [vmem:[%s5712_s7 + $0x348] sm:$0xff] }
 0x22b   : > { %1561 = vmatpush.msrb.mxu0 %v1305_v5  ;;  %v1369_v27 = vld [vmem:[%s5712_s7 + $0x468] sm:$0xff] }
 0x22c   : > { %1498 = vmatpush.msra.mxu2 %v1356_v53 }
 0x22d   : > { %1562 = vmatpush.msrb.mxu0 %v1303_v32 }
 0x22f   : > { %1563 = vmatpush.msrb.mxu0 %v1301_v26  ;;  %v1271_v26 = vld [vmem:[%s5712_s7 + $0x158] sm:$0xff] }
 0x231   : > { %1564 = vmatpush.msrb.mxu0 %v1299_v10  ;;  %v1367_v10 = vld [vmem:[%s5712_s7 + $0x458] sm:$0xff] }
 0x233   : > { %1565 = vmatpush.msrb.mxu0 %v1297_v2  ;;  %v1365_v2 = vld [vmem:[%s5712_s7 + $0x448] sm:$0xff] }
 0x235   : > { %1566 = vmatpush.msrb.mxu0 %v1295_v51  ;;  %v1263_v51 = vld [vmem:[%s5712_s7 + $0x118] sm:$0xff] }
 0x237   : > { %1567 = vmatpush.msrb.mxu0 %v1293_v46  ;;  %v1359_v46 = vld [vmem:[%s5712_s7 + $0x418] sm:$0xff] }
 0x259   : > { %v3683_v56 = vpop.permute.xlu0 %3682 }
 0x25a   : > { %v3685_v9 = vunpack.i.h.bf16 %v3683_v56  ;;  %v3684_v38 = vunpack.i.l.bf16 %v3683_v56  ;;  %v1267_v56 = vld [vmem:[%s5712_s7 + $0x138] sm:$0xff] }
 0x25c   : > { %v1198_v44 = vsel %vm551_vm3, %v3684_v38, %v3685_v9  ;;  %v1363_v38 = vld [vmem:[%s5712_s7 + $0x438] sm:$0xff] }
 0x25d   : > { %v4803_v25 = vmax.f32 %v4377_v33, %v1198_v44  ;;  %v1343_v33 = vld [vmem:[%s5712_s7 + $0x398] sm:$0xff]  ;;  %v1361_v44 = vld [vmem:[%s5712_s7 + $0x428] sm:$0xff] }
 0x25e   : > { %1581 = vmatpush.msrb.mxu1 %v1343_v33 }
 0x25f   : > { %1407 = vmatmul.f32.vlgmr.msrb.gmra.mxu2 %v4803_v25 }
 0x260   : > { %v4811_v48 = vpop.permute.xlu2 %3692  ;;  %1529 = vmatpush.msrb.mxu2 %v1291_v45  ;;  %1582 = vmatpush.msrb.mxu1 %v1341_v52 }
 0x261   : > { %v3688_v40 = vpop.permute.xlu1 %3687  ;;  %v3694_v59 = vunpack.i.l.bf16 %v4811_v48  ;;  %v3695_v55 = vunpack.i.h.bf16 %v4811_v48  ;;  %v1138_v48 = vmax.f32 %v4304_v20, %v4503_v23  ;;  %v1143_v23 = vmax.f32 %v4340_v50, %v4553_v34 }
 0x262   : > { %v3690_v21 = vunpack.i.h.bf16 %v3688_v40  ;;  %v3689_v39 = vunpack.i.l.bf16 %v3688_v40  ;;  %1530 = vmatpush.msrb.mxu2 %v1289_v49  ;;  %1583 = vmatpush.msrb.mxu1 %v1339_v0 }
 0x263   : > { %v1204_v53 = vsel %vm551_vm3, %v3694_v59, %v3695_v55 }
 0x264   : > { %v1199_v60 = vsel %vm551_vm3, %v3685_v9, %v3689_v39  ;;  %v1203_v7 = vsel %vm551_vm3, %v3690_v21, %v3694_v59  ;;  %1531 = vmatpush.msrb.mxu2 %v1287_v61  ;;  %1584 = vmatpush.msrb.mxu1 %v1337_v42  ;;  %v4890_v18 = vmax.f32 %v4471_v37, %v1204_v53  ;;  %v1373_v37 = vld [vmem:[%s5712_s7 + $0x488] sm:$0xff] }
 0x265   : > { %v4839_v3 = vmax.f32 %v4381_v54, %v1199_v60  ;;  %v4842_v57 = vmax.f32 %v4397_v36, %v1203_v7  ;;  %v1381_v54 = vld [vmem:[%s5712_s7 + $0x4c8] sm:$0xff] }
 0x266   : > { %1532 = vmatpush.msrb.mxu2 %v1285_v63  ;;  %v1281_v36 = vld [vmem:[%s5712_s7 + $0x1a8] sm:$0xff]  ;;  %1585 = vmatpush.msrb.mxu1 %v1335_v4 }
 0x267   : > { %1410 = vmatmul.f32.gmra.mxu2 %v4842_v57  ;;  %1430 = vmatmul.f32.vlgmr.msra.gmra.mxu3 %v4839_v3  ;;  %v1265_v9 = vld [vmem:[%s5712_s7 + $0x128] sm:$0xff] }
 0x268   : > { %v4851_v14 = vpop.permute.xlu2 %1180  ;;  %1600 = vmatpush.msra.mxu3 %v1383_v62  ;;  %1533 = vmatpush.msrb.mxu2 %v1283_v22  ;;  %v1357_v59 = vld [vmem:[%s5712_s7 + $0x408] sm:$0xff] }
 0x269   : > { %v1200_v6 = vsel %vm551_vm3, %v3689_v39, %v4851_v14  ;;  %1586 = vmatpush.msrb.mxu1 %v1333_v13 }
 0x26a   : > { %v1220_v11 = vmax.f32 %v4393_v12, %v1200_v6  ;;  %1601 = vmatpush.msra.mxu3 %v1381_v54  ;;  %1534 = vmatpush.msrb.mxu2 %v1281_v36  ;;  %v1377_v12 = vld [vmem:[%s5712_s7 + $0x4a8] sm:$0xff] }
 0x26b   : > { %1587 = vmatpush.msrb.mxu1 %v1331_v19 }
 0x26c   : > { %1453 = vmatmul.f32.vlgmr.msra.gmra.mxu0 %v1220_v11  ;;  %1602 = vmatpush.msra.mxu3 %v1379_v15 }
 0x26d   : > { %1535 = vmatpush.msrb.mxu2 %v1279_v8  ;;  %1588 = vmatpush.msrb.mxu1 %v1329_v28 }
 0x26e   : > { %1603 = vmatpush.msra.mxu3 %v1377_v12 }
 0x26f   : > { %1536 = vmatpush.msrb.mxu2 %v1277_v17  ;;  %1433 = vmatmul.f32.gmra.mxu3 %v4890_v18 }
 0x270   : > { %v1193_v16 = vpop.permute.xlu2 %1192  ;;  %1604 = vmatpush.msra.mxu3 %v1375_v41  ;;  %1589 = vmatpush.msrb.mxu1 %v1327_v58 }
 0x271   : > { %v1205_v5 = vsel %vm551_vm3, %v3695_v55, %v1193_v16  ;;  %1537 = vmatpush.msrb.mxu2 %v1275_v30 }
 0x272   : > { %v1225_v32 = vmax.f32 %v4475_v43, %v1205_v5  ;;  %1605 = vmatpush.msra.mxu3 %v1373_v37  ;;  %v1269_v43 = vld [vmem:[%s5712_s7 + $0x148] sm:$0xff]  ;;  %1590 = vmatpush.msrb.mxu1 %v1325_v31 }
 0x273   : > { %1538 = vmatpush.msrb.mxu2 %v1273_v29 }
 0x274   : > { %1456 = vmatmul.f32.gmra.mxu0 %v1225_v32  ;;  %1606 = vmatpush.msra.mxu3 %v1371_v35 }
 0x275   : > { %1539 = vmatpush.msrb.mxu2 %v1271_v26 }
 0x276   : > { %1607 = vmatpush.msra.mxu3 %v1369_v27 }
 0x277   : > { %1540 = vmatpush.msrb.mxu2 %v1269_v43  ;;  %1522 = vmatmul.f32.vlgmr.msrb.gmra.mxu3 %v4803_v25  ;;  %v1261_v25 = vld [vmem:[%s5712_s7 + $0x108] sm:$0xff]  ;;  %v1913_v43 = vld [vmem:[%s5655_s4 + $0x20] sm:$0xff] }
 0x278   : > { %1608 = vmatpush.msra.mxu3 %v1367_v10  ;;  %v1914_v10 = vld [vmem:[%s5655_s4 + $0x28] sm:$0xff] }
 0x279   : > { %1541 = vmatpush.msrb.mxu2 %v1267_v56  ;;  %v1915_v56 = vld [vmem:[%s5655_s4 + $0x30] sm:$0xff] }
 0x27a   : > { %1609 = vmatpush.msra.mxu3 %v1365_v2  ;;  %v1916_v2 = vld [vmem:[%s5655_s4 + $0x38] sm:$0xff] }
 0x27b   : > { %1542 = vmatpush.msrb.mxu2 %v1265_v9 }
 0x27c   : > { %1568 = vmatmul.f32.vlgmr.msrb.gmra.mxu0 %v1220_v11  ;;  %1610 = vmatpush.msra.mxu3 %v1363_v38  ;;  %v1185_v45 = vpop.permute.xlu1 %1184  ;;  %v1909_v38 = vld [vmem:[%s5655_s4] sm:$0xff] }
 0x27d   : > { %1543 = vmatpush.msrb.mxu2 %v1263_v51  ;;  %v1183_v49 = vpop.permute.xlu0 %1182  ;;  %v1910_v51 = vld [vmem:[%s5655_s4 + $0x8] sm:$0xff] }
 0x27e   : > { %1611 = vmatpush.msra.mxu3 %v1361_v44  ;;  %v1201_v33 = vsel %vm551_vm3, %v4851_v14, %v1183_v49  ;;  %v1202_v52 = vsel %vm551_vm3, %v1183_v49, %v1185_v45  ;;  %v1911_v44 = vld [vmem:[%s5655_s4 + $0x10] sm:$0xff]  ;;  %v1912_v45 = vld [vmem:[%s5655_s4 + $0x18] sm:$0xff] }
 0x27f   : > { %1544 = vmatpush.msrb.mxu2 %v1261_v25  ;;  %1525 = vmatmul.f32.gmra.mxu3 %v4842_v57  ;;  %v1221_v40 = vmax.f32 %v4544_v1, %v1201_v33  ;;  %v1222_v61 = vmax.f32 %v1138_v48, %v1202_v52 }
 0x280   : > { %1612 = vmatpush.msra.mxu3 %v1359_v46 }
 0x281   : > { %1476 = vmatmul.f32.vlgmr.msra.gmra.mxu1 %v1221_v40  ;;  %3388 = vmatmul.msk.f32.vlgmr.msra.gmra.mxu2 %vm1384_vm10, %v1222_v61 }
 0x282   : > { %1613 = vmatpush.msra.mxu3 %v1357_v59 }
 0x284   : > { %1571 = vmatmul.f32.gmra.mxu0 %v1225_v32  ;;  %v1197_v20 = vpop.permute.xlu1 %1196 }
 0x285   : > { %v1195_v21 = vpop.permute.xlu0 %1194 }
 0x286   : > { %v1206_v39 = vsel %vm551_vm3, %v1193_v16, %v1195_v21  ;;  %v1207_v1 = vsel %vm551_vm3, %v1195_v21, %v1197_v20  ;;  %vm1622_vm3 = vcmask 695296  }
 0x287   : > { %3390 = vmatmul.msk.f32.vlgmr.msra.gmra.mxu3 %vm1384_vm10, %v1222_v61  ;;  %v1227_v0 = vmax.f32 %v1143_v23, %v1207_v1  ;;  %v1226_v63 = vmax.f32 %v4601_v24, %v1206_v39 }
 0x289   : > { %1479 = vmatmul.f32.gmra.mxu1 %v1226_v63  ;;  %3389 = vmatmul.msk.f32.gmra.mxu2 %vm1384_vm10, %v1227_v0 }
 0x28f   : > { %3391 = vmatmul.msk.f32.gmra.mxu3 %vm1384_vm10, %v1227_v0 }
 0x291   : > { %1545 = vmatmul.f32.vlgmr.msrb.gmra.mxu2 %v4839_v3  ;;  %1591 = vmatmul.f32.vlgmr.msrb.gmra.mxu1 %v1221_v40 }
 0x299   : > { %1548 = vmatmul.f32.gmra.mxu2 %v4890_v18  ;;  %1594 = vmatmul.f32.gmra.mxu1 %v1226_v63 }
 0x2e2   : > { %v1408_v34 = vpop.f32.mrf.mxu2 }
 0x2e9   : > { %v1454_v57 = vpop.f32.mrf.mxu0 }
 0x2ea   : > { %v1431_v50 = vpop.f32.mrf.mxu3  ;;  %v1411_v60 = vpop.f32.mrf.mxu2 }
 0x2eb   : > { %v1432_v7 = vadd.f32 %v1431_v50, %v1408_v34 }
 0x2ed   : > { %v1455_v22 = vadd.f32 %v1454_v57, %v1432_v7 }
 0x2f1   : > { %v1457_v3 = vpop.f32.mrf.mxu0 }
 0x2f2   : > { %v1434_v42 = vpop.f32.mrf.mxu3 }
 0x2f3   : > { %v1435_v54 = vadd.f32 %v1434_v42, %v1411_v60 }
 0x2f5   : > { %v1458_v6 = vadd.f32 %v1457_v3, %v1435_v54 }
 0x2f9   : > { %v1569_v53 = vpop.f32.mrf.mxu0 }
 0x2fa   : > { %v1523_v14 = vpop.f32.mrf.mxu3 }
 0x2fe   : > { %v1477_v62 = vpop.f32.mrf.mxu1 }
 0x2ff   : > { %v1478_v24 = vadd.f32 %v1477_v62, %v1455_v22 }
 0x301   : > { %v1572_v37 = vpop.f32.mrf.mxu0 }
 0x302   : > { %v1526_v8 = vpop.f32.mrf.mxu3 }
 0x304   : > { %v1500_v55 = vpop.f32.mrf.mxu2 }
 0x305   : > { %v4974_v36 = vadd.f32 %v1500_v55, %v1478_v24 }
 0x306   : > { %v1480_v4 = vpop.f32.mrf.mxu1 }
 0x307   : > { %1621 = vst [vmem:[#allocation4] sm:$0xff] %v4974_v36  ;;  %1801 = vrot.lane.b32.xlu0 %v4974_v36, %s3858_s23  ;;  %1775 = vrot.lane.b32.xlu1 %v4974_v36, %s5713_s20  ;;  %v1481_v13 = vadd.f32 %v1480_v4, %v1458_v6 }
 0x308   : > { %1630 = vst [vmem:[#allocation2] sm:$0xff] %v4974_v36  ;;  %1749 = vrot.lane.b32.xlu2 %v4974_v36, %s5679_s19 }
 0x30a   : > { %v1615_v18 = vpop.f32.mrf.mxu3 }
 0x30c   : > { %v1503_v11 = vpop.f32.mrf.mxu2 }
 0x30d   : > { %v4984_v15 = vadd.f32 %v1503_v11, %v1481_v13 }
 0x30e   : > { %v1592_v17 = vpop.f32.mrf.mxu1 }
 0x30f   : > { %1624 = vst [vmem:[#allocation4 + $0x10] sm:$0xff] %v4984_v15  ;;  %1722 = vrot.lane.b32.xlu0 %v4974_v36, %s3860_s1  ;;  %1695 = vrot.lane.b32.xlu1 %v4974_v36, %s5681_s18 }
 0x310   : > { %1633 = vst [vmem:[#allocation2 + $0x30] sm:$0xff] %v4984_v15  ;;  %1669 = vrot.lane.b32.xlu2 %v4974_v36, %s5714_s2 }
 0x312   : > { %v1618_v32 = vpop.f32.mrf.mxu3 }
 0x314   : > { %v1546_v19 = vpop.f32.mrf.mxu2 }
 0x315   : > { %v1547_v12 = vadd.f32 %v1546_v19, %v1523_v14 }
 0x316   : > { %v1595_v5 = vpop.f32.mrf.mxu1 }
 0x317   : > { %v1570_v28 = vadd.f32 %v1569_v53, %v1547_v12  ;;  %1779 = vrot.lane.b32.xlu0 %v4984_v15, %s5713_s20  ;;  %1753 = vrot.lane.b32.xlu1 %v4984_v15, %s5679_s19 }
 0x318   : > { %1805 = vrot.lane.b32.xlu2 %v4984_v15, %s3858_s23 }
 0x319   : > { %v1593_v41 = vadd.f32 %v1592_v17, %v1570_v28 }
 0x31b   : > { %v1616_v30 = vadd.f32 %v1615_v18, %v1593_v41 }
 0x31c   : > { %v1549_v58 = vpop.f32.mrf.mxu2 }
 0x31d   : > { %1623 = vst.msk [vmem:[#allocation4 + $0x8] sm:$0xff] %vm1622_vm3, %v1616_v30  ;;  %v1550_v16 = vadd.f32 %v1549_v58, %v1526_v8 }
 0x31f   : > { %v1573_v29 = vadd.f32 %v1572_v37, %v1550_v16  ;;  %1699 = vrot.lane.b32.xlu0 %v4984_v15, %s5681_s18  ;;  %1673 = vrot.lane.b32.xlu1 %v4984_v15, %s5714_s2 }
 0x320   : > { %1726 = vrot.lane.b32.xlu2 %v4984_v15, %s3860_s1 }
 0x321   : > { %v1596_v31 = vadd.f32 %v1595_v5, %v1573_v29 }
 0x323   : > { %v1619_v35 = vadd.f32 %v1618_v32, %v1596_v31 }
 0x324   : > { %v1627_v26 = vld [vmem:[#allocation4 + $0x8] sm:$0xff] }
 0x325   : > { %1625 = vst.msk [vmem:[#allocation4 + $0x18] sm:$0xff] %vm1622_vm3, %v1619_v35 }
 0x326   : > { %1632 = vst.msk [vmem:[#allocation2 + $0x8] sm:$0xff] %vm1631_vm13, %v1627_v26 }
 0x327   : > { %1751 = vrot.lane.b32.xlu0 %v1627_v26, %s5679_s19  ;;  %1803 = vrot.lane.b32.xlu1 %v1627_v26, %s3858_s23 }
 0x328   : > { %1777 = vrot.lane.b32.xlu2 %v1627_v26, %s5713_s20 }
 0x32c   : > { %v1629_v27 = vld [vmem:[#allocation4 + $0x18] sm:$0xff] }
 0x32d   : > { %1634 = vst.msk [vmem:[#allocation2 + $0x38] sm:$0xff] %vm1631_vm13, %v1629_v27 }
 0x32f   : > { %1671 = vrot.lane.b32.xlu0 %v1627_v26, %s5714_s2  ;;  %1724 = vrot.lane.b32.xlu1 %v1627_v26, %s3860_s1 }
 0x330   : > { %1697 = vrot.lane.b32.xlu2 %v1627_v26, %s5681_s18 }
 0x337   : > { %1807 = vrot.lane.b32.xlu0 %v1629_v27, %s3858_s23  ;;  %1781 = vrot.lane.b32.xlu1 %v1629_v27, %s5713_s20  ;;  %s3864_s23 = smov 111  }
 0x338   : > { %1755 = vrot.lane.b32.xlu2 %v1629_v27, %s5679_s19  ;;  %s5721_s19 = smov 112  }
 0x33f   : > { %1728 = vrot.lane.b32.xlu0 %v1629_v27, %s3860_s1  ;;  %1645 = vrot.lane.b32.xlu1 %v1627_v26, %s5715_s27  ;;  %s5720_s1 = smov 114  }
 0x340   : > { %1675 = vrot.lane.b32.xlu2 %v1629_v27, %s5714_s2 }
 0x347   : > { %1643 = vrot.lane.b32.xlu0 %v4974_v36, %s5715_s27  ;;  %1701 = vrot.lane.b32.xlu1 %v1629_v27, %s5681_s18  ;;  %s3865_s18 = smov 118  }
 0x348   : > { %1647 = vrot.lane.b32.xlu2 %v4984_v15, %s5715_s27 }
 0x34f   : > { %1649 = vrot.lane.b32.xlu0 %v1629_v27, %s5715_s27  ;;  %1828 = vrot.lane.b32.xlu1 %v4974_v36, %s3862_s26 }
 0x350   : > { %1830 = vrot.lane.b32.xlu2 %v1627_v26, %s3862_s26 }
 0x357   : > { %1832 = vrot.lane.b32.xlu0 %v4984_v15, %s3862_s26  ;;  %1834 = vrot.lane.b32.xlu1 %v1629_v27, %s3862_s26 }
 0x358   : > { %1939 = vperm.xlu2 %3658, %v1913_v43  }
 0x35f   : > { %1944 = vperm.xlu0 %3659, %v1914_v10   ;;  %1949 = vperm.xlu1 %3660, %v1915_v56  }
 0x360   : > { %1954 = vperm.xlu2 %3658, %v1916_v2  }
 0x362   : > { %v1750_v9 = vpop.permute.xlu2 %1749 }
 0x367   : > { %1919 = vperm.xlu0 %3659, %v1909_v38   ;;  %1924 = vperm.xlu1 %3660, %v1910_v51  }
 0x368   : > { %1929 = vperm.xlu2 %3658, %v1911_v44  }
 0x36a   : > { %v1670_v25 = vpop.permute.xlu2 %1669 }
 0x36f   : > { %1934 = vperm.xlu0 %3659, %v1912_v45  }
 0x372   : > { %v1806_v46 = vpop.permute.xlu2 %1805 }
 0x379   : > { %v1802_v48 = vpop.permute.xlu0 %1801  ;;  %v1776_v49 = vpop.permute.xlu1 %1775 }
 0x37a   : > { %v1727_v33 = vpop.permute.xlu2 %1726 }
 0x381   : > { %v1723_v52 = vpop.permute.xlu0 %1722  ;;  %v1696_v40 = vpop.permute.xlu1 %1695 }
 0x382   : > { %v1778_v61 = vpop.permute.xlu2 %1777 }
 0x383   : > { %v1783_v59 = vsel %vm573_vm0, %v1776_v49, %v1778_v61  ;;  %1790 = vst.msk [vmem:[#allocation2 + $0x248] sm:$0xff] %vm1631_vm13, %v1778_v61  ;;  %v3394_v61 = vld [vmem:[%s5654_s3] sm:$0xf] }
 0x384   : > { %1789 = vst [vmem:[#allocation2 + $0x240] sm:$0xff] %v1783_v59 }
 0x389   : > { %v1780_v20 = vpop.permute.xlu0 %1779  ;;  %v1754_v23 = vpop.permute.xlu1 %1753 }
 0x38a   : > { %v1698_v21 = vpop.permute.xlu2 %1697  ;;  %v1872_v16 = vld [vmem:[#allocation2 + $0x248] sm:$0xff] }
 0x38b   : > { %v5057_v39 = vsel %vm1703_vm12, %v1696_v40, %v1698_v21  ;;  %1711 = vst.msk [vmem:[#allocation2 + $0x128] sm:$0xff] %vm1631_vm13, %v1698_v21 }
 0x38c   : > { %1710 = vst [vmem:[#allocation2 + $0x120] sm:$0xff] %v5057_v39 }
 0x391   : > { %v5061_v1 = vpop.permute.xlu0 %1699  ;;  %v1674_v0 = vpop.permute.xlu1 %1673 }
 0x392   : > { %v1756_v63 = vpop.permute.xlu2 %1755 }
 0x393   : > { %v1758_v50 = vsel %vm1384_vm10, %v1754_v23, %v1756_v63  ;;  %1766 = vst.msk [vmem:[#allocation2 + $0x218] sm:$0xff] %vm1631_vm13, %v1756_v63  ;;  %v1883_v23 = vpack.c.bf16 %v4984_v15, %v4974_v36  ;;  %v1850_v15 = vld [vmem:[#allocation2 + $0x38] sm:$0xff] }
 0x394   : > { %1765 = vst [vmem:[#allocation2 + $0x210] sm:$0xff] %v1758_v50 }
 0x399   : > { %v1752_v34 = vpop.permute.xlu0 %1751  ;;  %v1804_v42 = vpop.permute.xlu1 %1803 }
 0x39a   : > { %v1676_v60 = vpop.permute.xlu2 %1675  ;;  %v1757_v7 = vsel %vm1384_vm10, %v1750_v9, %v1752_v34  ;;  %1764 = vst.msk [vmem:[#allocation2 + $0x1e8] sm:$0xff] %vm1631_vm13, %v1752_v34  ;;  %v1810_v62 = vsel %vm1809_vm14, %v1802_v48, %v1804_v42  ;;  %v1870_v35 = vld [vmem:[#allocation2 + $0x218] sm:$0xff]  ;;  %v3396_v34 = vld [vmem:[%s5654_s3 + $0x8] sm:$0xf0] }
 0x39b   : > { %v5068_v57 = vsel %vm540_vm6, %v1674_v0, %v1676_v60  ;;  %1686 = vst.msk [vmem:[#allocation2 + $0xf8] sm:$0xff] %vm1631_vm13, %v1676_v60  ;;  %v1893_v30 = vpack.c.bf16 %v1758_v50, %v1757_v7 }
 0x39c   : > { %1685 = vst [vmem:[#allocation2 + $0xf0] sm:$0xff] %v5068_v57 }
 0x39d   : > { %1763 = vst [vmem:[#allocation2 + $0x1e0] sm:$0xff] %v1757_v7 }
 0x39e   : > { %1816 = vst [vmem:[#allocation2 + $0x2a0] sm:$0xff] %v1810_v62 }
 0x39f   : > { %1817 = vst.msk [vmem:[#allocation2 + $0x2a8] sm:$0xff] %vm1631_vm13, %v1804_v42 }
 0x3a1   : > { %v1672_v22 = vpop.permute.xlu0 %1671  ;;  %v1725_v24 = vpop.permute.xlu1 %1724  ;;  %v1868_v29 = vld [vmem:[#allocation2 + $0x1e8] sm:$0xff] }
 0x3a2   : > { %v1677_v55 = vsel %vm540_vm6, %v1670_v25, %v1672_v22  ;;  %1684 = vst.msk [vmem:[#allocation2 + $0xc8] sm:$0xff] %vm1631_vm13, %v1672_v22  ;;  %v1731_v14 = vsel %vm1730_vm15, %v1723_v52, %v1725_v24  ;;  %v1648_v54 = vpop.permute.xlu2 %1647  ;;  %v1894_v43 = vpack.c.bf16 %v1870_v35, %v1868_v29  ;;  %v1860_v25 = vld [vmem:[#allocation2 + $0x128] sm:$0xff]  ;;  %v1858_v40 = vld [vmem:[#allocation2 + $0xf8] sm:$0xff]  ;;  %vm1993_vm6 = vcmask 130048  }
 0x3a3   : > { %1683 = vst [vmem:[#allocation2 + $0xc0] sm:$0xff] %v1677_v55  ;;  %v1887_v38 = vpack.c.bf16 %v5068_v57, %v1677_v55  ;;  %v1848_v57 = vld [vmem:[#allocation2 + $0x8] sm:$0xff] }
 0x3a4   : > { %1737 = vst [vmem:[#allocation2 + $0x180] sm:$0xff] %v1731_v14 }
 0x3a5   : > { %1738 = vst.msk [vmem:[#allocation2 + $0x188] sm:$0xff] %vm1631_vm13, %v1725_v24 }
 0x3a6   : > { %v1876_v17 = vld [vmem:[#allocation2 + $0x2a8] sm:$0xff] }
 0x3a9   : > { %v1808_v3 = vpop.permute.xlu0 %1807  ;;  %v1782_v4 = vpop.permute.xlu1 %1781 }
 0x3aa   : > { %v1811_v6 = vsel %vm1809_vm14, %v1806_v46, %v1808_v3  ;;  %1819 = vst.msk [vmem:[#allocation2 + $0x2d8] sm:$0xff] %vm1631_vm13, %v1808_v3  ;;  %v1784_v13 = vsel %vm573_vm0, %v1780_v20, %v1782_v4  ;;  %v1831_v11 = vpop.permute.xlu2 %1830  ;;  %vm1836_vm0 = vcmask 801792  }
 0x3ab   : > { %1818 = vst [vmem:[#allocation2 + $0x2d0] sm:$0xff] %v1811_v6  ;;  %v1897_v8 = vpack.c.bf16 %v1811_v6, %v1810_v62  ;;  %v1895_v53 = vpack.c.bf16 %v1784_v13, %v1783_v59  ;;  %v3567_v59 = vld [vmem:[%s5654_s3 + $0x4] sm:$0xf0]  ;;  %v1884_v62 = vpack.c.bf16 %v1850_v15, %v1848_v57  ;;  %v3404_v6 = vld [vmem:[%s5654_s3 + $0x18] sm:$0xf0] }
 0x3ac   : > { %1791 = vst [vmem:[#allocation2 + $0x270] sm:$0xff] %v1784_v13  ;;  %v1864_v2 = vld [vmem:[#allocation2 + $0x188] sm:$0xff]  ;;  %v3395_v21 = vor.u32 %v3567_v59, %v3394_v61 }
 0x3ad   : > { %1792 = vst.msk [vmem:[#allocation2 + $0x278] sm:$0xff] %vm1631_vm13, %v1782_v4  ;;  %2006 = vmatpush.bf16.msra.mxu2 %v1897_v8  ;;  %v3568_v4 = vld [vmem:[%s5654_s3 + $0x14] sm:$0xf]  ;;  %v3571_v8 = vld [vmem:[%s5654_s3 + $0x24] sm:$0xf0] }
 0x3ae   : > { %1844 = vst.msk [vmem:[#allocation2 + $0x308] sm:$0xff] %vm1631_vm13, %v1831_v11  ;;  %v3407_v13 = vor.u32 %v3568_v4, %v3404_v6 }
 0x3b1   : > { %v1729_v19 = vpop.permute.xlu0 %1728  ;;  %v1646_v12 = vpop.permute.xlu1 %1645  ;;  %v1878_v28 = vld [vmem:[#allocation2 + $0x2d8] sm:$0xff]  ;;  %2007 = vmatpush.bf16.msra.mxu2 %v1895_v53 }
 0x3b2   : > { %v1732_v18 = vsel %vm1730_vm15, %v1727_v33, %v1729_v19  ;;  %1740 = vst.msk [vmem:[#allocation2 + $0x1b8] sm:$0xff] %vm1631_vm13, %v1729_v19  ;;  %v1898_v41 = vpack.c.bf16 %v1878_v28, %v1876_v17  ;;  %v1856_v33 = vld [vmem:[#allocation2 + $0xc8] sm:$0xff]  ;;  %v3570_v19 = vld [vmem:[%s5654_s3 + $0x24] sm:$0xf]  ;;  %v3418_v28 = vld [vmem:[%s5654_s3 + $0x30] sm:$0xf]  ;;  %v1940_v59 = vpop.permute.xlu2 %1939 }
 0x3b3   : > { %1739 = vst [vmem:[#allocation2 + $0x1b0] sm:$0xff] %v1732_v18  ;;  %v1891_v5 = vpack.c.bf16 %v1732_v18, %v1731_v14  ;;  %v1888_v20 = vpack.c.bf16 %v1858_v40, %v1856_v33  ;;  %v3402_v14 = vld [vmem:[%s5654_s3 + $0x10] sm:$0xf]  ;;  %v3573_v18 = vld [vmem:[%s5654_s3 + $0x34] sm:$0xf0] }
 0x3b4   : > { %1658 = vst.msk [vmem:[#allocation2 + $0x68] sm:$0xff] %vm1631_vm13, %v1646_v12  ;;  %2064 = vmatpush.bf16.msra.mxu0 %v1898_v41  ;;  %v1874_v58 = vld [vmem:[#allocation2 + $0x278] sm:$0xff]  ;;  %v3419_v41 = vor.u32 %v3573_v18, %v3418_v28 }
 0x3b5   : > { %2008 = vmatpush.bf16.msra.mxu2 %v1893_v30  ;;  %v1896_v37 = vpack.c.bf16 %v1874_v58, %v1872_v16  ;;  %v1880_v22 = vld [vmem:[#allocation2 + $0x308] sm:$0xff]  ;;  %v3572_v30 = vld [vmem:[%s5654_s3 + $0x34] sm:$0xf]  ;;  %v3420_v58 = vld [vmem:[%s5654_s3 + $0x38] sm:$0xf0] }
 0x3b6   : > { %v3423_v16 = vor.u32 %v3572_v30, %v3420_v58 }
 0x3b8   : > { %2065 = vmatpush.bf16.msra.mxu0 %v1896_v37 }
 0x3b9   : > { %v1644_v31 = vpop.permute.xlu0 %1643  ;;  %v1702_v32 = vpop.permute.xlu1 %1701  ;;  %2009 = vmatpush.bf16.msra.mxu2 %v1891_v5  ;;  %v1866_v10 = vld [vmem:[#allocation2 + $0x1b8] sm:$0xff] }
 0x3ba   : > { %v1651_v26 = vsel %vm529_vm4, %v1644_v31, %v1646_v12  ;;  %v1705_v27 = vsel %vm1703_vm12, %v5061_v1, %v1702_v32  ;;  %1713 = vst.msk [vmem:[#allocation2 + $0x158] sm:$0xff] %vm1631_vm13, %v1702_v32  ;;  %v1892_v9 = vpack.c.bf16 %v1866_v10, %v1864_v2  ;;  %v3412_v12 = vld [vmem:[%s5654_s3 + $0x28] sm:$0xf0] }
 0x3bb   : > { %1657 = vst [vmem:[#allocation2 + $0x60] sm:$0xff] %v1651_v26  ;;  %v1889_v56 = vpack.c.bf16 %v1705_v27, %v5057_v39  ;;  %v3566_v39 = vld [vmem:[%s5654_s3 + $0x4] sm:$0xf]  ;;  %v1852_v63 = vld [vmem:[#allocation2 + $0x68] sm:$0xff]  ;;  %v3415_v17 = vor.u32 %v3570_v19, %v3412_v12 }
 0x3bc   : > { %1712 = vst [vmem:[#allocation2 + $0x150] sm:$0xff] %v1705_v27  ;;  %2066 = vmatpush.bf16.msra.mxu0 %v1894_v43  ;;  %v3399_v7 = vor.u32 %v3566_v39, %v3396_v34 }
 0x3bd   : > { %2010 = vmatpush.bf16.msra.mxu2 %v1889_v56 }
 0x3c0   : > { %2067 = vmatpush.bf16.msra.mxu0 %v1892_v9 }
 0x3c1   : > { %v1650_v51 = vpop.permute.xlu0 %1649  ;;  %v1829_v44 = vpop.permute.xlu1 %1828  ;;  %v1862_v45 = vld [vmem:[#allocation2 + $0x158] sm:$0xff]  ;;  %2011 = vmatpush.bf16.msra.mxu2 %v1887_v38 }
 0x3c2   : > { %v1652_v46 = vsel %vm529_vm4, %v1648_v54, %v1650_v51  ;;  %1660 = vst.msk [vmem:[#allocation2 + $0x98] sm:$0xff] %vm1631_vm13, %v1650_v51  ;;  %v1837_v48 = vsel %vm1836_vm0, %v1829_v44, %v1831_v11  ;;  %v1890_v49 = vpack.c.bf16 %v1862_v45, %v1860_v25  ;;  %v3569_v54 = vld [vmem:[%s5654_s3 + $0x14] sm:$0xf0]  ;;  %v3410_v11 = vld [vmem:[%s5654_s3 + $0x20] sm:$0xf] }
 0x3c3   : > { %1659 = vst [vmem:[#allocation2 + $0x90] sm:$0xff] %v1652_v46  ;;  %v1885_v52 = vpack.c.bf16 %v1652_v46, %v1651_v26  ;;  %v3403_v3 = vor.u32 %v3569_v54, %v3402_v14  ;;  %v3411_v53 = vor.u32 %v3571_v8, %v3410_v11 }
 0x3c4   : > { %1843 = vst [vmem:[#allocation2 + $0x300] sm:$0xff] %v1837_v48  ;;  %2068 = vmatpush.bf16.msra.mxu0 %v1890_v49 }
 0x3c5   : > { %2012 = vmatpush.bf16.msra.mxu2 %v1885_v52 }
 0x3c8   : > { %2069 = vmatpush.bf16.msra.mxu0 %v1888_v20 }
 0x3c9   : > { %v1833_v1 = vpop.permute.xlu0 %1832  ;;  %v1835_v0 = vpop.permute.xlu1 %1834  ;;  %v1854_v50 = vld [vmem:[#allocation2 + $0x98] sm:$0xff]  ;;  %2013 = vmatpush.bf16.msra.mxu2 %v1883_v23 }
 0x3ca   : > { %v1838_v42 = vsel %vm1836_vm0, %v1833_v1, %v1835_v0  ;;  %1846 = vst.msk [vmem:[#allocation2 + $0x338] sm:$0xff] %vm1631_vm13, %v1835_v0  ;;  %v1886_v36 = vpack.c.bf16 %v1854_v50, %v1852_v63 }
 0x3cb   : > { %1845 = vst [vmem:[#allocation2 + $0x330] sm:$0xff] %v1838_v42  ;;  %v1899_v60 = vpack.c.bf16 %v1838_v42, %v1837_v48 }
 0x3cc   : > { %2070 = vmatpush.bf16.msra.mxu0 %v1886_v36  ;;  %2014 = vmatmul.bf16.vlgmr.msra.gmra.mxu2 %v3395_v21 }
 0x3cd   : > { %2042 = vmatpush.bf16.msrb.mxu3 %v1899_v60 }
 0x3d0   : > { %2071 = vmatpush.bf16.msra.mxu0 %v1884_v62  ;;  %3424 = vmatmul.msk.bf16.vlgmr.msrb.gmra.mxu3 %vm1993_vm6, %v3399_v7 }
 0x3d1   : > { %v1882_v24 = vld [vmem:[#allocation2 + $0x338] sm:$0xff]  ;;  %v1945_v32 = vpop.permute.xlu0 %1944 }
 0x3d2   : > { %v1900_v55 = vpack.c.bf16 %v1882_v24, %v1880_v22 }
 0x3d3   : > { %2072 = vmatmul.bf16.vlgmr.msra.gmra.mxu0 %v3395_v21 }
 0x3d4   : > { %2100 = vmatpush.bf16.msra.mxu1 %v1900_v55 }
 0x3d7   : > { %3428 = vmatmul.msk.bf16.vlgmr.msra.gmra.mxu1 %vm1993_vm6, %v3399_v7  ;;  %v1950_v7 = vpop.permute.xlu1 %1949 }
 0x3d9   : > { %v1920_v10 = vpop.permute.xlu0 %1919 }
 0x3dc   : > { %2019 = vmatmul.bf16.gmra.mxu2 %v3403_v3 }
 0x3df   : > { %v1925_v18 = vpop.permute.xlu1 %1924 }
 0x3e0   : > { %3425 = vmatmul.msk.bf16.gmra.mxu3 %vm1993_vm6, %v3407_v13 }
 0x3e1   : > { %v1935_v25 = vpop.permute.xlu0 %1934 }
 0x3e3   : > { %2077 = vmatmul.bf16.gmra.mxu0 %v3403_v3 }
 0x3e7   : > { %3429 = vmatmul.msk.bf16.gmra.mxu1 %vm1993_vm6, %v3407_v13 }
 0x3ec   : > { %2024 = vmatmul.bf16.gmra.mxu2 %v3411_v53 }
 0x3f0   : > { %3426 = vmatmul.msk.bf16.gmra.mxu3 %vm1993_vm6, %v3415_v17 }
 0x3f3   : > { %2082 = vmatmul.bf16.gmra.mxu0 %v3411_v53 }
 0x3f7   : > { %3430 = vmatmul.msk.bf16.gmra.mxu1 %vm1993_vm6, %v3415_v17 }
 0x3fc   : > { %2029 = vmatmul.bf16.gmra.mxu2 %v3419_v41 }
 0x400   : > { %3427 = vmatmul.msk.bf16.gmra.mxu3 %vm1993_vm6, %v3423_v16 }
 0x403   : > { %2087 = vmatmul.bf16.gmra.mxu0 %v3419_v41 }
 0x407   : > { %3431 = vmatmul.msk.bf16.gmra.mxu1 %vm1993_vm6, %v3423_v16 }
 0x44f   : > { %v5155_v37 = vpop.f32.mrf.mxu2 }
 0x450   : > { %v5157_v29 = vpop.f32.mrf.mxu0  ;;  %v2016_v30 = vadd.f32 %v5155_v37, %v1920_v10 }
 0x451   : > { %v2074_v41 = vadd.f32 %v5157_v29, %v1920_v10 }
 0x453   : > { %v5159_v5 = vpop.f32.mrf.mxu3 }
 0x454   : > { %v5161_v31 = vpop.f32.mrf.mxu1 }
 0x457   : > { %v5163_v35 = vpop.f32.mrf.mxu2 }
 0x458   : > { %v5165_v26 = vpop.f32.mrf.mxu0 }
 0x459   : > { %v2076_v29 = vadd.f32 %v5165_v26, %v1925_v18 }
 0x45b   : > { %v5167_v27 = vpop.f32.mrf.mxu3 }
 0x45c   : > { %v5169_v43 = vpop.f32.mrf.mxu1 }
 0x45f   : > { %v5171_v56 = vpop.f32.mrf.mxu2 }
 0x460   : > { %v5173_v2 = vpop.f32.mrf.mxu0 }
 0x463   : > { %v5175_v9 = vpop.f32.mrf.mxu3 }
 0x464   : > { %v5177_v38 = vpop.f32.mrf.mxu1 }
 0x467   : > { %v2022_v51 = vpop.f32.mrf.mxu2 }
 0x468   : > { %v2080_v44 = vpop.f32.mrf.mxu0  ;;  %v2023_v45 = vadd.f32 %v2022_v51, %v1935_v25 }
 0x469   : > { %v2081_v46 = vadd.f32 %v2080_v44, %v1935_v25 }
 0x46b   : > { %v2051_v48 = vpop.f32.mrf.mxu3 }
 0x46c   : > { %v2109_v49 = vpop.f32.mrf.mxu1  ;;  %v5179_v33 = vadd.f32 %v2051_v48, %v2023_v45  ;;  %v2103_v45 = vadd.f32 %v5161_v31, %v2074_v41 }
 0x46d   : > { %v5181_v52 = vadd.f32 %v2109_v49, %v2081_v46  ;;  %v2045_v46 = vadd.f32 %v5159_v5, %v2016_v30  ;;  %v1955_v5 = vpop.permute.xlu2 %1954 }
 0x46f   : > { %v2025_v40 = vpop.f32.mrf.mxu2 }
 0x470   : > { %v2083_v61 = vpop.f32.mrf.mxu0  ;;  %v2026_v20 = vadd.f32 %v2025_v40, %v1940_v59 }
 0x471   : > { %v2084_v23 = vadd.f32 %v2083_v61, %v1940_v59 }
 0x473   : > { %v2054_v21 = vpop.f32.mrf.mxu3 }
 0x474   : > { %v2112_v39 = vpop.f32.mrf.mxu1  ;;  %v2055_v1 = vadd.f32 %v2054_v21, %v2026_v20 }
 0x475   : > { %v2113_v0 = vadd.f32 %v2112_v39, %v2084_v23 }
 0x476   : > { %v3432_v63 = vmul.f32 -1.442695, %v2055_v1 }
 0x477   : > { %v3433_v50 = vmul.f32 -1.442695, %v2113_v0  ;;  %v2027_v34 = vpop.f32.mrf.mxu2 }
 0x478   : > { %v2085_v42 = vpop.f32.mrf.mxu0  ;;  %3744 = vpow2.f32 %v3432_v63  ;;  %v2028_v36 = vadd.f32 %v2027_v34, %v1945_v32 }
 0x479   : > { %3746 = vpow2.f32 %v3433_v50  ;;  %v2086_v15 = vadd.f32 %v2085_v42, %v1945_v32  ;;  %v2018_v32 = vadd.f32 %v5163_v35, %v1925_v18 }
 0x47b   : > { %v2056_v60 = vpop.f32.mrf.mxu3  ;;  %v5196_v37 = vadd.f32 %v5167_v27, %v2018_v32 }
 0x47c   : > { %v2114_v57 = vpop.f32.mrf.mxu1  ;;  %v2057_v62 = vadd.f32 %v2056_v60, %v2028_v36 }
 0x47d   : > { %v2115_v22 = vadd.f32 %v2114_v57, %v2086_v15 }
 0x47e   : > { %v3745_v24 = vpop.eup %3744  ;;  %v3434_v55 = vmul.f32 -1.442695, %v2057_v62 }
 0x47f   : > { %v3747_v14 = vpop.eup %3746  ;;  %v5183_v54 = vadd.f32 1.0, %v3745_v24  ;;  %v3435_v3 = vmul.f32 -1.442695, %v2115_v22  ;;  %v2030_v4 = vpop.f32.mrf.mxu2 }
 0x480   : > { %v2147_v6 = vadd.f32 1.0, %v3747_v14  ;;  %v2088_v13 = vpop.f32.mrf.mxu0  ;;  %3748 = vpow2.f32 %v3434_v55  ;;  %v2031_v11 = vadd.f32 %v2030_v4, %v1950_v7 }
 0x481   : > { %3750 = vrcp.f32 %v5183_v54  ;;  %v2089_v8 = vadd.f32 %v2088_v13, %v1950_v7  ;;  %v2163_v61 = vand.u32 2147483647, %v5183_v54  ;;  %v2165_v31 = vand.u32 2147483648, %v5183_v54 }
 0x482   : > { %3752 = vrcp.f32 %v2147_v6  ;;  %v2178_v23 = vand.u32 2147483647, %v2147_v6  ;;  %v2180_v21 = vand.u32 2147483648, %v2147_v6  ;;  %vm2174_vm5 = vweird.f32 %v2147_v6 }
 0x483   : > { %3754 = vpow2.f32 %v3435_v3  ;;  %v2059_v53 = vpop.f32.mrf.mxu3  ;;  %vm2159_vm9 = vweird.f32 %v5183_v54  ;;  %vm5205_vm2 = vcmp.eq.f32.partialorder %v2163_v61, 8.507059e+37  ;;  %v2166_v42 = vor.u32 1.1754944e-38, %v2165_v31 }
 0x484   : > { %v2117_v19 = vpop.f32.mrf.mxu1  ;;  %v2060_v12 = vadd.f32 %v2059_v53, %v2031_v11  ;;  %vm5209_vm10 = vcmp.eq.f32.partialorder %v2178_v23, 8.507059e+37  ;;  %v2181_v57 = vor.u32 1.1754944e-38, %v2180_v21 }
 0x485   : > { %v2118_v17 = vadd.f32 %v2117_v19, %v2089_v8 }
 0x486   : > { %v3749_v28 = vpop.eup %3748  ;;  %v3436_v58 = vmul.f32 -1.442695, %v2060_v12 }
 0x487   : > { %v3751_v16 = vpop.eup %3750  ;;  %v5189_v51 = vadd.f32 1.0, %v3749_v28  ;;  %v3437_v44 = vmul.f32 -1.442695, %v2118_v17  ;;  %v2032_v0 = vpop.f32.mrf.mxu2 }
 0x488   : > { %v3753_v25 = vpop.eup %3752  ;;  %v2155_v48 = vmul.f32 %v3751_v16, %v5183_v54  ;;  %3756 = vpow2.f32 %v3436_v58  ;;  %v2090_v35 = vpop.f32.mrf.mxu0  ;;  %vm2160_vm1 = vweird.f32 %v3751_v16  ;;  %v2033_v14 = vadd.f32 %v2032_v0, %v1955_v5 }
 0x489   : > { %v3755_v49 = vpop.eup %3754  ;;  %v2170_v10 = vmul.f32 %v3753_v25, %v2147_v6  ;;  %3758 = vrcp.f32 %v5189_v51  ;;  %v2091_v27 = vadd.f32 %v2090_v35, %v1955_v5  ;;  %vm2175_vm7 = vweird.f32 %v3753_v25  ;;  %vm2161_vm3 = vmor %vm2159_vm9, %vm2160_vm1 }
 0x48a   : > { %v2156_v40 = vsub.f32 1.0, %v2155_v48  ;;  %v5201_v59 = vadd.f32 1.0, %v3755_v49  ;;  %3760 = vpow2.f32 %v3437_v44  ;;  %vm2176_vm14 = vmor %vm2174_vm5, %vm2175_vm7  ;;  %v2193_v55 = vand.u32 2147483647, %v5189_v51  ;;  %v1930_v49 = vpop.permute.xlu2 %1929 }
 0x48b   : > { %v2171_v20 = vsub.f32 1.0, %v2170_v10  ;;  %v2061_v54 = vpop.f32.mrf.mxu3  ;;  %v2195_v18 = vand.u32 2147483648, %v5189_v51  ;;  %vm2189_vm0 = vweird.f32 %v5189_v51  ;;  %v2021_v10 = vadd.f32 %v5171_v56, %v1930_v49 }
 0x48c   : > { %v2157_v26 = vmul.f32 %v3751_v16, %v2156_v40  ;;  %3762 = vrcp.f32 %v5201_v59  ;;  %v2119_v39 = vpop.f32.mrf.mxu1  ;;  %v2062_v41 = vadd.f32 %v2061_v54, %v2033_v14  ;;  %vm2194_vm5 = vcmp.eq.f32.partialorder %v2193_v55, 8.507059e+37 }
 0x48d   : > { %v2172_v1 = vmul.f32 %v3753_v25, %v2171_v20  ;;  %v2120_v36 = vadd.f32 %v2119_v39, %v2091_v27  ;;  %vm2204_vm7 = vweird.f32 %v5201_v59  ;;  %v2079_v54 = vadd.f32 %v5173_v2, %v1930_v49 }
 0x48e   : > { %v3757_v63 = vpop.eup %3756  ;;  %v2158_v50 = vadd.f32 %v3751_v16, %v2157_v26 }
 0x48f   : > { %v3759_v15 = vpop.eup %3758  ;;  %v2173_v60 = vadd.f32 %v3753_v25, %v2172_v1  ;;  %v5214_v62 = vadd.f32 1.0, %v3757_v63  ;;  %v3439_v11 = vmul.f32 -1.442695, %v2120_v36 }
 0x490   : > { %v2162_v22 = vsel %vm2161_vm3, %v3751_v16, %v2158_v50  ;;  %v2185_v24 = vmul.f32 %v3759_v15, %v5189_v51  ;;  %v3761_v3 = vpop.eup %3760  ;;  %vm2190_vm15 = vweird.f32 %v3759_v15  ;;  %v2105_v16 = vadd.f32 %v5169_v43, %v2076_v29 }
 0x491   : > { %v2177_v4 = vsel %vm2176_vm14, %v3753_v25, %v2173_v60  ;;  %v2167_v13 = vsel %vm5205_vm2, %v2166_v42, %v2162_v22  ;;  %3764 = vrcp.f32 %v5214_v62  ;;  %v5224_v12 = vadd.f32 1.0, %v3761_v3  ;;  %vm2191_vm1 = vmor %vm2189_vm0, %vm2190_vm15 }
 0x492   : > { %v3763_v8 = vpop.eup %3762  ;;  %v2182_v6 = vsel %vm5209_vm10, %v2181_v57, %v2177_v4  ;;  %v2274_v53 = vmul.f32 %v2167_v13, %v2045_v46  ;;  %v2186_v19 = vsub.f32 1.0, %v2185_v24  ;;  %v2208_v25 = vand.u32 2147483647, %v5201_v59 }
 0x493   : > { %v2275_v17 = vmul.f32 %v2182_v6, %v2103_v45  ;;  %v2200_v28 = vmul.f32 %v3763_v8, %v5201_v59  ;;  %3766 = vrcp.f32 %v5224_v12  ;;  %v2210_v45 = vand.u32 2147483648, %v5201_v59 }
 0x494   : > { %v5228_v30 = vmax.f32 %v2274_v53, 0.0  ;;  %v2187_v58 = vmul.f32 %v3759_v15, %v2186_v19  ;;  %3768 = vpow2.f32 %v3439_v11  ;;  %vm2205_vm6 = vweird.f32 %v3763_v8 }
 0x495   : > { %v2283_v32 = vmax.f32 %v2275_v17, 0.0  ;;  %v2201_v44 = vsub.f32 1.0, %v2200_v28  ;;  %v2196_v51 = vor.u32 1.1754944e-38, %v2195_v18  ;;  %v3438_v29 = vmul.f32 -1.442695, %v2062_v41  ;;  %vm2206_vm9 = vmor %vm2204_vm7, %vm2205_vm6 }
 0x496   : > { %2290 = vst [vmem:[#allocation3] sm:$0xff] %v5228_v30  ;;  %v2188_v46 = vadd.f32 %v3759_v15, %v2187_v58  ;;  %2314 = vrot.lane.b32.xlu1 %v5228_v30, %s5715_s27  ;;  %v2211_v20 = vor.u32 1.1754944e-38, %v2210_v45  ;;  %v2225_v26 = vand.u32 2147483648, %v5214_v62  ;;  %vm2209_vm2 = vcmp.eq.f32.partialorder %v2208_v25, 8.507059e+37 }
 0x497   : > { %v3765_v48 = vpop.eup %3764  ;;  %2291 = vst.msk [vmem:[#allocation3 + $0x8] sm:$0xff] %vm1631_vm13, %v2283_v32  ;;  %v2202_v43 = vmul.f32 %v3763_v8, %v2201_v44  ;;  %3770 = vpow2.f32 %v3438_v29  ;;  %v2223_v39 = vand.u32 2147483647, %v5214_v62  ;;  %vm2219_vm3 = vweird.f32 %v5214_v62 }
 0x498   : > { %v2192_v35 = vsel %vm2191_vm1, %v3759_v15, %v2188_v46  ;;  %v2215_v40 = vmul.f32 %v3765_v48, %v5214_v62  ;;  %vm2220_vm10 = vweird.f32 %v3765_v48  ;;  %v2238_v42 = vand.u32 2147483647, %v5224_v12 }
 0x499   : > { %v2203_v61 = vadd.f32 %v3763_v8, %v2202_v43  ;;  %v2197_v31 = vsel %vm2194_vm5, %v2196_v51, %v2192_v35  ;;  %v3767_v5 = vpop.eup %3766  ;;  %v2240_v36 = vand.u32 2147483648, %v5224_v12  ;;  %v2226_v60 = vor.u32 1.1754944e-38, %v2225_v26  ;;  %vm2221_vm15 = vmor %vm2219_vm3, %vm2220_vm10 }
 0x49a   : > { %v5244_v23 = vmul.f32 %v2197_v31, %v5196_v37  ;;  %v2216_v21 = vsub.f32 1.0, %v2215_v40  ;;  %v2230_v56 = vmul.f32 %v3767_v5, %v5224_v12  ;;  %v3769_v1 = vpop.eup %3768  ;;  %vm2235_vm14 = vweird.f32 %v3767_v5 }
 0x49b   : > { %v2207_v27 = vsel %vm2206_vm9, %v3763_v8, %v2203_v61  ;;  %v2153_v37 = vadd.f32 1.0, %v3769_v1  ;;  %v2050_v62 = vadd.f32 %v5175_v9, %v2021_v10  ;;  %vm2224_vm0 = vcmp.eq.f32.partialorder %v2223_v39, 8.507059e+37  ;;  %v2414_v1 = vld [vmem:[%s5659_s8 + $0xa0] sm:$0xff] }
 0x49c   : > { %v2212_v0 = vsel %vm2209_vm2, %v2211_v20, %v2207_v27  ;;  %v2284_v59 = vmax.f32 %v5244_v23, 0.0  ;;  %v2217_v63 = vmul.f32 %v3765_v48, %v2216_v21  ;;  %v2231_v34 = vsub.f32 1.0, %v2230_v56  ;;  %2468 = vmatpush.msrb.mxu1 %v2414_v1 }
 0x49d   : > { %v2277_v50 = vmul.f32 %v2212_v0, %v2105_v16  ;;  %v3771_v57 = vpop.eup %3770  ;;  %3772 = vrcp.f32 %v2153_v37  ;;  %vm2234_vm6 = vweird.f32 %v5224_v12  ;;  %v2241_v13 = vor.u32 1.1754944e-38, %v2240_v36  ;;  %v2413_v0 = vld [vmem:[%s5659_s8 + $0x98] sm:$0xff] }
 0x49e   : > { %v2218_v15 = vadd.f32 %v3765_v48, %v2217_v63  ;;  %v5253_v7 = vld [vmem:[#allocation3 + $0x8] sm:$0xff]  ;;  %2318 = vrot.lane.b32.xlu0 %v2284_v59, %s5715_s27  ;;  %v2232_v24 = vmul.f32 %v3767_v5, %v2231_v34  ;;  %v2152_v14 = vadd.f32 1.0, %v3771_v57  ;;  %vm2236_vm1 = vmor %vm2234_vm6, %vm2235_vm14  ;;  %v2108_v8 = vadd.f32 %v5177_v38, %v2079_v54  ;;  %v2412_v63 = vld [vmem:[%s5659_s8 + $0x90] sm:$0xff]  ;;  %2469 = vmatpush.msrb.mxu1 %v2413_v0 }
 0x49f   : > { %v2285_v22 = vmax.f32 %v2277_v50, 0.0  ;;  %2316 = vrot.lane.b32.xlu2 %v5253_v7, %s5715_s27  ;;  %vm2239_vm5 = vcmp.eq.f32.partialorder %v2238_v42, 8.507059e+37  ;;  %v2270_v58 = vand.u32 2147483648, %v2153_v37  ;;  %v2268_v32 = vand.u32 2147483647, %v2153_v37  ;;  %v2408_v54 = vld [vmem:[%s5659_s8 + $0x70] sm:$0xff] }
 0x4a0   : > { %v2222_v55 = vsel %vm2221_vm15, %v3765_v48, %v2218_v15  ;;  %v2233_v3 = vadd.f32 %v3767_v5, %v2232_v24  ;;  %3774 = vrcp.f32 %v2152_v14  ;;  %vm2264_vm9 = vweird.f32 %v2153_v37  ;;  %2470 = vmatpush.msrb.mxu1 %v2412_v63 }
 0x4a1   : > { %2293 = vst.msk [vmem:[#allocation3 + $0x38] sm:$0xff] %vm1631_vm13, %v2285_v22  ;;  %v2227_v4 = vsel %vm2224_vm0, %v2226_v60, %v2222_v55  ;;  %v2255_v45 = vand.u32 2147483648, %v2152_v14  ;;  %v2271_v46 = vor.u32 1.1754944e-38, %v2270_v58  ;;  %v2253_v49 = vand.u32 2147483647, %v2152_v14 }
 0x4a2   : > { %v5265_v11 = vmul.f32 %v2227_v4, %v2050_v62  ;;  %v2237_v6 = vsel %vm2236_vm1, %v3767_v5, %v2233_v3  ;;  %vm2269_vm3 = vcmp.eq.f32.partialorder %v2268_v32, 8.507059e+37  ;;  %vm2249_vm14 = vweird.f32 %v2152_v14  ;;  %v2410_v3 = vld [vmem:[%s5659_s8 + $0x80] sm:$0xff]  ;;  %v2407_v4 = vld [vmem:[%s5659_s8 + $0x68] sm:$0xff] }
 0x4a3   : > { %v2242_v9 = vsel %vm2239_vm5, %v2241_v13, %v2237_v6  ;;  %v3773_v19 = vpop.eup %3772  ;;  %v2256_v35 = vor.u32 1.1754944e-38, %v2255_v45  ;;  %vm2254_vm0 = vcmp.eq.f32.partialorder %v2253_v49, 8.507059e+37  ;;  %v2406_v13 = vld [vmem:[%s5659_s8 + $0x60] sm:$0xff]  ;;  %v2403_v6 = vld [vmem:[%s5659_s8 + $0x48] sm:$0xff] }
 0x4a4   : > { %v2286_v53 = vmax.f32 %v5265_v11, 0.0  ;;  %v2279_v2 = vmul.f32 %v2242_v9, %v2108_v8  ;;  %v2260_v17 = vmul.f32 %v3773_v19, %v2153_v37  ;;  %vm2265_vm7 = vweird.f32 %v3773_v19  ;;  %v2405_v11 = vld [vmem:[%s5659_s8 + $0x58] sm:$0xff]  ;;  %v2404_v8 = vld [vmem:[%s5659_s8 + $0x50] sm:$0xff]  ;;  %v2402_v9 = vld [vmem:[%s5659_s8 + $0x40] sm:$0xff] }
 0x4a5   : > { %vm2266_vm2 = vmor %vm2264_vm9, %vm2265_vm7  ;;  %vm2861_vm7 = vcmask 392192   ;;  %vm3258_vm9 = vcmask 73728  }
 0x4a6   : > { %v2287_v28 = vmax.f32 %v2279_v2, 0.0  ;;  %v3775_v12 = vpop.eup %3774  ;;  %v2261_v18 = vsub.f32 1.0, %v2260_v17  ;;  %v2399_v2 = vld [vmem:[%s5659_s8 + $0x28] sm:$0xff]  ;;  %v2398_v17 = vld [vmem:[%s5659_s8 + $0x20] sm:$0xff] }
 0x4a7   : > { %2322 = vrot.lane.b32.xlu2 %v2286_v53, %s5715_s27  ;;  %v2245_v38 = vmul.f32 %v3775_v12, %v2152_v14  ;;  %vm2250_vm10 = vweird.f32 %v3775_v12  ;;  %v2409_v14 = vld [vmem:[%s5659_s8 + $0x78] sm:$0xff] }
 0x4a8   : > { %v2301_v41 = vld [vmem:[#allocation3 + $0x38] sm:$0xff]  ;;  %2295 = vst.msk [vmem:[#allocation3 + $0x68] sm:$0xff] %vm1631_vm13, %v2287_v28  ;;  %v2262_v16 = vmul.f32 %v3773_v19, %v2261_v18  ;;  %vm2251_vm15 = vmor %vm2249_vm14, %vm2250_vm10  ;;  %2428 = vmatpush.msra.mxu3 %v2409_v14  ;;  %v2395_v18 = vld [vmem:[%s5659_s8 + $0x8] sm:$0xff] }
 0x4a9   : > { %2320 = vrot.lane.b32.xlu1 %v2301_v41, %s5715_s27  ;;  %v2246_v44 = vsub.f32 1.0, %v2245_v38  ;;  %v2397_v28 = vld [vmem:[%s5659_s8 + $0x18] sm:$0xff] }
 0x4aa   : > { %v2263_v25 = vadd.f32 %v3773_v19, %v2262_v16  ;;  %2429 = vmatpush.msra.mxu3 %v2408_v54 }
 0x4ab   : > { %v2247_v48 = vmul.f32 %v3775_v12, %v2246_v44 }
 0x4ac   : > { %v2267_v43 = vsel %vm2266_vm2, %v3773_v19, %v2263_v25  ;;  %2430 = vmatpush.msra.mxu3 %v2407_v4  ;;  %v2400_v19 = vld [vmem:[%s5659_s8 + $0x30] sm:$0xff] }
 0x4ad   : > { %v2272_v51 = vsel %vm2269_vm3, %v2271_v46, %v2267_v43  ;;  %v2248_v29 = vadd.f32 %v3775_v12, %v2247_v48 }
 0x4ae   : > { %v2281_v10 = vmul.f32 %v2272_v51, %v5181_v52  ;;  %2431 = vmatpush.msra.mxu3 %v2406_v13 }
 0x4af   : > { %v2303_v40 = vld [vmem:[#allocation3 + $0x68] sm:$0xff]  ;;  %v2252_v61 = vsel %vm2251_vm15, %v3775_v12, %v2248_v29  ;;  %v2396_v12 = vld [vmem:[%s5659_s8 + $0x10] sm:$0xff] }
 0x4b0   : > { %2324 = vrot.lane.b32.xlu0 %v2303_v40, %s5715_s27  ;;  %v2289_v31 = vmax.f32 %v2281_v10, 0.0  ;;  %v2257_v5 = vsel %vm2254_vm0, %v2256_v35, %v2252_v61  ;;  %2432 = vmatpush.msra.mxu3 %v2405_v11 }
 0x4b1   : > { %v2280_v20 = vmul.f32 %v2257_v5, %v5179_v33 }
 0x4b2   : > { %2297 = vst.msk [vmem:[#allocation3 + $0x98] sm:$0xff] %vm1631_vm13, %v2289_v31  ;;  %2433 = vmatpush.msra.mxu3 %v2404_v8  ;;  %vm2494_vm13 = vcmask 465920  }
 0x4b3   : > { %v2288_v21 = vmax.f32 %v2280_v20, 0.0 }
 0x4b4   : > { %2434 = vmatpush.msra.mxu3 %v2403_v6 }
 0x4b5   : > { %2326 = vrot.lane.b32.xlu1 %v2288_v21, %s5715_s27 }
 0x4b6   : > { %2435 = vmatpush.msra.mxu3 %v2402_v9 }
 0x4b9   : > { %v2305_v26 = vld [vmem:[#allocation3 + $0x98] sm:$0xff] }
 0x4ba   : > { %2328 = vrot.lane.b32.xlu2 %v2305_v26, %s5715_s27 }
 0x4f9   : > { %v2317_v52 = vpop.permute.xlu2 %2316 }
 0x4fa   : > { %v5281_v27 = vmax.f32 %v5253_v7, %v2317_v52 }
 0x4fc   : > { %2360 = vrot.lane.b32.xlu1 %v5281_v27, %s5720_s1 }
 0x501   : > { %v2323_v15 = vpop.permute.xlu2 %2322 }
 0x508   : > { %v2315_v56 = vpop.permute.xlu1 %2314 }
 0x509   : > { %v2330_v39 = vsel %vm529_vm4, %v2315_v56, %v2317_v52 }
 0x50a   : > { %v5287_v33 = vmax.f32 %v5228_v30, %v2330_v39  ;;  %v2411_v30 = vld [vmem:[%s5659_s8 + $0x88] sm:$0xff] }
 0x50b   : > { %2471 = vmatpush.msrb.mxu1 %v2411_v30 }
 0x50c   : > { %2358 = vrot.lane.b32.xlu0 %v5287_v33, %s5720_s1 }
 0x50d   : > { %2472 = vmatpush.msrb.mxu1 %v2410_v3 }
 0x510   : > { %v2319_v50 = vpop.permute.xlu0 %2318 }
 0x514   : > { %v2329_v23 = vpop.permute.xlu2 %2328 }
 0x515   : > { %v5328_v55 = vmax.f32 %v2305_v26, %v2329_v23 }
 0x51b   : > { %v2321_v34 = vpop.permute.xlu1 %2320 }
 0x51c   : > { %v2331_v37 = vsel %vm529_vm4, %v2319_v50, %v2321_v34  ;;  %v5304_v42 = vmax.f32 %v2301_v41, %v2321_v34  ;;  %v2394_v41 = vld [vmem:[%s5659_s8] sm:$0xff] }
 0x51d   : > { %v5308_v36 = vmax.f32 %v2284_v59, %v2331_v37 }
 0x51e   : > { %2364 = vrot.lane.b32.xlu0 %v5304_v42, %s5720_s1 }
 0x51f   : > { %2362 = vrot.lane.b32.xlu2 %v5308_v36, %s5720_s1 }
 0x522   : > { %v2325_v60 = vpop.permute.xlu0 %2324 }
 0x523   : > { %v2332_v7 = vsel %vm529_vm4, %v2323_v15, %v2325_v60  ;;  %v5315_v57 = vmax.f32 %v2303_v40, %v2325_v60  ;;  %v2750_v15 = vld [vmem:[%s5657_s6 + $0x8] sm:$0xff]  ;;  %v2749_v60 = vld [vmem:[%s5657_s6] sm:$0xff] }
 0x524   : > { %v5319_v22 = vmax.f32 %v2286_v53, %v2332_v7  ;;  %v2401_v53 = vld [vmem:[%s5659_s8 + $0x38] sm:$0xff] }
 0x525   : > { %2436 = vmatpush.msra.mxu3 %v2401_v53 }
 0x526   : > { %2366 = vrot.lane.b32.xlu1 %v5319_v22, %s5720_s1 }
 0x527   : > { %2368 = vrot.lane.b32.xlu2 %v5315_v57, %s5720_s1  ;;  %v2327_v59 = vpop.permute.xlu1 %2326  ;;  %2437 = vmatpush.msra.mxu3 %v2400_v19 }
 0x528   : > { %v2333_v24 = vsel %vm529_vm4, %v2327_v59, %v2329_v23  ;;  %vm2415_vm4 = vcmask 326656  }
 0x529   : > { %v5326_v62 = vmax.f32 %v2288_v21, %v2333_v24  ;;  %2438 = vmatpush.msra.mxu3 %v2399_v2 }
 0x52b   : > { %2370 = vrot.lane.b32.xlu0 %v5326_v62, %s5720_s1  ;;  %2439 = vmatpush.msra.mxu3 %v2398_v17 }
 0x52d   : > { %2440 = vmatpush.msra.mxu3 %v2397_v28 }
 0x52e   : > { %2372 = vrot.lane.b32.xlu1 %v5328_v55, %s5720_s1  ;;  %s3866_s1 = smov 110  }
 0x52f   : > { %2441 = vmatpush.msra.mxu3 %v2396_v12 }
 0x531   : > { %2442 = vmatpush.msra.mxu3 %v2395_v18 }
 0x533   : > { %2443 = vmatpush.msra.mxu3 %v2394_v41 }
 0x56e   : > { %v2361_v58 = vpop.permute.xlu1 %2360 }
 0x56f   : > { %v2387_v38 = vmax.f32 %v5281_v27, %v2361_v58 }
 0x571   : > { %3440 = vmatmul.msk.f32.vlgmr.msrb.gmra.mxu1 %vm2415_vm4, %v2387_v38 }
 0x579   : > { %v2363_v25 = vpop.permute.xlu2 %2362 }
 0x57e   : > { %v2359_v16 = vpop.permute.xlu0 %2358 }
 0x57f   : > { %v2374_v32 = vsel %vm1703_vm12, %v2359_v16, %v2361_v58 }
 0x580   : > { %v2386_v44 = vmax.f32 %v5287_v33, %v2374_v32 }
 0x581   : > { %v2369_v43 = vpop.permute.xlu2 %2368 }
 0x582   : > { %2444 = vmatmul.f32.vlgmr.msra.gmra.mxu3 %v2386_v44  ;;  %v2391_v51 = vmax.f32 %v5315_v57, %v2369_v43 }
 0x590   : > { %v2365_v45 = vpop.permute.xlu0 %2364 }
 0x591   : > { %v2375_v46 = vsel %vm1703_vm12, %v2363_v25, %v2365_v45  ;;  %v2389_v48 = vmax.f32 %v5304_v42, %v2365_v45 }
 0x592   : > { %v2388_v49 = vmax.f32 %v5308_v36, %v2375_v46 }
 0x593   : > { %3441 = vmatmul.msk.f32.gmra.mxu1 %vm2415_vm4, %v2389_v48 }
 0x594   : > { %2447 = vmatmul.f32.gmra.mxu3 %v2388_v49 }
 0x598   : > { %v2367_v29 = vpop.permute.xlu1 %2366 }
 0x599   : > { %v2376_v10 = vsel %vm1703_vm12, %v2367_v29, %v2369_v43 }
 0x59a   : > { %v2390_v35 = vmax.f32 %v5319_v22, %v2376_v10 }
 0x59b   : > { %3442 = vmatmul.msk.f32.gmra.mxu1 %vm2415_vm4, %v2391_v51 }
 0x59c   : > { %2450 = vmatmul.f32.gmra.mxu3 %v2390_v35 }
 0x59d   : > { %v2371_v40 = vpop.permute.xlu0 %2370 }
 0x5a0   : > { %v2373_v61 = vpop.permute.xlu1 %2372 }
 0x5a1   : > { %v2377_v31 = vsel %vm1703_vm12, %v2371_v40, %v2373_v61  ;;  %v2393_v5 = vmax.f32 %v5328_v55, %v2373_v61 }
 0x5a2   : > { %v2392_v20 = vmax.f32 %v5326_v62, %v2377_v31 }
 0x5a3   : > { %3443 = vmatmul.msk.f32.gmra.mxu1 %vm2415_vm4, %v2393_v5 }
 0x5a4   : > { %2453 = vmatmul.f32.gmra.mxu3 %v2392_v20 }
 0x5ee   : > { %v2474_v21 = vpop.f32.mrf.mxu1 }
 0x605   : > { %v2445_v26 = vpop.f32.mrf.mxu3 }
 0x606   : > { %v2475_v52 = vadd.f32 %v2474_v21, %v2445_v26 }
 0x608   : > { %2486 = vst.msk [vmem:[#allocation4] sm:$0xff] %vm595_vm8, %v2475_v52 }
 0x60f   : > { %v2547_v27 = vld [vmem:[#allocation4] sm:$0xff] }
 0x610   : > { %2555 = vrot.lane.b32.xlu1 %v2547_v27, %s3863_s29  ;;  %2531 = vrot.lane.b32.xlu2 %v2547_v27, %s5714_s2  ;;  %2495 = vst.msk [vmem:[#allocation2] sm:$0xff] %vm2494_vm13, %v2547_v27  ;;  %v2477_v56 = vpop.f32.mrf.mxu1 }
 0x611   : > { %2507 = vrot.lane.b32.xlu0 %v2547_v27, %s5715_s27 }
 0x617   : > { %v2448_v39 = vpop.f32.mrf.mxu3 }
 0x618   : > { %v2478_v33 = vadd.f32 %v2477_v56, %v2448_v39  ;;  %2651 = vrot.lane.b32.xlu1 %v2547_v27, %s3864_s23  ;;  %2627 = vrot.lane.b32.xlu2 %v2547_v27, %s5721_s19  ;;  %v2480_v1 = vpop.f32.mrf.mxu1 }
 0x61a   : > { %2487 = vst.msk [vmem:[#allocation4 + $0x10] sm:$0xff] %vm595_vm8, %v2478_v33 }
 0x61f   : > { %v2451_v0 = vpop.f32.mrf.mxu3 }
 0x620   : > { %v2481_v63 = vadd.f32 %v2480_v1, %v2451_v0  ;;  %v2483_v50 = vpop.f32.mrf.mxu1 }
 0x621   : > { %v2524_v30 = vld [vmem:[#allocation4 + $0x10] sm:$0xff] }
 0x622   : > { %2533 = vrot.lane.b32.xlu0 %v2524_v30, %s5714_s2  ;;  %2557 = vrot.lane.b32.xlu2 %v2524_v30, %s3863_s29  ;;  %2496 = vst.msk [vmem:[#allocation2 + $0x30] sm:$0xff] %vm2494_vm13, %v2524_v30 }
 0x623   : > { %2488 = vst.msk [vmem:[#allocation4 + $0x20] sm:$0xff] %vm595_vm8, %v2481_v63  ;;  %2509 = vrot.lane.b32.xlu1 %v2524_v30, %s5715_s27 }
 0x627   : > { %v2454_v34 = vpop.f32.mrf.mxu3 }
 0x628   : > { %v2484_v37 = vadd.f32 %v2483_v50, %v2454_v34 }
 0x62a   : > { %v2492_v42 = vld [vmem:[#allocation4 + $0x20] sm:$0xff]  ;;  %2653 = vrot.lane.b32.xlu2 %v2524_v30, %s3864_s23  ;;  %2489 = vst.msk [vmem:[#allocation4 + $0x30] sm:$0xff] %vm595_vm8, %v2484_v37  ;;  %vm2776_vm8 = vcmask 261120  }
 0x62b   : > { %2535 = vrot.lane.b32.xlu0 %v2492_v42, %s5714_s2  ;;  %2511 = vrot.lane.b32.xlu1 %v2492_v42, %s5715_s27  ;;  %2497 = vst.msk [vmem:[#allocation2 + $0x60] sm:$0xff] %vm2494_vm13, %v2492_v42 }
 0x631   : > { %v2493_v36 = vld [vmem:[#allocation4 + $0x30] sm:$0xff] }
 0x632   : > { %2559 = vrot.lane.b32.xlu2 %v2492_v42, %s3863_s29  ;;  %2498 = vst.msk [vmem:[#allocation2 + $0x90] sm:$0xff] %vm2494_vm13, %v2493_v36 }
 0x633   : > { %2631 = vrot.lane.b32.xlu0 %v2492_v42, %s5721_s19  ;;  %2537 = vrot.lane.b32.xlu1 %v2493_v36, %s5714_s2  ;;  %s3867_s2 = smov 119  }
 0x639   : > { %v2694_v1 = vld [vmem:[#allocation2 + $0x90] sm:$0xff] }
 0x63a   : > { %2655 = vrot.lane.b32.xlu2 %v2492_v42, %s3864_s23 }
 0x63b   : > { %2561 = vrot.lane.b32.xlu0 %v2493_v36, %s3863_s29  ;;  %2607 = vrot.lane.b32.xlu1 %v2492_v42, %s3865_s18 }
 0x642   : > { %2513 = vrot.lane.b32.xlu2 %v2493_v36, %s5715_s27 }
 0x643   : > { %2629 = vrot.lane.b32.xlu0 %v2524_v30, %s5721_s19  ;;  %2605 = vrot.lane.b32.xlu1 %v2524_v30, %s3865_s18 }
 0x64a   : > { %2679 = vrot.lane.b32.xlu2 %v2492_v42, %s3866_s1 }
 0x64b   : > { %2657 = vrot.lane.b32.xlu0 %v2493_v36, %s3864_s23  ;;  %2633 = vrot.lane.b32.xlu1 %v2493_v36, %s5721_s19 }
 0x652   : > { %2609 = vrot.lane.b32.xlu2 %v2493_v36, %s3865_s18 }
 0x653   : > { %2603 = vrot.lane.b32.xlu0 %v2547_v27, %s3865_s18  ;;  %2583 = vrot.lane.b32.xlu1 %v2492_v42, %s3867_s2 }
 0x65a   : > { %2585 = vrot.lane.b32.xlu2 %v2493_v36, %s3867_s2 }
 0x65b   : > { %2675 = vrot.lane.b32.xlu0 %v2547_v27, %s3866_s1  ;;  %2677 = vrot.lane.b32.xlu1 %v2524_v30, %s3866_s1 }
 0x662   : > { %2579 = vrot.lane.b32.xlu2 %v2547_v27, %s3867_s2 }
 0x663   : > { %2681 = vrot.lane.b32.xlu0 %v2493_v36, %s3866_s1  ;;  %2758 = vperm.xlu1 %3660, %v2750_v15   ;;  %v2692_v36 = vld [vmem:[#allocation2 + $0x30] sm:$0xff]  ;;  %s3804_s1 = scalar_lea.hbm %s5667_s16, 2 }
 0x66a   : > { %2753 = vperm.xlu2 %3658, %v2749_v60   ;;  %v2532_v7 = vpop.permute.xlu2 %2531  ;;  %v3446_v60 = vld [vmem:[%s5656_s5] sm:$0xf] }
 0x66b   : > { %2581 = vrot.lane.b32.xlu0 %v2524_v30, %s3867_s2  ;;  %2543 = vst.msk [vmem:[#allocation2 + $0x180] sm:$0xff] %vm2494_vm13, %v2532_v7  ;;  %v2693_v30 = vld [vmem:[#allocation2 + $0x60] sm:$0xff]  ;;  %v3575_v7 = vld [vmem:[%s5656_s5 + $0x8] sm:$0xf0]  ;;  %s510_s2 = sand.u32 1, %s3838_s22  }
 0x66c   : > { %v2728_v37 = vpack.c.bf16 %v2694_v1, %v2693_v30  ;;  %s3285_s26 = scalar_lea.sflag [#allocation7], %s510_s2 }
 0x672   : > { %v2628_v57 = vpop.permute.xlu2 %2627  ;;  %v2699_v51 = vld [vmem:[#allocation2 + $0x180] sm:$0xff] }
 0x673   : > { %2639 = vst.msk [vmem:[#allocation2 + $0x480] sm:$0xff] %vm2494_vm13, %v2628_v57  ;;  %v2691_v57 = vld [vmem:[#allocation2] sm:$0xff] }
 0x67c   : > { %v2558_v22 = vpop.permute.xlu2 %2557 }
 0x67d   : > { %2568 = vst.msk [vmem:[#allocation2 + $0x270] sm:$0xff] %vm2494_vm13, %v2558_v22  ;;  %v2715_v22 = vld [vmem:[#allocation2 + $0x480] sm:$0xff] }
 0x682   : > { %v2556_v23 = vpop.permute.xlu1 %2555 }
 0x683   : > { %v2508_v59 = vpop.permute.xlu0 %2507  ;;  %2567 = vst.msk [vmem:[#allocation2 + $0x240] sm:$0xff] %vm2494_vm13, %v2556_v23  ;;  %v2727_v23 = vpack.c.bf16 %v2692_v36, %v2691_v57  ;;  %v2858_v57 = vld [vmem:[%s5660_s9 + $0x18] sm:$0xff] }
 0x684   : > { %2519 = vst.msk [vmem:[#allocation2 + $0xc0] sm:$0xff] %vm2494_vm13, %v2508_v59  ;;  %v2654_v24 = vpop.permute.xlu2 %2653  ;;  %v2704_v16 = vld [vmem:[#allocation2 + $0x270] sm:$0xff] }
 0x685   : > { %2664 = vst.msk [vmem:[#allocation2 + $0x570] sm:$0xff] %vm2494_vm13, %v2654_v24  ;;  %v3447_v24 = vor.u32 %v3575_v7, %v3446_v60  ;;  %v2860_v60 = vld [vmem:[%s5660_s9 + $0x28] sm:$0xff]  ;;  %v2859_v7 = vld [vmem:[%s5660_s9 + $0x20] sm:$0xff] }
 0x686   : > { %2875 = vmatpush.msrb.mxu3 %v2860_v60  ;;  %v3587_v60 = vld [vmem:[%s5663_s12 + $0x10] sm:$0xff] }
 0x688   : > { %2876 = vmatpush.msrb.mxu3 %v2859_v7  ;;  %v3586_v7 = vld [vmem:[%s5663_s12 + $0x8] sm:$0xff] }
 0x68a   : > { %v2652_v62 = vpop.permute.xlu1 %2651  ;;  %v2703_v38 = vld [vmem:[#allocation2 + $0x240] sm:$0xff]  ;;  %2877 = vmatpush.msrb.mxu3 %v2858_v57 }
 0x68b   : > { %2663 = vst.msk [vmem:[#allocation2 + $0x540] sm:$0xff] %vm2494_vm13, %v2652_v62  ;;  %v2733_v32 = vpack.c.bf16 %v2704_v16, %v2703_v38  ;;  %v2695_v27 = vld [vmem:[#allocation2 + $0xc0] sm:$0xff]  ;;  %v3448_v16 = vld [vmem:[%s5656_s5 + $0xc] sm:$0xf0] }
 0x68c   : > { %v2560_v55 = vpop.permute.xlu2 %2559  ;;  %v2720_v56 = vld [vmem:[#allocation2 + $0x570] sm:$0xff]  ;;  %v3574_v38 = vld [vmem:[%s5656_s5 + $0x4] sm:$0xf] }
 0x68d   : > { %2569 = vst.msk [vmem:[#allocation2 + $0x2a0] sm:$0xff] %vm2494_vm13, %v2560_v55 }
 0x692   : > { %v2719_v52 = vld [vmem:[#allocation2 + $0x540] sm:$0xff] }
 0x693   : > { %v2741_v33 = vpack.c.bf16 %v2720_v56, %v2719_v52 }
 0x694   : > { %v2534_v14 = vpop.permute.xlu0 %2533  ;;  %v2656_v54 = vpop.permute.xlu2 %2655  ;;  %v2705_v12 = vld [vmem:[#allocation2 + $0x2a0] sm:$0xff] }
 0x695   : > { %2544 = vst.msk [vmem:[#allocation2 + $0x1b0] sm:$0xff] %vm2494_vm13, %v2534_v14  ;;  %v2510_v3 = vpop.permute.xlu1 %2509 }
 0x696   : > { %2665 = vst.msk [vmem:[#allocation2 + $0x5a0] sm:$0xff] %vm2494_vm13, %v2656_v54 }
 0x697   : > { %2520 = vst.msk [vmem:[#allocation2 + $0xf0] sm:$0xff] %vm2494_vm13, %v2510_v3 }
 0x69c   : > { %v2514_v4 = vpop.permute.xlu2 %2513  ;;  %v2700_v43 = vld [vmem:[#allocation2 + $0x1b0] sm:$0xff] }
 0x69d   : > { %v2536_v13 = vpop.permute.xlu0 %2535  ;;  %2522 = vst.msk [vmem:[#allocation2 + $0x150] sm:$0xff] %vm2494_vm13, %v2514_v4  ;;  %v2512_v11 = vpop.permute.xlu1 %2511  ;;  %v2731_v29 = vpack.c.bf16 %v2700_v43, %v2699_v51  ;;  %v2721_v61 = vld [vmem:[#allocation2 + $0x5a0] sm:$0xff] }
 0x69e   : > { %2545 = vst.msk [vmem:[#allocation2 + $0x1e0] sm:$0xff] %vm2494_vm13, %v2536_v13  ;;  %v2696_v26 = vld [vmem:[#allocation2 + $0xf0] sm:$0xff] }
 0x69f   : > { %2521 = vst.msk [vmem:[#allocation2 + $0x120] sm:$0xff] %vm2494_vm13, %v2512_v11  ;;  %v2729_v39 = vpack.c.bf16 %v2696_v26, %v2695_v27 }
 0x6a4   : > { %v2680_v8 = vpop.permute.xlu2 %2679  ;;  %v2698_v35 = vld [vmem:[#allocation2 + $0x150] sm:$0xff] }
 0x6a5   : > { %v2632_v6 = vpop.permute.xlu0 %2631  ;;  %2689 = vst.msk [vmem:[#allocation2 + $0x660] sm:$0xff] %vm2494_vm13, %v2680_v8  ;;  %v2538_v9 = vpop.permute.xlu1 %2537  ;;  %v2701_v46 = vld [vmem:[#allocation2 + $0x1e0] sm:$0xff] }
 0x6a6   : > { %2641 = vst.msk [vmem:[#allocation2 + $0x4e0] sm:$0xff] %vm2494_vm13, %v2632_v6  ;;  %v2697_v10 = vld [vmem:[#allocation2 + $0x120] sm:$0xff] }
 0x6a7   : > { %2546 = vst.msk [vmem:[#allocation2 + $0x210] sm:$0xff] %vm2494_vm13, %v2538_v9  ;;  %v2730_v20 = vpack.c.bf16 %v2698_v35, %v2697_v10 }
 0x6ac   : > { %v2610_v53 = vpop.permute.xlu2 %2609  ;;  %v2725_v9 = vld [vmem:[#allocation2 + $0x660] sm:$0xff] }
 0x6ad   : > { %v2562_v19 = vpop.permute.xlu0 %2561  ;;  %2618 = vst.msk [vmem:[#allocation2 + $0x450] sm:$0xff] %vm2494_vm13, %v2610_v53  ;;  %v2608_v2 = vpop.permute.xlu1 %2607  ;;  %v2717_v50 = vld [vmem:[#allocation2 + $0x4e0] sm:$0xff] }
 0x6ae   : > { %2570 = vst.msk [vmem:[#allocation2 + $0x2d0] sm:$0xff] %vm2494_vm13, %v2562_v19  ;;  %v2702_v44 = vld [vmem:[#allocation2 + $0x210] sm:$0xff] }
 0x6af   : > { %2617 = vst.msk [vmem:[#allocation2 + $0x420] sm:$0xff] %vm2494_vm13, %v2608_v2  ;;  %v2732_v49 = vpack.c.bf16 %v2702_v44, %v2701_v46 }
 0x6b4   : > { %v2586_v17 = vpop.permute.xlu2 %2585  ;;  %v2714_v55 = vld [vmem:[#allocation2 + $0x450] sm:$0xff] }
 0x6b5   : > { %v2630_v28 = vpop.permute.xlu0 %2629  ;;  %v2706_v18 = vld [vmem:[#allocation2 + $0x2d0] sm:$0xff]  ;;  %2594 = vst.msk [vmem:[#allocation2 + $0x390] sm:$0xff] %vm2494_vm13, %v2586_v17  ;;  %v2606_v41 = vpop.permute.xlu1 %2605 }
 0x6b6   : > { %2640 = vst.msk [vmem:[#allocation2 + $0x4b0] sm:$0xff] %vm2494_vm13, %v2630_v28  ;;  %v2734_v58 = vpack.c.bf16 %v2706_v18, %v2705_v12  ;;  %v2713_v62 = vld [vmem:[#allocation2 + $0x420] sm:$0xff]  ;;  %v3454_v12 = vld [vmem:[%s5656_s5 + $0x8] sm:$0xf]  ;;  %v3576_v18 = vld [vmem:[%s5656_s5 + $0x10] sm:$0xf0] }
 0x6b7   : > { %2616 = vst.msk [vmem:[#allocation2 + $0x3f0] sm:$0xff] %vm2494_vm13, %v2606_v41  ;;  %v2738_v54 = vpack.c.bf16 %v2714_v55, %v2713_v62  ;;  %v2855_v62 = vld [vmem:[%s5660_s9] sm:$0xff] }
 0x6b8   : > { %2780 = vmatpush.bf16.msrb.mxu2 %v2734_v58  ;;  %v3455_v58 = vor.u32 %v3576_v18, %v3454_v12 }
 0x6bc   : > { %2781 = vmatpush.bf16.msrb.mxu2 %v2733_v32  ;;  %v2580_v25 = vpop.permute.xlu2 %2579  ;;  %v2710_v6 = vld [vmem:[#allocation2 + $0x390] sm:$0xff] }
 0x6bd   : > { %v2658_v45 = vpop.permute.xlu0 %2657  ;;  %2591 = vst.msk [vmem:[#allocation2 + $0x300] sm:$0xff] %vm2494_vm13, %v2580_v25  ;;  %v2634_v48 = vpop.permute.xlu1 %2633  ;;  %v2716_v15 = vld [vmem:[#allocation2 + $0x4b0] sm:$0xff] }
 0x6be   : > { %2666 = vst.msk [vmem:[#allocation2 + $0x5d0] sm:$0xff] %vm2494_vm13, %v2658_v45  ;;  %v2739_v59 = vpack.c.bf16 %v2716_v15, %v2715_v22  ;;  %v2712_v4 = vld [vmem:[#allocation2 + $0x3f0] sm:$0xff]  ;;  %v3451_v45 = vor.u32 %v3574_v38, %v3448_v16  ;;  %v3581_v38 = vld [vmem:[%s5661_s10 + $0x20] sm:$0x10]  ;;  %v3496_v16 = vld [vmem:[%s5661_s10 + $0x28] sm:$0xf] }
 0x6bf   : > { %2642 = vst.msk [vmem:[#allocation2 + $0x510] sm:$0xff] %vm2494_vm13, %v2634_v48  ;;  %v2857_v22 = vld [vmem:[%s5660_s9 + $0x10] sm:$0xff] }
 0x6c0   : > { %2782 = vmatpush.bf16.msrb.mxu2 %v2732_v49  ;;  %2878 = vmatpush.msrb.mxu3 %v2857_v22 }
 0x6c4   : > { %2783 = vmatpush.bf16.msrb.mxu2 %v2731_v29  ;;  %v2707_v32 = vld [vmem:[#allocation2 + $0x300] sm:$0xff]  ;;  %v2754_v52 = vpop.permute.xlu2 %2753 }
 0x6c5   : > { %v2604_v40 = vpop.permute.xlu0 %2603  ;;  %v2722_v31 = vld [vmem:[#allocation2 + $0x5d0] sm:$0xff]  ;;  %v2584_v5 = vpop.permute.xlu1 %2583 }
 0x6c6   : > { %2615 = vst.msk [vmem:[#allocation2 + $0x3c0] sm:$0xff] %vm2494_vm13, %v2604_v40  ;;  %v2742_v21 = vpack.c.bf16 %v2722_v31, %v2721_v61  ;;  %v2718_v0 = vld [vmem:[#allocation2 + $0x510] sm:$0xff] }
 0x6c7   : > { %2593 = vst.msk [vmem:[#allocation2 + $0x360] sm:$0xff] %vm2494_vm13, %v2584_v5  ;;  %v2740_v42 = vpack.c.bf16 %v2718_v0, %v2717_v50 }
 0x6c8   : > { %2784 = vmatpush.bf16.msrb.mxu2 %v2730_v20  ;;  %2794 = vmatpush.bf16.msrb.mxu0 %v2742_v21 }
 0x6cc   : > { %2785 = vmatpush.bf16.msrb.mxu2 %v2729_v39  ;;  %2795 = vmatpush.bf16.msrb.mxu0 %v2741_v33 }
 0x6cd   : > { %v2676_v63 = vpop.permute.xlu0 %2675  ;;  %v2678_v34 = vpop.permute.xlu1 %2677  ;;  %v2711_v3 = vld [vmem:[#allocation2 + $0x3c0] sm:$0xff] }
 0x6ce   : > { %2687 = vst.msk [vmem:[#allocation2 + $0x600] sm:$0xff] %vm2494_vm13, %v2676_v63  ;;  %v2737_v13 = vpack.c.bf16 %v2712_v4, %v2711_v3  ;;  %v2709_v11 = vld [vmem:[#allocation2 + $0x360] sm:$0xff]  ;;  %v3468_v4 = vld [vmem:[%s5661_s10 + $0x8] sm:$0xf] }
 0x6cf   : > { %2688 = vst.msk [vmem:[#allocation2 + $0x630] sm:$0xff] %vm2494_vm13, %v2678_v34  ;;  %v2736_v19 = vpack.c.bf16 %v2710_v6, %v2709_v11  ;;  %v3577_v3 = vld [vmem:[%s5661_s10] sm:$0x10]  ;;  %v3578_v11 = vld [vmem:[%s5661_s10 + $0x8] sm:$0x10] }
 0x6d0   : > { %2786 = vmatpush.bf16.msrb.mxu2 %v2728_v37  ;;  %2796 = vmatpush.bf16.msrb.mxu0 %v2740_v42  ;;  %v3579_v6 = vld [vmem:[%s5661_s10 + $0x10] sm:$0x10] }
 0x6d4   : > { %2787 = vmatpush.bf16.msrb.mxu2 %v2727_v23  ;;  %2797 = vmatpush.bf16.msrb.mxu0 %v2739_v59  ;;  %v2856_v23 = vld [vmem:[%s5660_s9 + $0x8] sm:$0xff] }
 0x6d5   : > { %v2682_v14 = vpop.permute.xlu0 %2681  ;;  %v2723_v17 = vld [vmem:[#allocation2 + $0x600] sm:$0xff]  ;;  %v2759_v51 = vpop.permute.xlu1 %2758  ;;  %2879 = vmatpush.msrb.mxu3 %v2856_v23 }
 0x6d6   : > { %2690 = vst.msk [vmem:[#allocation2 + $0x690] sm:$0xff] %vm2494_vm13, %v2682_v14  ;;  %v2724_v28 = vld [vmem:[#allocation2 + $0x630] sm:$0xff]  ;;  %v3585_v23 = vld [vmem:[%s5663_s12] sm:$0xff] }
 0x6d7   : > { %2788 = vmatmul.bf16.vlgmr.msrb.gmra.mxu2 %v3447_v24  ;;  %v2743_v41 = vpack.c.bf16 %v2724_v28, %v2723_v17  ;;  %2880 = vmatpush.msrb.mxu3 %v2855_v62  ;;  %v2886_v62 = vld [vmem:[%s5662_s11] sm:$0x1] }
 0x6d8   : > { %2798 = vmatpush.bf16.msrb.mxu0 %v2738_v54  ;;  %v3461_v54 = vld [vmem:[%s5661_s10] sm:$0xf] }
 0x6dc   : > { %2799 = vmatpush.bf16.msrb.mxu0 %v2737_v13  ;;  %v3462_v13 = vor.u32 %v3577_v3, %v3461_v54 }
 0x6dd   : > { %v2582_v8 = vpop.permute.xlu0 %2581  ;;  %v2726_v53 = vld [vmem:[#allocation2 + $0x690] sm:$0xff] }
 0x6de   : > { %2592 = vst.msk [vmem:[#allocation2 + $0x330] sm:$0xff] %vm2494_vm13, %v2582_v8  ;;  %v2744_v2 = vpack.c.bf16 %v2726_v53, %v2725_v9  ;;  %v3475_v8 = vld [vmem:[%s5661_s10 + $0x10] sm:$0xf]  ;;  %v3469_v9 = vor.u32 %v3578_v11, %v3468_v4  ;;  %v2900_v17 = vand.u32 %v3462_v13, %v4072_v47 }
 0x6df   : > { %v3476_v53 = vor.u32 %v3579_v6, %v3475_v8 }
 0x6e0   : > { %2800 = vmatpush.bf16.msrb.mxu0 %v2736_v19  ;;  %2814 = vmatpush.bf16.msra.mxu2 %v2744_v2  ;;  %v3482_v19 = vld [vmem:[%s5661_s10 + $0x18] sm:$0xf]  ;;  %v3580_v2 = vld [vmem:[%s5661_s10 + $0x18] sm:$0x10]  ;;  %v2930_v12 = vand.u32 %v3469_v9, %v4072_v47 }
 0x6e1   : > { %v3483_v28 = vor.u32 %v3580_v2, %v3482_v19  ;;  %v2960_v18 = vand.u32 %v3476_v53, %v4072_v47 }
 0x6e2   : > { %2939 = vmatpush.bf16.msra.mxu1 %v2930_v12 }
 0x6e3   : > { %2969 = vmatpush.bf16.msra.mxu3 %v2960_v18 }
 0x6e4   : > { %2815 = vmatpush.bf16.msra.mxu2 %v2743_v41  ;;  %v2990_v41 = vand.u32 %v3483_v28, %v4072_v47 }
 0x6e5   : > { %v2708_v44 = vld [vmem:[#allocation2 + $0x330] sm:$0xff] }
 0x6e6   : > { %v2735_v25 = vpack.c.bf16 %v2708_v44, %v2707_v32  ;;  %v3582_v44 = vld [vmem:[%s5661_s10 + $0x28] sm:$0x10] }
 0x6e7   : > { %3456 = vmatmul.msk.bf16.vlgmr.msra.gmra.mxu2 %vm2776_vm8, %v3455_v58  ;;  %v3489_v58 = vld [vmem:[%s5661_s10 + $0x20] sm:$0xf] }
 0x6e8   : > { %2801 = vmatpush.bf16.msrb.mxu0 %v2735_v25  ;;  %2999 = vmatpush.bf16.msrb.mxu2 %v2990_v41  ;;  %v3490_v32 = vor.u32 %v3581_v38, %v3489_v58  ;;  %v3503_v25 = vld [vmem:[%s5661_s10 + $0x30] sm:$0xf] }
 0x6eb   : > { %2802 = vmatmul.bf16.vlgmr.msrb.gmra.mxu0 %v3451_v45  ;;  %v3583_v45 = vld [vmem:[%s5661_s10 + $0x30] sm:$0x10] }
 0x6ec   : > { %2909 = vmatpush.bf16.msra.mxu0 %v2900_v17 }
 0x75a   : > { %v2789_v46 = vpop.f32.mrf.mxu2 }
 0x75b   : > { %v2790_v27 = vadd.f32 %v2789_v46, %v2754_v52  ;;  %v3497_v46 = vor.u32 %v3582_v44, %v3496_v16 }
 0x762   : > { %v2791_v48 = vpop.f32.mrf.mxu2 }
 0x763   : > { %v2792_v29 = vadd.f32 %v2791_v48, %v2759_v51  ;;  %v3504_v48 = vor.u32 %v3583_v45, %v3503_v25  ;;  %v3020_v51 = vand.u32 %v3490_v32, %v4072_v47  ;;  %v3594_v45 = vld [vmem:[%s5665_s14 + $0x8] sm:$0xff] }
 0x765   : > { %3029 = vmatpush.bf16.msrb.mxu0 %v3020_v51 }
 0x768   : > { %v2803_v49 = vpop.f32.mrf.mxu0 }
 0x769   : > { %v2804_v33 = vadd.f32 %v2803_v49, %v2790_v27  ;;  %v3510_v49 = vld [vmem:[%s5661_s10 + $0x38] sm:$0xf] }
 0x76a   : > { %v2817_v43 = vpop.f32.mrf.mxu2 }
 0x76b   : > { %v2818_v50 = vadd.f32 %v2817_v43, %v2804_v33  ;;  %v3584_v43 = vld [vmem:[%s5661_s10 + $0x38] sm:$0x10] }
 0x770   : > { %v2805_v10 = vpop.f32.mrf.mxu0 }
 0x771   : > { %v2806_v35 = vadd.f32 %v2805_v10, %v2792_v29  ;;  %v3511_v29 = vor.u32 %v3584_v43, %v3510_v49  ;;  %v3050_v10 = vand.u32 %v3497_v46, %v4072_v47  ;;  %v3593_v46 = vld [vmem:[%s5665_s14] sm:$0xff] }
 0x772   : > { %v2819_v40 = vpop.f32.mrf.mxu2 }
 0x773   : > { %v2820_v61 = vadd.f32 %v2819_v40, %v2806_v35  ;;  %v3080_v35 = vand.u32 %v3504_v48, %v4072_v47  ;;  %v3110_v40 = vand.u32 %v3511_v29, %v4072_v47  ;;  %3059 = vmatpush.bf16.msrb.mxu1 %v3050_v10  ;;  %v3144_v48 = vld [vmem:[%s5664_s13] sm:$0x1] }
 0x775   : > { %v3457_v31 = vmul.f32 -1.442695, %v2820_v61  ;;  %3119 = vmatpush.bf16.msra.mxu2 %v3110_v40 }
 0x777   : > { %3776 = vpow2.f32 %v3457_v31 }
 0x77d   : > { %v3777_v5 = vpop.eup %3776 }
 0x77e   : > { %v2825_v20 = vadd.f32 1.0, %v3777_v5 }
 0x780   : > { %3778 = vrcp.f32 %v2825_v20  ;;  %v2837_v39 = vand.u32 2147483648, %v2825_v20  ;;  %v2835_v0 = vand.u32 2147483647, %v2825_v20  ;;  %vm2831_vm6 = vweird.f32 %v2825_v20 }
 0x782   : > { %v2838_v30 = vor.u32 1.1754944e-38, %v2837_v39  ;;  %vm2836_vm5 = vcmp.eq.f32.partialorder %v2835_v0, 8.507059e+37 }
 0x786   : > { %v3779_v21 = vpop.eup %3778 }
 0x787   : > { %v2827_v26 = vmul.f32 %v3779_v21, %v2825_v20  ;;  %vm2832_vm12 = vweird.f32 %v3779_v21 }
 0x788   : > { %vm2833_vm1 = vmor %vm2831_vm6, %vm2832_vm12 }
 0x789   : > { %v2828_v56 = vsub.f32 1.0, %v2827_v26 }
 0x78b   : > { %v2829_v1 = vmul.f32 %v3779_v21, %v2828_v56 }
 0x78d   : > { %v2830_v63 = vadd.f32 %v3779_v21, %v2829_v1 }
 0x78f   : > { %v2834_v34 = vsel %vm2833_vm1, %v3779_v21, %v2830_v63 }
 0x790   : > { %v2839_v37 = vsel %vm2836_vm5, %v2838_v30, %v2834_v34  ;;  %v3592_v34 = vld [vmem:[%s5663_s12 + $0x38] sm:$0xff] }
 0x791   : > { %v2841_v42 = vmul.f32 %v2839_v37, %v2818_v50  ;;  %v3591_v37 = vld [vmem:[%s5663_s12 + $0x30] sm:$0xff] }
 0x793   : > { %v2842_v36 = vmax.f32 %v2841_v42, 0.0  ;;  %v3590_v42 = vld [vmem:[%s5663_s12 + $0x28] sm:$0xff] }
 0x795   : > { %2843 = vst.msk [vmem:[#allocation3] sm:$0xff] %vm2494_vm13, %v2842_v36  ;;  %v3589_v36 = vld [vmem:[%s5663_s12 + $0x20] sm:$0xff] }
 0x79c   : > { %v2844_v15 = vld [vmem:[#allocation3] sm:$0xff] }
 0x79d   : > { %2846 = vrot.lane.b32.xlu0 %v2844_v15, %s5715_s27  ;;  %s3297_s27 = sshll.u32 %s3293_s28, 4  ;;  %s3298_s27 = int_to_ptr.hbm [resolvable:$true] %s3297_s27 }
 0x79e   : > { %s3798_s23 = sshra.s32 %s3298_s27, 4  ;;  %s3799_s23 = int_to_ptr.hbm [resolvable:$true] %s3798_s23 }
 0x79f   : > { %s3800_s25 = scalar_lea.hbm %s3799_s23, 1  ;;  %p3805_p0 = scmp.lt.s32.totalorder %s3799_s23, %s5667_s16 }
 0x7a0   : > { %p3801_p11 = scmp.ne.s32.totalorder %s3799_s23, %s3800_s25  ;;  %p3806_p1 = scmp.lt.s32.totalorder %s3804_s1, %s3800_s25 }
 0x7a2   : > { %p3802_p12 = pnand %p3801_p11, %p3991_p5  ;;  %p3807_p2 = por %p3806_p1, %p3805_p0 }
 0x7a4   : > { %p3803_p13 = pneg %p3802_p12 }
 0x7a6   : > { %p3808_p3 = pnand %p3807_p2, %p3803_p13 }
 0x80f   : > { %v2847_v59 = vpop.permute.xlu0 %2846 }
 0x810   : > { %v2849_v24 = vmax.f32 %v2844_v15, %v2847_v59  ;;  %v3588_v15 = vld [vmem:[%s5663_s12 + $0x18] sm:$0xff] }
 0x811   : > { %v3596_v59 = vld [vmem:[%s5665_s14 + $0x18] sm:$0xff] }
 0x812   : > { %2851 = vrot.lane.b32.xlu1 %v2849_v24, %s3863_s29  ;;  %s511_s29 = scalar_lea.vmem [#allocation6], %s510_s2 }
 0x813   : > { %s3295_s30 = sshll.u32 %s511_s29, 4  ;;  %s3296_s30 = int_to_ptr.vmem [resolvable:$true] %s3295_s30 }
 0x884   : > { %v2852_v55 = vpop.permute.xlu1 %2851 }
 0x885   : > { %v2854_v14 = vmax.f32 %v2849_v24, %v2852_v55  ;;  %v3595_v24 = vld [vmem:[%s5665_s14 + $0x10] sm:$0xff] }
 0x887   : > { %3458 = vmatmul.msk.f32.vlgmr.msrb.gmra.mxu3 %vm2861_vm7, %v2854_v14 }
 0x888   : > { %3089 = vmatpush.bf16.msrb.mxu3 %v3080_v35  ;;  %v3216_v35 = vld [vmem:[%s5666_s15] sm:$0x1] }
 0x90a   : > { %v2882_v61 = vpop.f32.mrf.mxu3 }
 0x90b   : > { %2885 = vst.msk [vmem:[#allocation5] sm:$0xff] %vm668_vm11, %v2882_v61 }
 0x912   : > { %v2887_v31 = vld [vmem:[#allocation5] sm:$0x1]  ;;  %v2916_v5 = vld [vmem:[#allocation5 + $0x1] sm:$0x1]  ;;  %v2946_v20 = vld [vmem:[#allocation5 + $0x2] sm:$0x1] }
 0x913   : > { %v2888_v21 = vpack.c.bf16 %v2887_v31, %v2887_v31  ;;  %v2917_v26 = vpack.c.bf16 %v2916_v5, %v2916_v5  ;;  %v2947_v52 = vpack.c.bf16 %v2946_v20, %v2946_v20  ;;  %v2976_v27 = vld [vmem:[#allocation5 + $0x3] sm:$0x1]  ;;  %v3006_v47 = vld [vmem:[#allocation5 + $0x4] sm:$0x1]  ;;  %v3036_v39 = vld [vmem:[#allocation5 + $0x5] sm:$0x1] }
 0x914   : > { %v2977_v56 = vpack.c.bf16 %v2976_v27, %v2976_v27  ;;  %v3066_v33 = vld [vmem:[#allocation5 + $0x6] sm:$0x1]  ;;  %v3096_v1 = vld [vmem:[#allocation5 + $0x7] sm:$0x1]  ;;  %v3007_v0 = vpack.c.bf16 %v3006_v47, %v3006_v47  ;;  %v3037_v63 = vpack.c.bf16 %v3036_v39, %v3036_v39 }
 0x915   : > { %3463 = vmatmul.msk.bf16.vlgmr.msra.gmra.mxu0 %vm668_vm11, %v2888_v21  ;;  %3470 = vmatmul.msk.bf16.vlgmr.msra.gmra.mxu1 %vm668_vm11, %v2917_v26  ;;  %v3067_v30 = vpack.c.bf16 %v3066_v33, %v3066_v33  ;;  %v3097_v50 = vpack.c.bf16 %v3096_v1, %v3096_v1 }
 0x916   : > { %3477 = vmatmul.msk.bf16.vlgmr.msra.gmra.mxu3 %vm668_vm11, %v2947_v52  ;;  %3484 = vmatmul.msk.bf16.vlgmr.msrb.gmra.mxu2 %vm668_vm11, %v2977_v56 }
 0x917   : > { %3193 = vmatpush.bf16.msra.mxu0 %v3592_v34  ;;  %3249 = vmatpush.bf16.msra.mxu1 %v3596_v59 }
 0x91b   : > { %3194 = vmatpush.bf16.msra.mxu0 %v3591_v37  ;;  %3250 = vmatpush.bf16.msra.mxu1 %v3595_v24 }
 0x91f   : > { %3195 = vmatpush.bf16.msra.mxu0 %v3590_v42  ;;  %3251 = vmatpush.bf16.msra.mxu1 %v3594_v45 }
 0x923   : > { %3196 = vmatpush.bf16.msra.mxu0 %v3589_v36  ;;  %3252 = vmatpush.bf16.msra.mxu1 %v3593_v46 }
 0x925   : > { %3491 = vmatmul.msk.bf16.vlgmr.msrb.gmra.mxu0 %vm668_vm11, %v3007_v0  ;;  %3498 = vmatmul.msk.bf16.vlgmr.msrb.gmra.mxu1 %vm668_vm11, %v3037_v63 }
 0x926   : > { %3505 = vmatmul.msk.bf16.vlgmr.msrb.gmra.mxu3 %vm668_vm11, %v3067_v30  ;;  %3512 = vmatmul.msk.bf16.vlgmr.msra.gmra.mxu2 %vm668_vm11, %v3097_v50  ;;  %vm3241_vm11 = vcmask 523264  }
 0x927   : > { %3197 = vmatpush.bf16.msra.mxu0 %v3588_v15 }
 0x92b   : > { %3198 = vmatpush.bf16.msra.mxu0 %v3587_v60 }
 0x92f   : > { %3199 = vmatpush.bf16.msra.mxu0 %v3586_v7 }
 0x933   : > { %3200 = vmatpush.bf16.msra.mxu0 %v3585_v23 }
 0x992   : > { %v2911_v57 = vpop.f32.mrf.mxu0  ;;  %v2941_v22 = vpop.f32.mrf.mxu1 }
 0x993   : > { %v2915_v55 = vadd.f32 %v2911_v57, %v2886_v62 }
 0x995   : > { %v2945_v13 = vadd.f32 %v2941_v22, %v2915_v55 }
 0x999   : > { %v2971_v14 = vpop.f32.mrf.mxu3  ;;  %v3001_v54 = vpop.f32.mrf.mxu2 }
 0x99a   : > { %v2913_v3 = vpop.f32.mrf.mxu0  ;;  %v2943_v4 = vpop.f32.mrf.mxu1  ;;  %v2975_v11 = vadd.f32 %v2971_v14, %v2945_v13 }
 0x99c   : > { %v3005_v9 = vadd.f32 %v3001_v54, %v2975_v11 }
 0x9a1   : > { %v2973_v8 = vpop.f32.mrf.mxu3  ;;  %v3003_v6 = vpop.f32.mrf.mxu2 }
 0x9a2   : > { %v3031_v53 = vpop.f32.mrf.mxu0  ;;  %v3061_v19 = vpop.f32.mrf.mxu1 }
 0x9a3   : > { %v3035_v2 = vadd.f32 %v3031_v53, %v3005_v9 }
 0x9a5   : > { %v3065_v17 = vadd.f32 %v3061_v19, %v3035_v2 }
 0x9a9   : > { %v3091_v28 = vpop.f32.mrf.mxu3  ;;  %v3121_v12 = vpop.f32.mrf.mxu2 }
 0x9aa   : > { %v3095_v18 = vadd.f32 %v3091_v28, %v3065_v17  ;;  %v3033_v41 = vpop.f32.mrf.mxu0  ;;  %v3063_v58 = vpop.f32.mrf.mxu1 }
 0x9ac   : > { %v3125_v38 = vadd.f32 %v3121_v12, %v3095_v18 }
 0x9ae   : > { %v3126_v16 = vmax.f32 %v3125_v38, 0.0 }
 0x9b0   : > { %v3127_v32 = vpack.c.bf16 %v3126_v16, %v3126_v16 }
 0x9b1   : > { %v3093_v44 = vpop.f32.mrf.mxu3  ;;  %v3123_v25 = vpop.f32.mrf.mxu2 }
 0x9b2   : > { %3201 = vmatmul.bf16.vlgmr.msra.gmra.mxu0 %v3127_v32 }
 0xa2f   : > { %v3202_v49 = vpop.f32.mrf.mxu0 }
 0xa30   : > { %v3203_v43 = vadd.f32 %v3202_v49, %v3144_v48 }
 0xa32   : > { %v3206_v51 = vmax.f32 %v3203_v43, 0.0 }
 0xa34   : > { %v3207_v29 = vpack.c.bf16 %v3206_v51, %v3206_v51 }
 0xa36   : > { %3561 = vmatmul.msk.bf16.vlgmr.msra.gmra.mxu1 %vm3241_vm11, %v3207_v29 }
 0xa37   : > { %v3204_v10 = vpop.f32.mrf.mxu0 }
 0xab3   : > { %v3254_v40 = vpop.f32.mrf.mxu1 }
 0xab4   : > { %v3255_v61 = vadd.f32 %v3254_v40, %v3216_v35 }
 0xab6   : > { %v3259_v31 = vsel %vm3258_vm9, %v3255_v61, -inf }
 0xab7   : > { %3260 = vmax.xlane.f32.xlu2 %v3259_v31 }
 0xabb   : > { %v3256_v5 = vpop.f32.mrf.mxu1 }
 0xb2a   : > { %v3261_v20 = vpop.xlane.xlu2 %3260 }
 0xb2b   : > { %v3262_v21 = vsub.f32 %v3255_v61, %v3261_v20 }
 0xb2d   : > { %v3263_v26 = vmul.f32 1.442695, %v3262_v21 }
 0xb2f   : > { %3780 = vpow2.f32 %v3263_v26 }
 0xb35   : > { %v3781_v52 = vpop.eup %3780 }
 0xb36   : > { %v3265_v27 = vsel %vm3258_vm9, %v3781_v52, 0.0 }
 0xb37   : > { %3266 = vadd.xlane.f32.xlu0 %v3265_v27 }
 0xbaa   : > { %v3267_v56 = vpop.xlane.xlu0 %3266 }
 0xbab   : > { %3782 = vrcp.f32 %v3267_v56  ;;  %v3279_v1 = vand.u32 2147483648, %v3267_v56  ;;  %v3277_v63 = vand.u32 2147483647, %v3267_v56  ;;  %vm3273_vm10 = vweird.f32 %v3267_v56 }
 0xbad   : > { %v3280_v50 = vor.u32 1.1754944e-38, %v3279_v1  ;;  %vm3278_vm14 = vcmp.eq.f32.partialorder %v3277_v63, 8.507059e+37 }
 0xbb1   : > { %v3783_v47 = vpop.eup %3782 }
 0xbb2   : > { %v3269_v39 = vmul.f32 %v3783_v47, %v3267_v56  ;;  %vm3274_vm2 = vweird.f32 %v3783_v47 }
 0xbb3   : > { %vm3275_vm3 = vmor %vm3273_vm10, %vm3274_vm2 }
 0xbb4   : > { %v3270_v33 = vsub.f32 1.0, %v3269_v39 }
 0xbb6   : > { %v3271_v0 = vmul.f32 %v3783_v47, %v3270_v33 }
 0xbb8   : > { %v3272_v30 = vadd.f32 %v3783_v47, %v3271_v0 }
 0xbba   : > { %v3276_v34 = vsel %vm3275_vm3, %v3783_v47, %v3272_v30 }
 0xbbb   : > { %v3281_v37 = vsel %vm3278_vm14, %v3280_v50, %v3276_v34 }
 0xbbc   : > { %v3282_v42 = vmul.f32 %v3781_v52, %v3281_v37 }
 0xbbe   : > { %3283 = vst.msk [vmem:[%s511_s29] sm:$0x1] %vm3258_vm9, %v3282_v42 }
 0xbbf   : > { %3811 = shalt.err (!%p3808_p3)
}
 0xbc0   : > { %3599 = dma.vmem_to_hbm [thread:$0]  (%p3991_p5), %s3296_s30, 16, %s3298_s27, %s3285_s26  }
 0xbc1 PF: > { %p3605_p4 = scmp.ge.s32.totalorder %s3846_s24, 2  ;;  %s3309_s2 = sand.u32 1, %s3834_s21  }
 0xbc2   : > { %s3310_s28 = scalar_lea.sflag [#allocation7], %s3309_s2 }
 0xbc3   : > { %p3602_p7 = pnand %p3605_p4, %p3995_p6 }
 0xbc5   : > { %p3603_p8 = pneg %p3602_p7 }
 0xbc7   : > { %3829 = dma.done.wait (%p3603_p8), %s3310_s28, 16  }
 0xbc8   : > { %3831 = vsyncadd (%p3603_p8), %s3310_s28, 4294967280  ;;  %s5722_s24 = sld [smem:[#allocation10_spill]]  ;;  %s5725_s21 = smov %s3838_s22 }
 0xbc9   : > { %s5723_s29 = sld [smem:[#allocation9_spill]] }
 0xbca   : > { %s5724_s23 = sld [smem:[#allocation11_spill]] }
 0xbce   : > { %p26_p9 = scmp.ge.s32.totalorder %s5722_s24, 4  }
 0xbcf   : > { %s5726_s22 = smov %s5723_s29 }
 0xbd0   :  { %28 = sbr.rel (!%p26_p9) target bundleno = 8 (0x8), region = 134 }
 0xbd5   :  { %3315 = vsyncpa [#allocation7], 1 }
 0xbd6   :  { %3317 = vsyncpa [#allocation7 + $0x1], 1 }

</bundles_post_ra>
